<compile_context>
chip_gen: v6e
topology: v6e:2x2x1
jax: 0.10.0
libtpu: 0.0.40
codegen_flags: <defaults>
</compile_context>

<pallas_src>
import functools

import jax
import jax.numpy as jnp
from jax import lax
from jax.experimental import pallas as pl
from jax.experimental.pallas import tpu as pltpu


# ----------------------------------------------------------------------------
# In-kernel helpers.  All activations are (C, H*W) slabs: channels on the
# sublane axis, flattened spatial on the 128-lane axis.
# ----------------------------------------------------------------------------
def _conv3x3(x, w2_ref, b_ref, m_ref, W, HW):
    """3x3 'same' conv as a single MXU matmul.

    x      : (Cin, HW)      f32 activation slab
    w2_ref : (Cout, 9*Cin)  flattened weights (tap-major, then input channel)
    b_ref  : (Cout, 1)
    m_ref  : (9, HW)        0/1 edge-validity masks (one row per tap)
    """
    taps = []
    t = 0
    for dy in (-1, 0, 1):
        for dx in (-1, 0, 1):
            d = (dy * W + dx) % HW
            if d == 0:
                sh = x
            else:
                # lane rotation: sh[:, p] = x[:, (p + dy*W + dx) mod HW]
                sh = jnp.concatenate([x[:, d:], x[:, :d]], axis=1)
            taps.append(sh * m_ref[t:t + 1, :])   # zero the out-of-image taps
            t += 1
    slab = jnp.concatenate(taps, axis=0)          # (9*Cin, HW), sublane concat
    y = jnp.dot(w2_ref[...], slab, preferred_element_type=jnp.float32)
    return y + b_ref[...]


def _gn_swish(x, g_ref, b_ref, ohgc_ref, ohcg_ref, inv_n, eps):
    """GroupNorm (two-pass variance) + swish on a (C, HW) slab."""
    ohgc = ohgc_ref[...]                          # (G, C) one-hot
    ohcg = ohcg_ref[...]                          # (C, G) one-hot
    G = ohgc.shape[0]
    HW = x.shape[1]
    mean_g = jnp.sum(jnp.dot(ohgc, x, preferred_element_type=jnp.float32),
                     axis=1, keepdims=True) * inv_n              # (G, 1)
    mean_c = jnp.dot(ohcg, jnp.broadcast_to(mean_g, (G, HW)),
                     preferred_element_type=jnp.float32)         # (C, HW)
    d = x - mean_c
    var_g = jnp.sum(jnp.dot(ohgc, d * d, preferred_element_type=jnp.float32),
                    axis=1, keepdims=True) * inv_n               # (G, 1)
    istd = jnp.dot(ohcg,
                   jnp.broadcast_to(lax.rsqrt(var_g + eps), (G, HW)),
                   preferred_element_type=jnp.float32)           # (C, HW)
    y = d * istd * g_ref[...] + b_ref[...]
    return y * jax.nn.sigmoid(y)                                 # swish (EUP)


def _make_decoder_kernel(H, W, ch, num_groups, eps):
    HW = H * W
    W2 = 2 * W
    HW2 = 4 * HW
    cg = ch // num_groups
    inv_lo = 1.0 / float(HW * cg)
    inv_hi = 1.0 / float(HW2 * cg)

    def kernel(lat_ref, wpq_ref, bpq_ref, win_ref, bin_ref,
               g1_ref, be1_ref, wr1_ref, br1_ref,
               g2_ref, be2_ref, wr2_ref, br2_ref,
               up_ref, wup_ref, bup_ref, go_ref, beo_ref,
               wout_ref, bout_ref, ohgc_ref, ohcg_ref, mlo_ref, mhi_ref,
               o_ref):
        # latents already in (C, HW) layout == torch .permute(0,2,1).reshape(...)
        x = lat_ref[0].astype(jnp.float32)                       # (Cemb, HW)

        # post_quant_conv (1x1)
        z = jnp.dot(wpq_ref[...], x,
                    preferred_element_type=jnp.float32) + bpq_ref[...]

        # conv_in
        h = _conv3x3(z, win_ref, bin_ref, mlo_ref, W, HW)

        # ResnetBlock: (GN + swish -> conv) x2, identity residual
        r = _gn_swish(h, g1_ref, be1_ref, ohgc_ref, ohcg_ref, inv_lo, eps)
        r = _conv3x3(r, wr1_ref, br1_ref, mlo_ref, W, HW)
        r = _gn_swish(r, g2_ref, be2_ref, ohgc_ref, ohcg_ref, inv_lo, eps)
        r = _conv3x3(r, wr2_ref, br2_ref, mlo_ref, W, HW)
        h = h + r

        # nearest-2x upsample as a one-hot matmul, then up_conv
        h = jnp.dot(h, up_ref[...], preferred_element_type=jnp.float32)  # (ch, HW2)
        h = _conv3x3(h, wup_ref, bup_ref, mhi_ref, W2, HW2)

        # norm_out + swish, conv_out with the "unprocess" x*0.5+0.5 fused
        h = _gn_swish(h, go_ref, beo_ref, ohgc_ref, ohcg_ref, inv_hi, eps)
        pix = _conv3x3(h, wout_ref, bout_ref, mhi_ref, W2, HW2)          # (3, HW2)
        o_ref[0] = (pix * 0.5 + 0.5).astype(o_ref.dtype)                 # lane-dense

    return kernel


# ----------------------------------------------------------------------------
# Wrapper-side constant builders (run once under jit; tiny).
# ----------------------------------------------------------------------------
def _conv_masks(H, W):
    """(9, H*W) 0/1 validity masks for the nine 3x3 taps (zero 'same' padding)."""
    p = jnp.arange(H * W)
    h, w = p // W, p % W
    rows = []
    for dy in (-1, 0, 1):
        for dx in (-1, 0, 1):
            rows.append((h + dy >= 0) & (h + dy < H) & (w + dx >= 0) & (w + dx < W))
    return jnp.stack(rows, axis=0).astype(jnp.float32)


def _upsample_matrix(H, W):
    """(H*W, 4*H*W) one-hot nearest-2x upsample operator (right-multiply)."""
    ho = jnp.arange(2 * H)[:, None]
    wo = jnp.arange(2 * W)[None, :]
    src = ((ho // 2) * W + (wo // 2)).reshape(-1)                 # (4HW,)
    return (jnp.arange(H * W)[:, None] == src[None, :]).astype(jnp.float32)


def _flatten_conv(w):
    """(K, K, Cin, Cout) -> (Cout, K*K*Cin), tap-major then input-channel."""
    K, _, cin, cout = w.shape
    return w.reshape(K * K * cin, cout).T


# ----------------------------------------------------------------------------
# VQ_Decoder.forward (float-latent path).
# ----------------------------------------------------------------------------
def vq_decoder_forward(latents, params, *, reshape_size, num_groups=8, eps=1e-6):
    B, seq, cemb = latents.shape
    H, W = reshape_size
    assert seq == H * W
    ch = params["conv_in"]["w"].shape[-1]
    zch = params["post_quant_conv"]["w"].shape[-1]
    out_ch = params["conv_out"]["w"].shape[-1]
    HW, HW2 = H * W, 4 * H * W

    # torch: latents.permute(0, 2, 1).reshape(B, C, H, W) -> per-sample (C, HW)
    lat_t = jnp.transpose(latents, (0, 2, 1))

    col = lambda v: v.reshape(-1, 1).astype(jnp.float32)
    oh_cg = (jnp.arange(ch)[:, None] // (ch // num_groups)
             == jnp.arange(num_groups)[None, :]).astype(jnp.float32)    # (C, G)

    operands = [
        params["post_quant_conv"]["w"][0, 0].T, col(params["post_quant_conv"]["b"]),
        _flatten_conv(params["conv_in"]["w"]), col(params["conv_in"]["b"]),
        col(params["res_norm1"]["g"]), col(params["res_norm1"]["b"]),
        _flatten_conv(params["res_conv1"]["w"]), col(params["res_conv1"]["b"]),
        col(params["res_norm2"]["g"]), col(params["res_norm2"]["b"]),
        _flatten_conv(params["res_conv2"]["w"]), col(params["res_conv2"]["b"]),
        _upsample_matrix(H, W),
        _flatten_conv(params["up_conv"]["w"]), col(params["up_conv"]["b"]),
        col(params["norm_out"]["g"]), col(params["norm_out"]["b"]),
        _flatten_conv(params["conv_out"]["w"]), col(params["conv_out"]["b"]),
        oh_cg.T, oh_cg,
        _conv_masks(H, W), _conv_masks(2 * H, 2 * W),
    ]

    def full(shape):
        nd = len(shape)
        return pl.BlockSpec(shape, lambda b, _nd=nd: (0,) * _nd)

    in_specs = [pl.BlockSpec((1, cemb, HW), lambda b: (b, 0, 0))]
    in_specs += [full(tuple(op.shape)) for op in operands]

    # Rough cost hint (MXU matmuls dominate).
    mm = lambda m, k, n: 2 * m * k * n
    flops_per = (mm(zch, cemb, HW) + mm(ch, 9 * zch, HW) + 2 * mm(ch, 9 * ch, HW)
                 + mm(ch, HW, HW2) + mm(ch, 9 * ch, HW2) + mm(out_ch, 9 * ch, HW2)
                 + 2 * (2 * mm(num_groups, ch, HW) + 2 * mm(ch, num_groups, HW))
                 + (2 * mm(num_groups, ch, HW2) + 2 * mm(ch, num_groups, HW2)))
    trans_per = 2 * ch * HW + ch * HW2 + 3 * num_groups
    bytes_acc = 4 * (int(latents.size) + B * out_ch * HW2
                     + sum(int(op.size) for op in operands))

    out = pl.pallas_call(
        _make_decoder_kernel(H, W, ch, num_groups, eps),
        out_shape=jax.ShapeDtypeStruct((B, out_ch, HW2), latents.dtype),
        grid=(B,),
        in_specs=in_specs,
        out_specs=pl.BlockSpec((1, out_ch, HW2), lambda b: (b, 0, 0)),
        compiler_params=pltpu.CompilerParams(
            dimension_semantics=("parallel",),
            vmem_limit_bytes=32 * 1024 * 1024),
        cost_estimate=pl.CostEstimate(flops=B * flops_per,
                                      transcendentals=B * trans_per,
                                      bytes_accessed=bytes_acc),
    )(lat_t, *operands)

    # (B, 3, 4*HW) -> NCHW: pure reshape, no transpose / extra HBM pass.
    return out.reshape(B, out_ch, 2 * H, 2 * W)


# ----------------------------------------------------------------------------
# Deterministic parameter init (shapes mirror a tiny VQGAN decoder).
# ----------------------------------------------------------------------------
def init_params(key, *, embed_dim=4, z_ch=4, ch=32, out_ch=3):
    keys = iter(jax.random.split(key, 32))

    def conv(ksz, cin, cout):
        return {"w": jax.random.normal(next(keys), (ksz, ksz, cin, cout), jnp.float32) * 0.05,
                "b": jax.random.normal(next(keys), (cout,), jnp.float32) * 0.1}

    def norm(c):
        return {"g": 1.0 + 0.1 * jax.random.normal(next(keys), (c,), jnp.float32),
                "b": 0.1 * jax.random.normal(next(keys), (c,), jnp.float32)}

    return {
        "post_quant_conv": conv(1, embed_dim, z_ch),
        "conv_in": conv(3, z_ch, ch),
        "res_norm1": norm(ch), "res_conv1": conv(3, ch, ch),
        "res_norm2": norm(ch), "res_conv2": conv(3, ch, ch),
        "up_conv": conv(3, ch, ch),
        "norm_out": norm(ch), "conv_out": conv(3, ch, out_ch),
    }


# ----------------------------------------------------------------------------
# Pure-JAX reference of the same decoder (for correctness verification).
# ----------------------------------------------------------------------------
def _ref_conv(x, w, b):
    dn = lax.conv_dimension_numbers(x.shape, w.shape, ("NHWC", "HWIO", "NHWC"))
    y = lax.conv_general_dilated(x, w, (1, 1), "SAME", dimension_numbers=dn,
                                 precision=lax.Precision.HIGHEST)
    return y + b


def _ref_gn_swish(x, g, b, G, eps):
    B, H, W, C = x.shape
    xg = x.reshape(B, H, W, G, C // G)
    mean = xg.mean(axis=(1, 2, 4), keepdims=True)
    var = jnp.mean((xg - mean) ** 2, axis=(1, 2, 4), keepdims=True)
    y = ((xg - mean) * lax.rsqrt(var + eps)).reshape(B, H, W, C) * g + b
    return y * jax.nn.sigmoid(y)


def vq_decoder_reference(latents, params, *, reshape_size, num_groups=8, eps=1e-6):
    B, seq, C = latents.shape
    H, W = reshape_size
    x = jnp.transpose(latents, (0, 2, 1)).reshape(B, C, H, W)
    x = jnp.transpose(x, (0, 2, 3, 1))                               # NHWC
    x = _ref_conv(x, params["post_quant_conv"]["w"], params["post_quant_conv"]["b"])
    h = _ref_conv(x, params["conv_in"]["w"], params["conv_in"]["b"])
    r = _ref_gn_swish(h, params["res_norm1"]["g"], params["res_norm1"]["b"], num_groups, eps)
    r = _ref_conv(r, params["res_conv1"]["w"], params["res_conv1"]["b"])
    r = _ref_gn_swish(r, params["res_norm2"]["g"], params["res_norm2"]["b"], num_groups, eps)
    r = _ref_conv(r, params["res_conv2"]["w"], params["res_conv2"]["b"])
    h = h + r
    h = jnp.repeat(jnp.repeat(h, 2, axis=1), 2, axis=2)
    h = _ref_conv(h, params["up_conv"]["w"], params["up_conv"]["b"])
    h = _ref_gn_swish(h, params["norm_out"]["g"], params["norm_out"]["b"], num_groups, eps)
    pix = _ref_conv(h, params["conv_out"]["w"], params["conv_out"]["b"]) * 0.5 + 0.5
    return jnp.transpose(pix, (0, 3, 1, 2))                          # NCHW


if __name__ == "__main__":
    key = jax.random.PRNGKey(0)
    k_lat, k_par = jax.random.split(key)

    B, Hlat, Wlat, Cemb = 2, 8, 8, 4
    latents = jax.random.normal(k_lat, (B, Hlat * Wlat, Cemb), jnp.float32)
    params = init_params(k_par, embed_dim=Cemb, z_ch=4, ch=32, out_ch=3)

    fwd = jax.jit(functools.partial(vq_decoder_forward,
                                    reshape_size=(Hlat, Wlat), num_groups=8))
    out = fwd(latents, params)
    jax.block_until_ready(out)
    assert out.shape == (B, 3, 2 * Hlat, 2 * Wlat), out.shape
    assert out.dtype == jnp.float32

    ref = jax.jit(functools.partial(vq_decoder_reference,
                                    reshape_size=(Hlat, Wlat), num_groups=8))(latents, params)
    jax.block_until_ready(ref)
    err = float(jnp.max(jnp.abs(out - ref)))
    assert err < 5e-3, f"max abs error vs pure-JAX reference: {err}"
    print("KERNEL_OK")
</pallas_src>

<mosaic_0001>
module attributes {stable_mosaic.version = 11 : i64} {
  func.func @kernel(%arg0: i32, %arg1: memref<1x4x64xf32, #tpu.memory_space<vmem>>, %arg2: memref<4x4xf32, #tpu.memory_space<vmem>>, %arg3: memref<4x1xf32, #tpu.memory_space<vmem>>, %arg4: memref<32x36xf32, #tpu.memory_space<vmem>>, %arg5: memref<32x1xf32, #tpu.memory_space<vmem>>, %arg6: memref<32x1xf32, #tpu.memory_space<vmem>>, %arg7: memref<32x1xf32, #tpu.memory_space<vmem>>, %arg8: memref<32x288xf32, #tpu.memory_space<vmem>>, %arg9: memref<32x1xf32, #tpu.memory_space<vmem>>, %arg10: memref<32x1xf32, #tpu.memory_space<vmem>>, %arg11: memref<32x1xf32, #tpu.memory_space<vmem>>, %arg12: memref<32x288xf32, #tpu.memory_space<vmem>>, %arg13: memref<32x1xf32, #tpu.memory_space<vmem>>, %arg14: memref<64x256xf32, #tpu.memory_space<vmem>>, %arg15: memref<32x288xf32, #tpu.memory_space<vmem>>, %arg16: memref<32x1xf32, #tpu.memory_space<vmem>>, %arg17: memref<32x1xf32, #tpu.memory_space<vmem>>, %arg18: memref<32x1xf32, #tpu.memory_space<vmem>>, %arg19: memref<3x288xf32, #tpu.memory_space<vmem>>, %arg20: memref<3x1xf32, #tpu.memory_space<vmem>>, %arg21: memref<8x32xf32, #tpu.memory_space<vmem>>, %arg22: memref<32x8xf32, #tpu.memory_space<vmem>>, %arg23: memref<9x64xf32, #tpu.memory_space<vmem>>, %arg24: memref<9x256xf32, #tpu.memory_space<vmem>>, %arg25: memref<1x3x256xf32, #tpu.memory_space<vmem>>) attributes {dimension_semantics = [#tpu.dimension_semantics<parallel>], iteration_bounds = array<i64: 2>, scalar_prefetch = 0 : i64, scratch_operands = 0 : i64, tpu.core_type = #tpu.core_type<tc>, window_params = [{transform_indices = @transform_0, window_bounds = array<i64: 1, 4, 64>}, {pipeline_mode = #tpu.pipeline_mode<synchronous>, transform_indices = @transform_1, window_bounds = array<i64: 4, 4>}, {pipeline_mode = #tpu.pipeline_mode<synchronous>, transform_indices = @transform_2, window_bounds = array<i64: 4, 1>}, {pipeline_mode = #tpu.pipeline_mode<synchronous>, transform_indices = @transform_3, window_bounds = array<i64: 32, 36>}, {pipeline_mode = #tpu.pipeline_mode<synchronous>, transform_indices = @transform_4, window_bounds = array<i64: 32, 1>}, {pipeline_mode = #tpu.pipeline_mode<synchronous>, transform_indices = @transform_5, window_bounds = array<i64: 32, 1>}, {pipeline_mode = #tpu.pipeline_mode<synchronous>, transform_indices = @transform_6, window_bounds = array<i64: 32, 1>}, {pipeline_mode = #tpu.pipeline_mode<synchronous>, transform_indices = @transform_7, window_bounds = array<i64: 32, 288>}, {pipeline_mode = #tpu.pipeline_mode<synchronous>, transform_indices = @transform_8, window_bounds = array<i64: 32, 1>}, {pipeline_mode = #tpu.pipeline_mode<synchronous>, transform_indices = @transform_9, window_bounds = array<i64: 32, 1>}, {pipeline_mode = #tpu.pipeline_mode<synchronous>, transform_indices = @transform_10, window_bounds = array<i64: 32, 1>}, {pipeline_mode = #tpu.pipeline_mode<synchronous>, transform_indices = @transform_11, window_bounds = array<i64: 32, 288>}, {pipeline_mode = #tpu.pipeline_mode<synchronous>, transform_indices = @transform_12, window_bounds = array<i64: 32, 1>}, {pipeline_mode = #tpu.pipeline_mode<synchronous>, transform_indices = @transform_13, window_bounds = array<i64: 64, 256>}, {pipeline_mode = #tpu.pipeline_mode<synchronous>, transform_indices = @transform_14, window_bounds = array<i64: 32, 288>}, {pipeline_mode = #tpu.pipeline_mode<synchronous>, transform_indices = @transform_15, window_bounds = array<i64: 32, 1>}, {pipeline_mode = #tpu.pipeline_mode<synchronous>, transform_indices = @transform_16, window_bounds = array<i64: 32, 1>}, {pipeline_mode = #tpu.pipeline_mode<synchronous>, transform_indices = @transform_17, window_bounds = array<i64: 32, 1>}, {pipeline_mode = #tpu.pipeline_mode<synchronous>, transform_indices = @transform_18, window_bounds = array<i64: 3, 288>}, {pipeline_mode = #tpu.pipeline_mode<synchronous>, transform_indices = @transform_19, window_bounds = array<i64: 3, 1>}, {pipeline_mode = #tpu.pipeline_mode<synchronous>, transform_indices = @transform_20, window_bounds = array<i64: 8, 32>}, {pipeline_mode = #tpu.pipeline_mode<synchronous>, transform_indices = @transform_21, window_bounds = array<i64: 32, 8>}, {pipeline_mode = #tpu.pipeline_mode<synchronous>, transform_indices = @transform_22, window_bounds = array<i64: 9, 64>}, {pipeline_mode = #tpu.pipeline_mode<synchronous>, transform_indices = @transform_23, window_bounds = array<i64: 9, 256>}, {transform_indices = @transform_24, window_bounds = array<i64: 1, 3, 256>}]} {
    %c0 = arith.constant 0 : index
    %c0_0 = arith.constant 0 : index
    %c0_1 = arith.constant 0 : index
    %0 = vector.load %arg1[%c0, %c0_0, %c0_1] : memref<1x4x64xf32, #tpu.memory_space<vmem>>, vector<1x4x64xf32>
    %1 = vector.shape_cast %0 : vector<1x4x64xf32> to vector<4x64xf32>
    %c0_2 = arith.constant 0 : index
    %c0_3 = arith.constant 0 : index
    %2 = vector.load %arg2[%c0_2, %c0_3] : memref<4x4xf32, #tpu.memory_space<vmem>>, vector<4x4xf32>
    %cst = arith.constant dense<0.000000e+00> : vector<4x64xf32>
    %3 = tpu.matmul %2, %1, %cst {dimension_numbers = #tpu.dot_dimension_numbers<[1], [0], [0], [1], [0, 0, 1, 1], [], []>} : vector<4x4xf32>, vector<4x64xf32>, vector<4x64xf32> -> vector<4x64xf32>
    %c0_4 = arith.constant 0 : index
    %c0_5 = arith.constant 0 : index
    %4 = vector.load %arg3[%c0_4, %c0_5] : memref<4x1xf32, #tpu.memory_space<vmem>>, vector<4x1xf32>
    %5 = vector.broadcast %4 : vector<4x1xf32> to vector<4x64xf32>
    %6 = arith.addf %3, %5 : vector<4x64xf32>
    %7 = vector.extract_strided_slice %6 {offsets = [0, 55], sizes = [4, 9], strides = [1, 1]} : vector<4x64xf32> to vector<4x9xf32>
    %8 = vector.extract_strided_slice %6 {offsets = [0, 0], sizes = [4, 55], strides = [1, 1]} : vector<4x64xf32> to vector<4x55xf32>
    %9 = tpu.concatenate %7, %8 in 1 : vector<4x9xf32>, vector<4x55xf32> -> vector<4x64xf32>
    %c0_6 = arith.constant 0 : index
    %c0_7 = arith.constant 0 : index
    %10 = vector.load %arg23[%c0_6, %c0_7] : memref<9x64xf32, #tpu.memory_space<vmem>>, vector<1x64xf32>
    %11 = vector.broadcast %10 : vector<1x64xf32> to vector<4x64xf32>
    %12 = arith.mulf %9, %11 : vector<4x64xf32>
    %13 = vector.extract_strided_slice %6 {offsets = [0, 56], sizes = [4, 8], strides = [1, 1]} : vector<4x64xf32> to vector<4x8xf32>
    %14 = vector.extract_strided_slice %6 {offsets = [0, 0], sizes = [4, 56], strides = [1, 1]} : vector<4x64xf32> to vector<4x56xf32>
    %15 = tpu.concatenate %13, %14 in 1 : vector<4x8xf32>, vector<4x56xf32> -> vector<4x64xf32>
    %c1 = arith.constant 1 : index
    %c0_8 = arith.constant 0 : index
    %16 = vector.load %arg23[%c1, %c0_8] : memref<9x64xf32, #tpu.memory_space<vmem>>, vector<1x64xf32>
    %17 = vector.broadcast %16 : vector<1x64xf32> to vector<4x64xf32>
    %18 = arith.mulf %15, %17 : vector<4x64xf32>
    %19 = vector.extract_strided_slice %6 {offsets = [0, 57], sizes = [4, 7], strides = [1, 1]} : vector<4x64xf32> to vector<4x7xf32>
    %20 = vector.extract_strided_slice %6 {offsets = [0, 0], sizes = [4, 57], strides = [1, 1]} : vector<4x64xf32> to vector<4x57xf32>
    %21 = tpu.concatenate %19, %20 in 1 : vector<4x7xf32>, vector<4x57xf32> -> vector<4x64xf32>
    %c2 = arith.constant 2 : index
    %c0_9 = arith.constant 0 : index
    %22 = vector.load %arg23[%c2, %c0_9] : memref<9x64xf32, #tpu.memory_space<vmem>>, vector<1x64xf32>
    %23 = vector.broadcast %22 : vector<1x64xf32> to vector<4x64xf32>
    %24 = arith.mulf %21, %23 : vector<4x64xf32>
    %25 = vector.extract_strided_slice %6 {offsets = [0, 63], sizes = [4, 1], strides = [1, 1]} : vector<4x64xf32> to vector<4x1xf32>
    %26 = vector.extract_strided_slice %6 {offsets = [0, 0], sizes = [4, 63], strides = [1, 1]} : vector<4x64xf32> to vector<4x63xf32>
    %27 = tpu.concatenate %25, %26 in 1 : vector<4x1xf32>, vector<4x63xf32> -> vector<4x64xf32>
    %c3 = arith.constant 3 : index
    %c0_10 = arith.constant 0 : index
    %28 = vector.load %arg23[%c3, %c0_10] : memref<9x64xf32, #tpu.memory_space<vmem>>, vector<1x64xf32>
    %29 = vector.broadcast %28 : vector<1x64xf32> to vector<4x64xf32>
    %30 = arith.mulf %27, %29 : vector<4x64xf32>
    %c4 = arith.constant 4 : index
    %c0_11 = arith.constant 0 : index
    %31 = vector.load %arg23[%c4, %c0_11] : memref<9x64xf32, #tpu.memory_space<vmem>>, vector<1x64xf32>
    %32 = vector.broadcast %31 : vector<1x64xf32> to vector<4x64xf32>
    %33 = arith.mulf %6, %32 : vector<4x64xf32>
    %34 = vector.extract_strided_slice %6 {offsets = [0, 1], sizes = [4, 63], strides = [1, 1]} : vector<4x64xf32> to vector<4x63xf32>
    %35 = vector.extract_strided_slice %6 {offsets = [0, 0], sizes = [4, 1], strides = [1, 1]} : vector<4x64xf32> to vector<4x1xf32>
    %36 = tpu.concatenate %34, %35 in 1 : vector<4x63xf32>, vector<4x1xf32> -> vector<4x64xf32>
    %c5 = arith.constant 5 : index
    %c0_12 = arith.constant 0 : index
    %37 = vector.load %arg23[%c5, %c0_12] : memref<9x64xf32, #tpu.memory_space<vmem>>, vector<1x64xf32>
    %38 = vector.broadcast %37 : vector<1x64xf32> to vector<4x64xf32>
    %39 = arith.mulf %36, %38 : vector<4x64xf32>
    %40 = vector.extract_strided_slice %6 {offsets = [0, 7], sizes = [4, 57], strides = [1, 1]} : vector<4x64xf32> to vector<4x57xf32>
    %41 = vector.extract_strided_slice %6 {offsets = [0, 0], sizes = [4, 7], strides = [1, 1]} : vector<4x64xf32> to vector<4x7xf32>
    %42 = tpu.concatenate %40, %41 in 1 : vector<4x57xf32>, vector<4x7xf32> -> vector<4x64xf32>
    %c6 = arith.constant 6 : index
    %c0_13 = arith.constant 0 : index
    %43 = vector.load %arg23[%c6, %c0_13] : memref<9x64xf32, #tpu.memory_space<vmem>>, vector<1x64xf32>
    %44 = vector.broadcast %43 : vector<1x64xf32> to vector<4x64xf32>
    %45 = arith.mulf %42, %44 : vector<4x64xf32>
    %46 = vector.extract_strided_slice %6 {offsets = [0, 8], sizes = [4, 56], strides = [1, 1]} : vector<4x64xf32> to vector<4x56xf32>
    %47 = vector.extract_strided_slice %6 {offsets = [0, 0], sizes = [4, 8], strides = [1, 1]} : vector<4x64xf32> to vector<4x8xf32>
    %48 = tpu.concatenate %46, %47 in 1 : vector<4x56xf32>, vector<4x8xf32> -> vector<4x64xf32>
    %c7 = arith.constant 7 : index
    %c0_14 = arith.constant 0 : index
    %49 = vector.load %arg23[%c7, %c0_14] : memref<9x64xf32, #tpu.memory_space<vmem>>, vector<1x64xf32>
    %50 = vector.broadcast %49 : vector<1x64xf32> to vector<4x64xf32>
    %51 = arith.mulf %48, %50 : vector<4x64xf32>
    %52 = vector.extract_strided_slice %6 {offsets = [0, 9], sizes = [4, 55], strides = [1, 1]} : vector<4x64xf32> to vector<4x55xf32>
    %53 = vector.extract_strided_slice %6 {offsets = [0, 0], sizes = [4, 9], strides = [1, 1]} : vector<4x64xf32> to vector<4x9xf32>
    %54 = tpu.concatenate %52, %53 in 1 : vector<4x55xf32>, vector<4x9xf32> -> vector<4x64xf32>
    %c8 = arith.constant 8 : index
    %c0_15 = arith.constant 0 : index
    %55 = vector.load %arg23[%c8, %c0_15] : memref<9x64xf32, #tpu.memory_space<vmem>>, vector<1x64xf32>
    %56 = vector.broadcast %55 : vector<1x64xf32> to vector<4x64xf32>
    %57 = arith.mulf %54, %56 : vector<4x64xf32>
    %58 = tpu.concatenate %12, %18, %24, %30, %33, %39, %45, %51, %57 in 0 : vector<4x64xf32>, vector<4x64xf32>, vector<4x64xf32>, vector<4x64xf32>, vector<4x64xf32>, vector<4x64xf32>, vector<4x64xf32>, vector<4x64xf32>, vector<4x64xf32> -> vector<36x64xf32>
    %c0_16 = arith.constant 0 : index
    %c0_17 = arith.constant 0 : index
    %59 = vector.load %arg4[%c0_16, %c0_17] : memref<32x36xf32, #tpu.memory_space<vmem>>, vector<32x36xf32>
    %cst_18 = arith.constant dense<0.000000e+00> : vector<32x64xf32>
    %60 = tpu.matmul %59, %58, %cst_18 {dimension_numbers = #tpu.dot_dimension_numbers<[1], [0], [0], [1], [0, 0, 1, 1], [], []>} : vector<32x36xf32>, vector<36x64xf32>, vector<32x64xf32> -> vector<32x64xf32>
    %c0_19 = arith.constant 0 : index
    %c0_20 = arith.constant 0 : index
    %61 = vector.load %arg5[%c0_19, %c0_20] : memref<32x1xf32, #tpu.memory_space<vmem>>, vector<32x1xf32>
    %62 = vector.broadcast %61 : vector<32x1xf32> to vector<32x64xf32>
    %63 = arith.addf %60, %62 : vector<32x64xf32>
    %c0_21 = arith.constant 0 : index
    %c0_22 = arith.constant 0 : index
    %64 = vector.load %arg21[%c0_21, %c0_22] : memref<8x32xf32, #tpu.memory_space<vmem>>, vector<8x32xf32>
    %c0_23 = arith.constant 0 : index
    %c0_24 = arith.constant 0 : index
    %65 = vector.load %arg22[%c0_23, %c0_24] : memref<32x8xf32, #tpu.memory_space<vmem>>, vector<32x8xf32>
    %cst_25 = arith.constant dense<0.000000e+00> : vector<8x64xf32>
    %66 = tpu.matmul %64, %63, %cst_25 {dimension_numbers = #tpu.dot_dimension_numbers<[1], [0], [0], [1], [0, 0, 1, 1], [], []>} : vector<8x32xf32>, vector<32x64xf32>, vector<8x64xf32> -> vector<8x64xf32>
    %cst_26 = arith.constant dense<0.000000e+00> : vector<8xf32>
    %67 = vector.multi_reduction <add>, %66, %cst_26 [1] : vector<8x64xf32> to vector<8xf32>
    %68 = vector.shape_cast %67 : vector<8xf32> to vector<8x1xf32>
    %cst_27 = arith.constant 3.906250e-03 : f32
    %69 = vector.broadcast %cst_27 : f32 to vector<8x1xf32>
    %70 = arith.mulf %68, %69 : vector<8x1xf32>
    %71 = vector.shape_cast %70 : vector<8x1xf32> to vector<8x1xf32>
    %72 = vector.broadcast %71 : vector<8x1xf32> to vector<8x64xf32>
    %cst_28 = arith.constant dense<0.000000e+00> : vector<32x64xf32>
    %73 = tpu.matmul %65, %72, %cst_28 {dimension_numbers = #tpu.dot_dimension_numbers<[1], [0], [0], [1], [0, 0, 1, 1], [], []>} : vector<32x8xf32>, vector<8x64xf32>, vector<32x64xf32> -> vector<32x64xf32>
    %74 = arith.subf %63, %73 : vector<32x64xf32>
    %75 = arith.mulf %74, %74 : vector<32x64xf32>
    %cst_29 = arith.constant dense<0.000000e+00> : vector<8x64xf32>
    %76 = tpu.matmul %64, %75, %cst_29 {dimension_numbers = #tpu.dot_dimension_numbers<[1], [0], [0], [1], [0, 0, 1, 1], [], []>} : vector<8x32xf32>, vector<32x64xf32>, vector<8x64xf32> -> vector<8x64xf32>
    %cst_30 = arith.constant dense<0.000000e+00> : vector<8xf32>
    %77 = vector.multi_reduction <add>, %76, %cst_30 [1] : vector<8x64xf32> to vector<8xf32>
    %78 = vector.shape_cast %77 : vector<8xf32> to vector<8x1xf32>
    %cst_31 = arith.constant 3.906250e-03 : f32
    %79 = vector.broadcast %cst_31 : f32 to vector<8x1xf32>
    %80 = arith.mulf %78, %79 : vector<8x1xf32>
    %cst_32 = arith.constant 9.99999997E-7 : f32
    %81 = vector.broadcast %cst_32 : f32 to vector<8x1xf32>
    %82 = arith.addf %80, %81 : vector<8x1xf32>
    %83 = math.rsqrt %82 : vector<8x1xf32>
    %84 = vector.shape_cast %83 : vector<8x1xf32> to vector<8x1xf32>
    %85 = vector.broadcast %84 : vector<8x1xf32> to vector<8x64xf32>
    %cst_33 = arith.constant dense<0.000000e+00> : vector<32x64xf32>
    %86 = tpu.matmul %65, %85, %cst_33 {dimension_numbers = #tpu.dot_dimension_numbers<[1], [0], [0], [1], [0, 0, 1, 1], [], []>} : vector<32x8xf32>, vector<8x64xf32>, vector<32x64xf32> -> vector<32x64xf32>
    %87 = arith.mulf %74, %86 : vector<32x64xf32>
    %c0_34 = arith.constant 0 : index
    %c0_35 = arith.constant 0 : index
    %88 = vector.load %arg6[%c0_34, %c0_35] : memref<32x1xf32, #tpu.memory_space<vmem>>, vector<32x1xf32>
    %89 = vector.broadcast %88 : vector<32x1xf32> to vector<32x64xf32>
    %90 = arith.mulf %87, %89 : vector<32x64xf32>
    %c0_36 = arith.constant 0 : index
    %c0_37 = arith.constant 0 : index
    %91 = vector.load %arg7[%c0_36, %c0_37] : memref<32x1xf32, #tpu.memory_space<vmem>>, vector<32x1xf32>
    %92 = vector.broadcast %91 : vector<32x1xf32> to vector<32x64xf32>
    %93 = arith.addf %90, %92 : vector<32x64xf32>
    %94 = arith.negf %93 : vector<32x64xf32>
    %95 = math.exp %94 : vector<32x64xf32>
    %cst_38 = arith.constant 1.000000e+00 : f32
    %96 = vector.broadcast %cst_38 : f32 to vector<32x64xf32>
    %97 = arith.addf %96, %95 : vector<32x64xf32>
    %98 = arith.divf %96, %97 : vector<32x64xf32>
    %99 = arith.mulf %93, %98 : vector<32x64xf32>
    %100 = vector.extract_strided_slice %99 {offsets = [0, 55], sizes = [32, 9], strides = [1, 1]} : vector<32x64xf32> to vector<32x9xf32>
    %101 = vector.extract_strided_slice %99 {offsets = [0, 0], sizes = [32, 55], strides = [1, 1]} : vector<32x64xf32> to vector<32x55xf32>
    %102 = tpu.concatenate %100, %101 in 1 : vector<32x9xf32>, vector<32x55xf32> -> vector<32x64xf32>
    %c0_39 = arith.constant 0 : index
    %c0_40 = arith.constant 0 : index
    %103 = vector.load %arg23[%c0_39, %c0_40] : memref<9x64xf32, #tpu.memory_space<vmem>>, vector<1x64xf32>
    %104 = vector.broadcast %103 : vector<1x64xf32> to vector<32x64xf32>
    %105 = arith.mulf %102, %104 : vector<32x64xf32>
    %106 = vector.extract_strided_slice %99 {offsets = [0, 56], sizes = [32, 8], strides = [1, 1]} : vector<32x64xf32> to vector<32x8xf32>
    %107 = vector.extract_strided_slice %99 {offsets = [0, 0], sizes = [32, 56], strides = [1, 1]} : vector<32x64xf32> to vector<32x56xf32>
    %108 = tpu.concatenate %106, %107 in 1 : vector<32x8xf32>, vector<32x56xf32> -> vector<32x64xf32>
    %c1_41 = arith.constant 1 : index
    %c0_42 = arith.constant 0 : index
    %109 = vector.load %arg23[%c1_41, %c0_42] : memref<9x64xf32, #tpu.memory_space<vmem>>, vector<1x64xf32>
    %110 = vector.broadcast %109 : vector<1x64xf32> to vector<32x64xf32>
    %111 = arith.mulf %108, %110 : vector<32x64xf32>
    %112 = vector.extract_strided_slice %99 {offsets = [0, 57], sizes = [32, 7], strides = [1, 1]} : vector<32x64xf32> to vector<32x7xf32>
    %113 = vector.extract_strided_slice %99 {offsets = [0, 0], sizes = [32, 57], strides = [1, 1]} : vector<32x64xf32> to vector<32x57xf32>
    %114 = tpu.concatenate %112, %113 in 1 : vector<32x7xf32>, vector<32x57xf32> -> vector<32x64xf32>
    %c2_43 = arith.constant 2 : index
    %c0_44 = arith.constant 0 : index
    %115 = vector.load %arg23[%c2_43, %c0_44] : memref<9x64xf32, #tpu.memory_space<vmem>>, vector<1x64xf32>
    %116 = vector.broadcast %115 : vector<1x64xf32> to vector<32x64xf32>
    %117 = arith.mulf %114, %116 : vector<32x64xf32>
    %118 = vector.extract_strided_slice %99 {offsets = [0, 63], sizes = [32, 1], strides = [1, 1]} : vector<32x64xf32> to vector<32x1xf32>
    %119 = vector.extract_strided_slice %99 {offsets = [0, 0], sizes = [32, 63], strides = [1, 1]} : vector<32x64xf32> to vector<32x63xf32>
    %120 = tpu.concatenate %118, %119 in 1 : vector<32x1xf32>, vector<32x63xf32> -> vector<32x64xf32>
    %c3_45 = arith.constant 3 : index
    %c0_46 = arith.constant 0 : index
    %121 = vector.load %arg23[%c3_45, %c0_46] : memref<9x64xf32, #tpu.memory_space<vmem>>, vector<1x64xf32>
    %122 = vector.broadcast %121 : vector<1x64xf32> to vector<32x64xf32>
    %123 = arith.mulf %120, %122 : vector<32x64xf32>
    %c4_47 = arith.constant 4 : index
    %c0_48 = arith.constant 0 : index
    %124 = vector.load %arg23[%c4_47, %c0_48] : memref<9x64xf32, #tpu.memory_space<vmem>>, vector<1x64xf32>
    %125 = vector.broadcast %124 : vector<1x64xf32> to vector<32x64xf32>
    %126 = arith.mulf %99, %125 : vector<32x64xf32>
    %127 = vector.extract_strided_slice %99 {offsets = [0, 1], sizes = [32, 63], strides = [1, 1]} : vector<32x64xf32> to vector<32x63xf32>
    %128 = vector.extract_strided_slice %99 {offsets = [0, 0], sizes = [32, 1], strides = [1, 1]} : vector<32x64xf32> to vector<32x1xf32>
    %129 = tpu.concatenate %127, %128 in 1 : vector<32x63xf32>, vector<32x1xf32> -> vector<32x64xf32>
    %c5_49 = arith.constant 5 : index
    %c0_50 = arith.constant 0 : index
    %130 = vector.load %arg23[%c5_49, %c0_50] : memref<9x64xf32, #tpu.memory_space<vmem>>, vector<1x64xf32>
    %131 = vector.broadcast %130 : vector<1x64xf32> to vector<32x64xf32>
    %132 = arith.mulf %129, %131 : vector<32x64xf32>
    %133 = vector.extract_strided_slice %99 {offsets = [0, 7], sizes = [32, 57], strides = [1, 1]} : vector<32x64xf32> to vector<32x57xf32>
    %134 = vector.extract_strided_slice %99 {offsets = [0, 0], sizes = [32, 7], strides = [1, 1]} : vector<32x64xf32> to vector<32x7xf32>
    %135 = tpu.concatenate %133, %134 in 1 : vector<32x57xf32>, vector<32x7xf32> -> vector<32x64xf32>
    %c6_51 = arith.constant 6 : index
    %c0_52 = arith.constant 0 : index
    %136 = vector.load %arg23[%c6_51, %c0_52] : memref<9x64xf32, #tpu.memory_space<vmem>>, vector<1x64xf32>
    %137 = vector.broadcast %136 : vector<1x64xf32> to vector<32x64xf32>
    %138 = arith.mulf %135, %137 : vector<32x64xf32>
    %139 = vector.extract_strided_slice %99 {offsets = [0, 8], sizes = [32, 56], strides = [1, 1]} : vector<32x64xf32> to vector<32x56xf32>
    %140 = vector.extract_strided_slice %99 {offsets = [0, 0], sizes = [32, 8], strides = [1, 1]} : vector<32x64xf32> to vector<32x8xf32>
    %141 = tpu.concatenate %139, %140 in 1 : vector<32x56xf32>, vector<32x8xf32> -> vector<32x64xf32>
    %c7_53 = arith.constant 7 : index
    %c0_54 = arith.constant 0 : index
    %142 = vector.load %arg23[%c7_53, %c0_54] : memref<9x64xf32, #tpu.memory_space<vmem>>, vector<1x64xf32>
    %143 = vector.broadcast %142 : vector<1x64xf32> to vector<32x64xf32>
    %144 = arith.mulf %141, %143 : vector<32x64xf32>
    %145 = vector.extract_strided_slice %99 {offsets = [0, 9], sizes = [32, 55], strides = [1, 1]} : vector<32x64xf32> to vector<32x55xf32>
    %146 = vector.extract_strided_slice %99 {offsets = [0, 0], sizes = [32, 9], strides = [1, 1]} : vector<32x64xf32> to vector<32x9xf32>
    %147 = tpu.concatenate %145, %146 in 1 : vector<32x55xf32>, vector<32x9xf32> -> vector<32x64xf32>
    %c8_55 = arith.constant 8 : index
    %c0_56 = arith.constant 0 : index
    %148 = vector.load %arg23[%c8_55, %c0_56] : memref<9x64xf32, #tpu.memory_space<vmem>>, vector<1x64xf32>
    %149 = vector.broadcast %148 : vector<1x64xf32> to vector<32x64xf32>
    %150 = arith.mulf %147, %149 : vector<32x64xf32>
    %151 = tpu.concatenate %105, %111, %117, %123, %126, %132, %138, %144, %150 in 0 : vector<32x64xf32>, vector<32x64xf32>, vector<32x64xf32>, vector<32x64xf32>, vector<32x64xf32>, vector<32x64xf32>, vector<32x64xf32>, vector<32x64xf32>, vector<32x64xf32> -> vector<288x64xf32>
    %c0_57 = arith.constant 0 : index
    %c0_58 = arith.constant 0 : index
    %152 = vector.load %arg8[%c0_57, %c0_58] : memref<32x288xf32, #tpu.memory_space<vmem>>, vector<32x288xf32>
    %cst_59 = arith.constant dense<0.000000e+00> : vector<32x64xf32>
    %153 = tpu.matmul %152, %151, %cst_59 {dimension_numbers = #tpu.dot_dimension_numbers<[1], [0], [0], [1], [0, 0, 1, 1], [], []>} : vector<32x288xf32>, vector<288x64xf32>, vector<32x64xf32> -> vector<32x64xf32>
    %c0_60 = arith.constant 0 : index
    %c0_61 = arith.constant 0 : index
    %154 = vector.load %arg9[%c0_60, %c0_61] : memref<32x1xf32, #tpu.memory_space<vmem>>, vector<32x1xf32>
    %155 = vector.broadcast %154 : vector<32x1xf32> to vector<32x64xf32>
    %156 = arith.addf %153, %155 : vector<32x64xf32>
    %c0_62 = arith.constant 0 : index
    %c0_63 = arith.constant 0 : index
    %157 = vector.load %arg21[%c0_62, %c0_63] : memref<8x32xf32, #tpu.memory_space<vmem>>, vector<8x32xf32>
    %c0_64 = arith.constant 0 : index
    %c0_65 = arith.constant 0 : index
    %158 = vector.load %arg22[%c0_64, %c0_65] : memref<32x8xf32, #tpu.memory_space<vmem>>, vector<32x8xf32>
    %cst_66 = arith.constant dense<0.000000e+00> : vector<8x64xf32>
    %159 = tpu.matmul %157, %156, %cst_66 {dimension_numbers = #tpu.dot_dimension_numbers<[1], [0], [0], [1], [0, 0, 1, 1], [], []>} : vector<8x32xf32>, vector<32x64xf32>, vector<8x64xf32> -> vector<8x64xf32>
    %cst_67 = arith.constant dense<0.000000e+00> : vector<8xf32>
    %160 = vector.multi_reduction <add>, %159, %cst_67 [1] : vector<8x64xf32> to vector<8xf32>
    %161 = vector.shape_cast %160 : vector<8xf32> to vector<8x1xf32>
    %cst_68 = arith.constant 3.906250e-03 : f32
    %162 = vector.broadcast %cst_68 : f32 to vector<8x1xf32>
    %163 = arith.mulf %161, %162 : vector<8x1xf32>
    %164 = vector.shape_cast %163 : vector<8x1xf32> to vector<8x1xf32>
    %165 = vector.broadcast %164 : vector<8x1xf32> to vector<8x64xf32>
    %cst_69 = arith.constant dense<0.000000e+00> : vector<32x64xf32>
    %166 = tpu.matmul %158, %165, %cst_69 {dimension_numbers = #tpu.dot_dimension_numbers<[1], [0], [0], [1], [0, 0, 1, 1], [], []>} : vector<32x8xf32>, vector<8x64xf32>, vector<32x64xf32> -> vector<32x64xf32>
    %167 = arith.subf %156, %166 : vector<32x64xf32>
    %168 = arith.mulf %167, %167 : vector<32x64xf32>
    %cst_70 = arith.constant dense<0.000000e+00> : vector<8x64xf32>
    %169 = tpu.matmul %157, %168, %cst_70 {dimension_numbers = #tpu.dot_dimension_numbers<[1], [0], [0], [1], [0, 0, 1, 1], [], []>} : vector<8x32xf32>, vector<32x64xf32>, vector<8x64xf32> -> vector<8x64xf32>
    %cst_71 = arith.constant dense<0.000000e+00> : vector<8xf32>
    %170 = vector.multi_reduction <add>, %169, %cst_71 [1] : vector<8x64xf32> to vector<8xf32>
    %171 = vector.shape_cast %170 : vector<8xf32> to vector<8x1xf32>
    %cst_72 = arith.constant 3.906250e-03 : f32
    %172 = vector.broadcast %cst_72 : f32 to vector<8x1xf32>
    %173 = arith.mulf %171, %172 : vector<8x1xf32>
    %cst_73 = arith.constant 9.99999997E-7 : f32
    %174 = vector.broadcast %cst_73 : f32 to vector<8x1xf32>
    %175 = arith.addf %173, %174 : vector<8x1xf32>
    %176 = math.rsqrt %175 : vector<8x1xf32>
    %177 = vector.shape_cast %176 : vector<8x1xf32> to vector<8x1xf32>
    %178 = vector.broadcast %177 : vector<8x1xf32> to vector<8x64xf32>
    %cst_74 = arith.constant dense<0.000000e+00> : vector<32x64xf32>
    %179 = tpu.matmul %158, %178, %cst_74 {dimension_numbers = #tpu.dot_dimension_numbers<[1], [0], [0], [1], [0, 0, 1, 1], [], []>} : vector<32x8xf32>, vector<8x64xf32>, vector<32x64xf32> -> vector<32x64xf32>
    %180 = arith.mulf %167, %179 : vector<32x64xf32>
    %c0_75 = arith.constant 0 : index
    %c0_76 = arith.constant 0 : index
    %181 = vector.load %arg10[%c0_75, %c0_76] : memref<32x1xf32, #tpu.memory_space<vmem>>, vector<32x1xf32>
    %182 = vector.broadcast %181 : vector<32x1xf32> to vector<32x64xf32>
    %183 = arith.mulf %180, %182 : vector<32x64xf32>
    %c0_77 = arith.constant 0 : index
    %c0_78 = arith.constant 0 : index
    %184 = vector.load %arg11[%c0_77, %c0_78] : memref<32x1xf32, #tpu.memory_space<vmem>>, vector<32x1xf32>
    %185 = vector.broadcast %184 : vector<32x1xf32> to vector<32x64xf32>
    %186 = arith.addf %183, %185 : vector<32x64xf32>
    %187 = arith.negf %186 : vector<32x64xf32>
    %188 = math.exp %187 : vector<32x64xf32>
    %cst_79 = arith.constant 1.000000e+00 : f32
    %189 = vector.broadcast %cst_79 : f32 to vector<32x64xf32>
    %190 = arith.addf %189, %188 : vector<32x64xf32>
    %191 = arith.divf %189, %190 : vector<32x64xf32>
    %192 = arith.mulf %186, %191 : vector<32x64xf32>
    %193 = vector.extract_strided_slice %192 {offsets = [0, 55], sizes = [32, 9], strides = [1, 1]} : vector<32x64xf32> to vector<32x9xf32>
    %194 = vector.extract_strided_slice %192 {offsets = [0, 0], sizes = [32, 55], strides = [1, 1]} : vector<32x64xf32> to vector<32x55xf32>
    %195 = tpu.concatenate %193, %194 in 1 : vector<32x9xf32>, vector<32x55xf32> -> vector<32x64xf32>
    %c0_80 = arith.constant 0 : index
    %c0_81 = arith.constant 0 : index
    %196 = vector.load %arg23[%c0_80, %c0_81] : memref<9x64xf32, #tpu.memory_space<vmem>>, vector<1x64xf32>
    %197 = vector.broadcast %196 : vector<1x64xf32> to vector<32x64xf32>
    %198 = arith.mulf %195, %197 : vector<32x64xf32>
    %199 = vector.extract_strided_slice %192 {offsets = [0, 56], sizes = [32, 8], strides = [1, 1]} : vector<32x64xf32> to vector<32x8xf32>
    %200 = vector.extract_strided_slice %192 {offsets = [0, 0], sizes = [32, 56], strides = [1, 1]} : vector<32x64xf32> to vector<32x56xf32>
    %201 = tpu.concatenate %199, %200 in 1 : vector<32x8xf32>, vector<32x56xf32> -> vector<32x64xf32>
    %c1_82 = arith.constant 1 : index
    %c0_83 = arith.constant 0 : index
    %202 = vector.load %arg23[%c1_82, %c0_83] : memref<9x64xf32, #tpu.memory_space<vmem>>, vector<1x64xf32>
    %203 = vector.broadcast %202 : vector<1x64xf32> to vector<32x64xf32>
    %204 = arith.mulf %201, %203 : vector<32x64xf32>
    %205 = vector.extract_strided_slice %192 {offsets = [0, 57], sizes = [32, 7], strides = [1, 1]} : vector<32x64xf32> to vector<32x7xf32>
    %206 = vector.extract_strided_slice %192 {offsets = [0, 0], sizes = [32, 57], strides = [1, 1]} : vector<32x64xf32> to vector<32x57xf32>
    %207 = tpu.concatenate %205, %206 in 1 : vector<32x7xf32>, vector<32x57xf32> -> vector<32x64xf32>
    %c2_84 = arith.constant 2 : index
    %c0_85 = arith.constant 0 : index
    %208 = vector.load %arg23[%c2_84, %c0_85] : memref<9x64xf32, #tpu.memory_space<vmem>>, vector<1x64xf32>
    %209 = vector.broadcast %208 : vector<1x64xf32> to vector<32x64xf32>
    %210 = arith.mulf %207, %209 : vector<32x64xf32>
    %211 = vector.extract_strided_slice %192 {offsets = [0, 63], sizes = [32, 1], strides = [1, 1]} : vector<32x64xf32> to vector<32x1xf32>
    %212 = vector.extract_strided_slice %192 {offsets = [0, 0], sizes = [32, 63], strides = [1, 1]} : vector<32x64xf32> to vector<32x63xf32>
    %213 = tpu.concatenate %211, %212 in 1 : vector<32x1xf32>, vector<32x63xf32> -> vector<32x64xf32>
    %c3_86 = arith.constant 3 : index
    %c0_87 = arith.constant 0 : index
    %214 = vector.load %arg23[%c3_86, %c0_87] : memref<9x64xf32, #tpu.memory_space<vmem>>, vector<1x64xf32>
    %215 = vector.broadcast %214 : vector<1x64xf32> to vector<32x64xf32>
    %216 = arith.mulf %213, %215 : vector<32x64xf32>
    %c4_88 = arith.constant 4 : index
    %c0_89 = arith.constant 0 : index
    %217 = vector.load %arg23[%c4_88, %c0_89] : memref<9x64xf32, #tpu.memory_space<vmem>>, vector<1x64xf32>
    %218 = vector.broadcast %217 : vector<1x64xf32> to vector<32x64xf32>
    %219 = arith.mulf %192, %218 : vector<32x64xf32>
    %220 = vector.extract_strided_slice %192 {offsets = [0, 1], sizes = [32, 63], strides = [1, 1]} : vector<32x64xf32> to vector<32x63xf32>
    %221 = vector.extract_strided_slice %192 {offsets = [0, 0], sizes = [32, 1], strides = [1, 1]} : vector<32x64xf32> to vector<32x1xf32>
    %222 = tpu.concatenate %220, %221 in 1 : vector<32x63xf32>, vector<32x1xf32> -> vector<32x64xf32>
    %c5_90 = arith.constant 5 : index
    %c0_91 = arith.constant 0 : index
    %223 = vector.load %arg23[%c5_90, %c0_91] : memref<9x64xf32, #tpu.memory_space<vmem>>, vector<1x64xf32>
    %224 = vector.broadcast %223 : vector<1x64xf32> to vector<32x64xf32>
    %225 = arith.mulf %222, %224 : vector<32x64xf32>
    %226 = vector.extract_strided_slice %192 {offsets = [0, 7], sizes = [32, 57], strides = [1, 1]} : vector<32x64xf32> to vector<32x57xf32>
    %227 = vector.extract_strided_slice %192 {offsets = [0, 0], sizes = [32, 7], strides = [1, 1]} : vector<32x64xf32> to vector<32x7xf32>
    %228 = tpu.concatenate %226, %227 in 1 : vector<32x57xf32>, vector<32x7xf32> -> vector<32x64xf32>
    %c6_92 = arith.constant 6 : index
    %c0_93 = arith.constant 0 : index
    %229 = vector.load %arg23[%c6_92, %c0_93] : memref<9x64xf32, #tpu.memory_space<vmem>>, vector<1x64xf32>
    %230 = vector.broadcast %229 : vector<1x64xf32> to vector<32x64xf32>
    %231 = arith.mulf %228, %230 : vector<32x64xf32>
    %232 = vector.extract_strided_slice %192 {offsets = [0, 8], sizes = [32, 56], strides = [1, 1]} : vector<32x64xf32> to vector<32x56xf32>
    %233 = vector.extract_strided_slice %192 {offsets = [0, 0], sizes = [32, 8], strides = [1, 1]} : vector<32x64xf32> to vector<32x8xf32>
    %234 = tpu.concatenate %232, %233 in 1 : vector<32x56xf32>, vector<32x8xf32> -> vector<32x64xf32>
    %c7_94 = arith.constant 7 : index
    %c0_95 = arith.constant 0 : index
    %235 = vector.load %arg23[%c7_94, %c0_95] : memref<9x64xf32, #tpu.memory_space<vmem>>, vector<1x64xf32>
    %236 = vector.broadcast %235 : vector<1x64xf32> to vector<32x64xf32>
    %237 = arith.mulf %234, %236 : vector<32x64xf32>
    %238 = vector.extract_strided_slice %192 {offsets = [0, 9], sizes = [32, 55], strides = [1, 1]} : vector<32x64xf32> to vector<32x55xf32>
    %239 = vector.extract_strided_slice %192 {offsets = [0, 0], sizes = [32, 9], strides = [1, 1]} : vector<32x64xf32> to vector<32x9xf32>
    %240 = tpu.concatenate %238, %239 in 1 : vector<32x55xf32>, vector<32x9xf32> -> vector<32x64xf32>
    %c8_96 = arith.constant 8 : index
    %c0_97 = arith.constant 0 : index
    %241 = vector.load %arg23[%c8_96, %c0_97] : memref<9x64xf32, #tpu.memory_space<vmem>>, vector<1x64xf32>
    %242 = vector.broadcast %241 : vector<1x64xf32> to vector<32x64xf32>
    %243 = arith.mulf %240, %242 : vector<32x64xf32>
    %244 = tpu.concatenate %198, %204, %210, %216, %219, %225, %231, %237, %243 in 0 : vector<32x64xf32>, vector<32x64xf32>, vector<32x64xf32>, vector<32x64xf32>, vector<32x64xf32>, vector<32x64xf32>, vector<32x64xf32>, vector<32x64xf32>, vector<32x64xf32> -> vector<288x64xf32>
    %c0_98 = arith.constant 0 : index
    %c0_99 = arith.constant 0 : index
    %245 = vector.load %arg12[%c0_98, %c0_99] : memref<32x288xf32, #tpu.memory_space<vmem>>, vector<32x288xf32>
    %cst_100 = arith.constant dense<0.000000e+00> : vector<32x64xf32>
    %246 = tpu.matmul %245, %244, %cst_100 {dimension_numbers = #tpu.dot_dimension_numbers<[1], [0], [0], [1], [0, 0, 1, 1], [], []>} : vector<32x288xf32>, vector<288x64xf32>, vector<32x64xf32> -> vector<32x64xf32>
    %c0_101 = arith.constant 0 : index
    %c0_102 = arith.constant 0 : index
    %247 = vector.load %arg13[%c0_101, %c0_102] : memref<32x1xf32, #tpu.memory_space<vmem>>, vector<32x1xf32>
    %248 = vector.broadcast %247 : vector<32x1xf32> to vector<32x64xf32>
    %249 = arith.addf %246, %248 : vector<32x64xf32>
    %250 = arith.addf %63, %249 : vector<32x64xf32>
    %c0_103 = arith.constant 0 : index
    %c0_104 = arith.constant 0 : index
    %251 = vector.load %arg14[%c0_103, %c0_104] : memref<64x256xf32, #tpu.memory_space<vmem>>, vector<64x256xf32>
    %cst_105 = arith.constant dense<0.000000e+00> : vector<32x256xf32>
    %252 = tpu.matmul %250, %251, %cst_105 {dimension_numbers = #tpu.dot_dimension_numbers<[1], [0], [0], [1], [0, 0, 1, 1], [], []>} : vector<32x64xf32>, vector<64x256xf32>, vector<32x256xf32> -> vector<32x256xf32>
    %253 = vector.extract_strided_slice %252 {offsets = [0, 239], sizes = [32, 17], strides = [1, 1]} : vector<32x256xf32> to vector<32x17xf32>
    %254 = vector.extract_strided_slice %252 {offsets = [0, 0], sizes = [32, 239], strides = [1, 1]} : vector<32x256xf32> to vector<32x239xf32>
    %255 = tpu.concatenate %253, %254 in 1 : vector<32x17xf32>, vector<32x239xf32> -> vector<32x256xf32>
    %c0_106 = arith.constant 0 : index
    %c0_107 = arith.constant 0 : index
    %256 = vector.load %arg24[%c0_106, %c0_107] : memref<9x256xf32, #tpu.memory_space<vmem>>, vector<1x256xf32>
    %257 = vector.broadcast %256 : vector<1x256xf32> to vector<32x256xf32>
    %258 = arith.mulf %255, %257 : vector<32x256xf32>
    %259 = vector.extract_strided_slice %252 {offsets = [0, 240], sizes = [32, 16], strides = [1, 1]} : vector<32x256xf32> to vector<32x16xf32>
    %260 = vector.extract_strided_slice %252 {offsets = [0, 0], sizes = [32, 240], strides = [1, 1]} : vector<32x256xf32> to vector<32x240xf32>
    %261 = tpu.concatenate %259, %260 in 1 : vector<32x16xf32>, vector<32x240xf32> -> vector<32x256xf32>
    %c1_108 = arith.constant 1 : index
    %c0_109 = arith.constant 0 : index
    %262 = vector.load %arg24[%c1_108, %c0_109] : memref<9x256xf32, #tpu.memory_space<vmem>>, vector<1x256xf32>
    %263 = vector.broadcast %262 : vector<1x256xf32> to vector<32x256xf32>
    %264 = arith.mulf %261, %263 : vector<32x256xf32>
    %265 = vector.extract_strided_slice %252 {offsets = [0, 241], sizes = [32, 15], strides = [1, 1]} : vector<32x256xf32> to vector<32x15xf32>
    %266 = vector.extract_strided_slice %252 {offsets = [0, 0], sizes = [32, 241], strides = [1, 1]} : vector<32x256xf32> to vector<32x241xf32>
    %267 = tpu.concatenate %265, %266 in 1 : vector<32x15xf32>, vector<32x241xf32> -> vector<32x256xf32>
    %c2_110 = arith.constant 2 : index
    %c0_111 = arith.constant 0 : index
    %268 = vector.load %arg24[%c2_110, %c0_111] : memref<9x256xf32, #tpu.memory_space<vmem>>, vector<1x256xf32>
    %269 = vector.broadcast %268 : vector<1x256xf32> to vector<32x256xf32>
    %270 = arith.mulf %267, %269 : vector<32x256xf32>
    %271 = vector.extract_strided_slice %252 {offsets = [0, 255], sizes = [32, 1], strides = [1, 1]} : vector<32x256xf32> to vector<32x1xf32>
    %272 = vector.extract_strided_slice %252 {offsets = [0, 0], sizes = [32, 255], strides = [1, 1]} : vector<32x256xf32> to vector<32x255xf32>
    %273 = tpu.concatenate %271, %272 in 1 : vector<32x1xf32>, vector<32x255xf32> -> vector<32x256xf32>
    %c3_112 = arith.constant 3 : index
    %c0_113 = arith.constant 0 : index
    %274 = vector.load %arg24[%c3_112, %c0_113] : memref<9x256xf32, #tpu.memory_space<vmem>>, vector<1x256xf32>
    %275 = vector.broadcast %274 : vector<1x256xf32> to vector<32x256xf32>
    %276 = arith.mulf %273, %275 : vector<32x256xf32>
    %c4_114 = arith.constant 4 : index
    %c0_115 = arith.constant 0 : index
    %277 = vector.load %arg24[%c4_114, %c0_115] : memref<9x256xf32, #tpu.memory_space<vmem>>, vector<1x256xf32>
    %278 = vector.broadcast %277 : vector<1x256xf32> to vector<32x256xf32>
    %279 = arith.mulf %252, %278 : vector<32x256xf32>
    %280 = vector.extract_strided_slice %252 {offsets = [0, 1], sizes = [32, 255], strides = [1, 1]} : vector<32x256xf32> to vector<32x255xf32>
    %281 = vector.extract_strided_slice %252 {offsets = [0, 0], sizes = [32, 1], strides = [1, 1]} : vector<32x256xf32> to vector<32x1xf32>
    %282 = tpu.concatenate %280, %281 in 1 : vector<32x255xf32>, vector<32x1xf32> -> vector<32x256xf32>
    %c5_116 = arith.constant 5 : index
    %c0_117 = arith.constant 0 : index
    %283 = vector.load %arg24[%c5_116, %c0_117] : memref<9x256xf32, #tpu.memory_space<vmem>>, vector<1x256xf32>
    %284 = vector.broadcast %283 : vector<1x256xf32> to vector<32x256xf32>
    %285 = arith.mulf %282, %284 : vector<32x256xf32>
    %286 = vector.extract_strided_slice %252 {offsets = [0, 15], sizes = [32, 241], strides = [1, 1]} : vector<32x256xf32> to vector<32x241xf32>
    %287 = vector.extract_strided_slice %252 {offsets = [0, 0], sizes = [32, 15], strides = [1, 1]} : vector<32x256xf32> to vector<32x15xf32>
    %288 = tpu.concatenate %286, %287 in 1 : vector<32x241xf32>, vector<32x15xf32> -> vector<32x256xf32>
    %c6_118 = arith.constant 6 : index
    %c0_119 = arith.constant 0 : index
    %289 = vector.load %arg24[%c6_118, %c0_119] : memref<9x256xf32, #tpu.memory_space<vmem>>, vector<1x256xf32>
    %290 = vector.broadcast %289 : vector<1x256xf32> to vector<32x256xf32>
    %291 = arith.mulf %288, %290 : vector<32x256xf32>
    %292 = vector.extract_strided_slice %252 {offsets = [0, 16], sizes = [32, 240], strides = [1, 1]} : vector<32x256xf32> to vector<32x240xf32>
    %293 = vector.extract_strided_slice %252 {offsets = [0, 0], sizes = [32, 16], strides = [1, 1]} : vector<32x256xf32> to vector<32x16xf32>
    %294 = tpu.concatenate %292, %293 in 1 : vector<32x240xf32>, vector<32x16xf32> -> vector<32x256xf32>
    %c7_120 = arith.constant 7 : index
    %c0_121 = arith.constant 0 : index
    %295 = vector.load %arg24[%c7_120, %c0_121] : memref<9x256xf32, #tpu.memory_space<vmem>>, vector<1x256xf32>
    %296 = vector.broadcast %295 : vector<1x256xf32> to vector<32x256xf32>
    %297 = arith.mulf %294, %296 : vector<32x256xf32>
    %298 = vector.extract_strided_slice %252 {offsets = [0, 17], sizes = [32, 239], strides = [1, 1]} : vector<32x256xf32> to vector<32x239xf32>
    %299 = vector.extract_strided_slice %252 {offsets = [0, 0], sizes = [32, 17], strides = [1, 1]} : vector<32x256xf32> to vector<32x17xf32>
    %300 = tpu.concatenate %298, %299 in 1 : vector<32x239xf32>, vector<32x17xf32> -> vector<32x256xf32>
    %c8_122 = arith.constant 8 : index
    %c0_123 = arith.constant 0 : index
    %301 = vector.load %arg24[%c8_122, %c0_123] : memref<9x256xf32, #tpu.memory_space<vmem>>, vector<1x256xf32>
    %302 = vector.broadcast %301 : vector<1x256xf32> to vector<32x256xf32>
    %303 = arith.mulf %300, %302 : vector<32x256xf32>
    %304 = tpu.concatenate %258, %264, %270, %276, %279, %285, %291, %297, %303 in 0 : vector<32x256xf32>, vector<32x256xf32>, vector<32x256xf32>, vector<32x256xf32>, vector<32x256xf32>, vector<32x256xf32>, vector<32x256xf32>, vector<32x256xf32>, vector<32x256xf32> -> vector<288x256xf32>
    %c0_124 = arith.constant 0 : index
    %c0_125 = arith.constant 0 : index
    %305 = vector.load %arg15[%c0_124, %c0_125] : memref<32x288xf32, #tpu.memory_space<vmem>>, vector<32x288xf32>
    %cst_126 = arith.constant dense<0.000000e+00> : vector<32x256xf32>
    %306 = tpu.matmul %305, %304, %cst_126 {dimension_numbers = #tpu.dot_dimension_numbers<[1], [0], [0], [1], [0, 0, 1, 1], [], []>} : vector<32x288xf32>, vector<288x256xf32>, vector<32x256xf32> -> vector<32x256xf32>
    %c0_127 = arith.constant 0 : index
    %c0_128 = arith.constant 0 : index
    %307 = vector.load %arg16[%c0_127, %c0_128] : memref<32x1xf32, #tpu.memory_space<vmem>>, vector<32x1xf32>
    %308 = vector.broadcast %307 : vector<32x1xf32> to vector<32x256xf32>
    %309 = arith.addf %306, %308 : vector<32x256xf32>
    %c0_129 = arith.constant 0 : index
    %c0_130 = arith.constant 0 : index
    %310 = vector.load %arg21[%c0_129, %c0_130] : memref<8x32xf32, #tpu.memory_space<vmem>>, vector<8x32xf32>
    %c0_131 = arith.constant 0 : index
    %c0_132 = arith.constant 0 : index
    %311 = vector.load %arg22[%c0_131, %c0_132] : memref<32x8xf32, #tpu.memory_space<vmem>>, vector<32x8xf32>
    %cst_133 = arith.constant dense<0.000000e+00> : vector<8x256xf32>
    %312 = tpu.matmul %310, %309, %cst_133 {dimension_numbers = #tpu.dot_dimension_numbers<[1], [0], [0], [1], [0, 0, 1, 1], [], []>} : vector<8x32xf32>, vector<32x256xf32>, vector<8x256xf32> -> vector<8x256xf32>
    %cst_134 = arith.constant dense<0.000000e+00> : vector<8xf32>
    %313 = vector.multi_reduction <add>, %312, %cst_134 [1] : vector<8x256xf32> to vector<8xf32>
    %314 = vector.shape_cast %313 : vector<8xf32> to vector<8x1xf32>
    %cst_135 = arith.constant 9.765625E-4 : f32
    %315 = vector.broadcast %cst_135 : f32 to vector<8x1xf32>
    %316 = arith.mulf %314, %315 : vector<8x1xf32>
    %317 = vector.shape_cast %316 : vector<8x1xf32> to vector<8x1xf32>
    %318 = vector.broadcast %317 : vector<8x1xf32> to vector<8x256xf32>
    %cst_136 = arith.constant dense<0.000000e+00> : vector<32x256xf32>
    %319 = tpu.matmul %311, %318, %cst_136 {dimension_numbers = #tpu.dot_dimension_numbers<[1], [0], [0], [1], [0, 0, 1, 1], [], []>} : vector<32x8xf32>, vector<8x256xf32>, vector<32x256xf32> -> vector<32x256xf32>
    %320 = arith.subf %309, %319 : vector<32x256xf32>
    %321 = arith.mulf %320, %320 : vector<32x256xf32>
    %cst_137 = arith.constant dense<0.000000e+00> : vector<8x256xf32>
    %322 = tpu.matmul %310, %321, %cst_137 {dimension_numbers = #tpu.dot_dimension_numbers<[1], [0], [0], [1], [0, 0, 1, 1], [], []>} : vector<8x32xf32>, vector<32x256xf32>, vector<8x256xf32> -> vector<8x256xf32>
    %cst_138 = arith.constant dense<0.000000e+00> : vector<8xf32>
    %323 = vector.multi_reduction <add>, %322, %cst_138 [1] : vector<8x256xf32> to vector<8xf32>
    %324 = vector.shape_cast %323 : vector<8xf32> to vector<8x1xf32>
    %cst_139 = arith.constant 9.765625E-4 : f32
    %325 = vector.broadcast %cst_139 : f32 to vector<8x1xf32>
    %326 = arith.mulf %324, %325 : vector<8x1xf32>
    %cst_140 = arith.constant 9.99999997E-7 : f32
    %327 = vector.broadcast %cst_140 : f32 to vector<8x1xf32>
    %328 = arith.addf %326, %327 : vector<8x1xf32>
    %329 = math.rsqrt %328 : vector<8x1xf32>
    %330 = vector.shape_cast %329 : vector<8x1xf32> to vector<8x1xf32>
    %331 = vector.broadcast %330 : vector<8x1xf32> to vector<8x256xf32>
    %cst_141 = arith.constant dense<0.000000e+00> : vector<32x256xf32>
    %332 = tpu.matmul %311, %331, %cst_141 {dimension_numbers = #tpu.dot_dimension_numbers<[1], [0], [0], [1], [0, 0, 1, 1], [], []>} : vector<32x8xf32>, vector<8x256xf32>, vector<32x256xf32> -> vector<32x256xf32>
    %333 = arith.mulf %320, %332 : vector<32x256xf32>
    %c0_142 = arith.constant 0 : index
    %c0_143 = arith.constant 0 : index
    %334 = vector.load %arg17[%c0_142, %c0_143] : memref<32x1xf32, #tpu.memory_space<vmem>>, vector<32x1xf32>
    %335 = vector.broadcast %334 : vector<32x1xf32> to vector<32x256xf32>
    %336 = arith.mulf %333, %335 : vector<32x256xf32>
    %c0_144 = arith.constant 0 : index
    %c0_145 = arith.constant 0 : index
    %337 = vector.load %arg18[%c0_144, %c0_145] : memref<32x1xf32, #tpu.memory_space<vmem>>, vector<32x1xf32>
    %338 = vector.broadcast %337 : vector<32x1xf32> to vector<32x256xf32>
    %339 = arith.addf %336, %338 : vector<32x256xf32>
    %340 = arith.negf %339 : vector<32x256xf32>
    %341 = math.exp %340 : vector<32x256xf32>
    %cst_146 = arith.constant 1.000000e+00 : f32
    %342 = vector.broadcast %cst_146 : f32 to vector<32x256xf32>
    %343 = arith.addf %342, %341 : vector<32x256xf32>
    %344 = arith.divf %342, %343 : vector<32x256xf32>
    %345 = arith.mulf %339, %344 : vector<32x256xf32>
    %346 = vector.extract_strided_slice %345 {offsets = [0, 239], sizes = [32, 17], strides = [1, 1]} : vector<32x256xf32> to vector<32x17xf32>
    %347 = vector.extract_strided_slice %345 {offsets = [0, 0], sizes = [32, 239], strides = [1, 1]} : vector<32x256xf32> to vector<32x239xf32>
    %348 = tpu.concatenate %346, %347 in 1 : vector<32x17xf32>, vector<32x239xf32> -> vector<32x256xf32>
    %c0_147 = arith.constant 0 : index
    %c0_148 = arith.constant 0 : index
    %349 = vector.load %arg24[%c0_147, %c0_148] : memref<9x256xf32, #tpu.memory_space<vmem>>, vector<1x256xf32>
    %350 = vector.broadcast %349 : vector<1x256xf32> to vector<32x256xf32>
    %351 = arith.mulf %348, %350 : vector<32x256xf32>
    %352 = vector.extract_strided_slice %345 {offsets = [0, 240], sizes = [32, 16], strides = [1, 1]} : vector<32x256xf32> to vector<32x16xf32>
    %353 = vector.extract_strided_slice %345 {offsets = [0, 0], sizes = [32, 240], strides = [1, 1]} : vector<32x256xf32> to vector<32x240xf32>
    %354 = tpu.concatenate %352, %353 in 1 : vector<32x16xf32>, vector<32x240xf32> -> vector<32x256xf32>
    %c1_149 = arith.constant 1 : index
    %c0_150 = arith.constant 0 : index
    %355 = vector.load %arg24[%c1_149, %c0_150] : memref<9x256xf32, #tpu.memory_space<vmem>>, vector<1x256xf32>
    %356 = vector.broadcast %355 : vector<1x256xf32> to vector<32x256xf32>
    %357 = arith.mulf %354, %356 : vector<32x256xf32>
    %358 = vector.extract_strided_slice %345 {offsets = [0, 241], sizes = [32, 15], strides = [1, 1]} : vector<32x256xf32> to vector<32x15xf32>
    %359 = vector.extract_strided_slice %345 {offsets = [0, 0], sizes = [32, 241], strides = [1, 1]} : vector<32x256xf32> to vector<32x241xf32>
    %360 = tpu.concatenate %358, %359 in 1 : vector<32x15xf32>, vector<32x241xf32> -> vector<32x256xf32>
    %c2_151 = arith.constant 2 : index
    %c0_152 = arith.constant 0 : index
    %361 = vector.load %arg24[%c2_151, %c0_152] : memref<9x256xf32, #tpu.memory_space<vmem>>, vector<1x256xf32>
    %362 = vector.broadcast %361 : vector<1x256xf32> to vector<32x256xf32>
    %363 = arith.mulf %360, %362 : vector<32x256xf32>
    %364 = vector.extract_strided_slice %345 {offsets = [0, 255], sizes = [32, 1], strides = [1, 1]} : vector<32x256xf32> to vector<32x1xf32>
    %365 = vector.extract_strided_slice %345 {offsets = [0, 0], sizes = [32, 255], strides = [1, 1]} : vector<32x256xf32> to vector<32x255xf32>
    %366 = tpu.concatenate %364, %365 in 1 : vector<32x1xf32>, vector<32x255xf32> -> vector<32x256xf32>
    %c3_153 = arith.constant 3 : index
    %c0_154 = arith.constant 0 : index
    %367 = vector.load %arg24[%c3_153, %c0_154] : memref<9x256xf32, #tpu.memory_space<vmem>>, vector<1x256xf32>
    %368 = vector.broadcast %367 : vector<1x256xf32> to vector<32x256xf32>
    %369 = arith.mulf %366, %368 : vector<32x256xf32>
    %c4_155 = arith.constant 4 : index
    %c0_156 = arith.constant 0 : index
    %370 = vector.load %arg24[%c4_155, %c0_156] : memref<9x256xf32, #tpu.memory_space<vmem>>, vector<1x256xf32>
    %371 = vector.broadcast %370 : vector<1x256xf32> to vector<32x256xf32>
    %372 = arith.mulf %345, %371 : vector<32x256xf32>
    %373 = vector.extract_strided_slice %345 {offsets = [0, 1], sizes = [32, 255], strides = [1, 1]} : vector<32x256xf32> to vector<32x255xf32>
    %374 = vector.extract_strided_slice %345 {offsets = [0, 0], sizes = [32, 1], strides = [1, 1]} : vector<32x256xf32> to vector<32x1xf32>
    %375 = tpu.concatenate %373, %374 in 1 : vector<32x255xf32>, vector<32x1xf32> -> vector<32x256xf32>
    %c5_157 = arith.constant 5 : index
    %c0_158 = arith.constant 0 : index
    %376 = vector.load %arg24[%c5_157, %c0_158] : memref<9x256xf32, #tpu.memory_space<vmem>>, vector<1x256xf32>
    %377 = vector.broadcast %376 : vector<1x256xf32> to vector<32x256xf32>
    %378 = arith.mulf %375, %377 : vector<32x256xf32>
    %379 = vector.extract_strided_slice %345 {offsets = [0, 15], sizes = [32, 241], strides = [1, 1]} : vector<32x256xf32> to vector<32x241xf32>
    %380 = vector.extract_strided_slice %345 {offsets = [0, 0], sizes = [32, 15], strides = [1, 1]} : vector<32x256xf32> to vector<32x15xf32>
    %381 = tpu.concatenate %379, %380 in 1 : vector<32x241xf32>, vector<32x15xf32> -> vector<32x256xf32>
    %c6_159 = arith.constant 6 : index
    %c0_160 = arith.constant 0 : index
    %382 = vector.load %arg24[%c6_159, %c0_160] : memref<9x256xf32, #tpu.memory_space<vmem>>, vector<1x256xf32>
    %383 = vector.broadcast %382 : vector<1x256xf32> to vector<32x256xf32>
    %384 = arith.mulf %381, %383 : vector<32x256xf32>
    %385 = vector.extract_strided_slice %345 {offsets = [0, 16], sizes = [32, 240], strides = [1, 1]} : vector<32x256xf32> to vector<32x240xf32>
    %386 = vector.extract_strided_slice %345 {offsets = [0, 0], sizes = [32, 16], strides = [1, 1]} : vector<32x256xf32> to vector<32x16xf32>
    %387 = tpu.concatenate %385, %386 in 1 : vector<32x240xf32>, vector<32x16xf32> -> vector<32x256xf32>
    %c7_161 = arith.constant 7 : index
    %c0_162 = arith.constant 0 : index
    %388 = vector.load %arg24[%c7_161, %c0_162] : memref<9x256xf32, #tpu.memory_space<vmem>>, vector<1x256xf32>
    %389 = vector.broadcast %388 : vector<1x256xf32> to vector<32x256xf32>
    %390 = arith.mulf %387, %389 : vector<32x256xf32>
    %391 = vector.extract_strided_slice %345 {offsets = [0, 17], sizes = [32, 239], strides = [1, 1]} : vector<32x256xf32> to vector<32x239xf32>
    %392 = vector.extract_strided_slice %345 {offsets = [0, 0], sizes = [32, 17], strides = [1, 1]} : vector<32x256xf32> to vector<32x17xf32>
    %393 = tpu.concatenate %391, %392 in 1 : vector<32x239xf32>, vector<32x17xf32> -> vector<32x256xf32>
    %c8_163 = arith.constant 8 : index
    %c0_164 = arith.constant 0 : index
    %394 = vector.load %arg24[%c8_163, %c0_164] : memref<9x256xf32, #tpu.memory_space<vmem>>, vector<1x256xf32>
    %395 = vector.broadcast %394 : vector<1x256xf32> to vector<32x256xf32>
    %396 = arith.mulf %393, %395 : vector<32x256xf32>
    %397 = tpu.concatenate %351, %357, %363, %369, %372, %378, %384, %390, %396 in 0 : vector<32x256xf32>, vector<32x256xf32>, vector<32x256xf32>, vector<32x256xf32>, vector<32x256xf32>, vector<32x256xf32>, vector<32x256xf32>, vector<32x256xf32>, vector<32x256xf32> -> vector<288x256xf32>
    %c0_165 = arith.constant 0 : index
    %c0_166 = arith.constant 0 : index
    %398 = vector.load %arg19[%c0_165, %c0_166] : memref<3x288xf32, #tpu.memory_space<vmem>>, vector<3x288xf32>
    %cst_167 = arith.constant dense<0.000000e+00> : vector<3x256xf32>
    %399 = tpu.matmul %398, %397, %cst_167 {dimension_numbers = #tpu.dot_dimension_numbers<[1], [0], [0], [1], [0, 0, 1, 1], [], []>} : vector<3x288xf32>, vector<288x256xf32>, vector<3x256xf32> -> vector<3x256xf32>
    %c0_168 = arith.constant 0 : index
    %c0_169 = arith.constant 0 : index
    %400 = vector.load %arg20[%c0_168, %c0_169] : memref<3x1xf32, #tpu.memory_space<vmem>>, vector<3x1xf32>
    %401 = vector.broadcast %400 : vector<3x1xf32> to vector<3x256xf32>
    %402 = arith.addf %399, %401 : vector<3x256xf32>
    %cst_170 = arith.constant 5.000000e-01 : f32
    %403 = vector.broadcast %cst_170 : f32 to vector<3x256xf32>
    %404 = arith.mulf %402, %403 : vector<3x256xf32>
    %cst_171 = arith.constant 5.000000e-01 : f32
    %405 = vector.broadcast %cst_171 : f32 to vector<3x256xf32>
    %406 = arith.addf %404, %405 : vector<3x256xf32>
    %c0_172 = arith.constant 0 : index
    %c0_173 = arith.constant 0 : index
    %c0_174 = arith.constant 0 : index
    %407 = vector.load %arg25[%c0_172, %c0_173, %c0_174] : memref<1x3x256xf32, #tpu.memory_space<vmem>>, vector<1x3x256xf32>
    %408 = vector.shape_cast %407 : vector<1x3x256xf32> to vector<3x256xf32>
    %409 = vector.shape_cast %406 : vector<3x256xf32> to vector<1x3x256xf32>
    tpu.vector_store %arg25[%c0_172, %c0_173, %c0_174], %409 {strides = array<i32>} : memref<1x3x256xf32, #tpu.memory_space<vmem>>, vector<1x3x256xf32>,
    return
  }
  func.func @transform_0(%arg0: i32) -> (i32, i32, i32) {
    %c0_i32 = arith.constant 0 : i32
    %c0_i32_0 = arith.constant 0 : i32
    %c0_i32_1 = arith.constant 0 : i32
    return %arg0, %c0_i32, %c0_i32_0 : i32, i32, i32
  }
  func.func @transform_1(%arg0: i32) -> (i32, i32) {
    %c0_i32 = arith.constant 0 : i32
    %c0_i32_0 = arith.constant 0 : i32
    %c0_i32_1 = arith.constant 0 : i32
    return %c0_i32, %c0_i32_0 : i32, i32
  }
  func.func @transform_2(%arg0: i32) -> (i32, i32) {
    %c0_i32 = arith.constant 0 : i32
    %c0_i32_0 = arith.constant 0 : i32
    %c0_i32_1 = arith.constant 0 : i32
    return %c0_i32, %c0_i32_0 : i32, i32
  }
  func.func @transform_3(%arg0: i32) -> (i32, i32) {
    %c0_i32 = arith.constant 0 : i32
    %c0_i32_0 = arith.constant 0 : i32
    %c0_i32_1 = arith.constant 0 : i32
    return %c0_i32, %c0_i32_0 : i32, i32
  }
  func.func @transform_4(%arg0: i32) -> (i32, i32) {
    %c0_i32 = arith.constant 0 : i32
    %c0_i32_0 = arith.constant 0 : i32
    %c0_i32_1 = arith.constant 0 : i32
    return %c0_i32, %c0_i32_0 : i32, i32
  }
  func.func @transform_5(%arg0: i32) -> (i32, i32) {
    %c0_i32 = arith.constant 0 : i32
    %c0_i32_0 = arith.constant 0 : i32
    %c0_i32_1 = arith.constant 0 : i32
    return %c0_i32, %c0_i32_0 : i32, i32
  }
  func.func @transform_6(%arg0: i32) -> (i32, i32) {
    %c0_i32 = arith.constant 0 : i32
    %c0_i32_0 = arith.constant 0 : i32
    %c0_i32_1 = arith.constant 0 : i32
    return %c0_i32, %c0_i32_0 : i32, i32
  }
  func.func @transform_7(%arg0: i32) -> (i32, i32) {
    %c0_i32 = arith.constant 0 : i32
    %c0_i32_0 = arith.constant 0 : i32
    %c0_i32_1 = arith.constant 0 : i32
    return %c0_i32, %c0_i32_0 : i32, i32
  }
  func.func @transform_8(%arg0: i32) -> (i32, i32) {
    %c0_i32 = arith.constant 0 : i32
    %c0_i32_0 = arith.constant 0 : i32
    %c0_i32_1 = arith.constant 0 : i32
    return %c0_i32, %c0_i32_0 : i32, i32
  }
  func.func @transform_9(%arg0: i32) -> (i32, i32) {
    %c0_i32 = arith.constant 0 : i32
    %c0_i32_0 = arith.constant 0 : i32
    %c0_i32_1 = arith.constant 0 : i32
    return %c0_i32, %c0_i32_0 : i32, i32
  }
  func.func @transform_10(%arg0: i32) -> (i32, i32) {
    %c0_i32 = arith.constant 0 : i32
    %c0_i32_0 = arith.constant 0 : i32
    %c0_i32_1 = arith.constant 0 : i32
    return %c0_i32, %c0_i32_0 : i32, i32
  }
  func.func @transform_11(%arg0: i32) -> (i32, i32) {
    %c0_i32 = arith.constant 0 : i32
    %c0_i32_0 = arith.constant 0 : i32
    %c0_i32_1 = arith.constant 0 : i32
    return %c0_i32, %c0_i32_0 : i32, i32
  }
  func.func @transform_12(%arg0: i32) -> (i32, i32) {
    %c0_i32 = arith.constant 0 : i32
    %c0_i32_0 = arith.constant 0 : i32
    %c0_i32_1 = arith.constant 0 : i32
    return %c0_i32, %c0_i32_0 : i32, i32
  }
  func.func @transform_13(%arg0: i32) -> (i32, i32) {
    %c0_i32 = arith.constant 0 : i32
    %c0_i32_0 = arith.constant 0 : i32
    %c0_i32_1 = arith.constant 0 : i32
    return %c0_i32, %c0_i32_0 : i32, i32
  }
  func.func @transform_14(%arg0: i32) -> (i32, i32) {
    %c0_i32 = arith.constant 0 : i32
    %c0_i32_0 = arith.constant 0 : i32
    %c0_i32_1 = arith.constant 0 : i32
    return %c0_i32, %c0_i32_0 : i32, i32
  }
  func.func @transform_15(%arg0: i32) -> (i32, i32) {
    %c0_i32 = arith.constant 0 : i32
    %c0_i32_0 = arith.constant 0 : i32
    %c0_i32_1 = arith.constant 0 : i32
    return %c0_i32, %c0_i32_0 : i32, i32
  }
  func.func @transform_16(%arg0: i32) -> (i32, i32) {
    %c0_i32 = arith.constant 0 : i32
    %c0_i32_0 = arith.constant 0 : i32
    %c0_i32_1 = arith.constant 0 : i32
    return %c0_i32, %c0_i32_0 : i32, i32
  }
  func.func @transform_17(%arg0: i32) -> (i32, i32) {
    %c0_i32 = arith.constant 0 : i32
    %c0_i32_0 = arith.constant 0 : i32
    %c0_i32_1 = arith.constant 0 : i32
    return %c0_i32, %c0_i32_0 : i32, i32
  }
  func.func @transform_18(%arg0: i32) -> (i32, i32) {
    %c0_i32 = arith.constant 0 : i32
    %c0_i32_0 = arith.constant 0 : i32
    %c0_i32_1 = arith.constant 0 : i32
    return %c0_i32, %c0_i32_0 : i32, i32
  }
  func.func @transform_19(%arg0: i32) -> (i32, i32) {
    %c0_i32 = arith.constant 0 : i32
    %c0_i32_0 = arith.constant 0 : i32
    %c0_i32_1 = arith.constant 0 : i32
    return %c0_i32, %c0_i32_0 : i32, i32
  }
  func.func @transform_20(%arg0: i32) -> (i32, i32) {
    %c0_i32 = arith.constant 0 : i32
    %c0_i32_0 = arith.constant 0 : i32
    %c0_i32_1 = arith.constant 0 : i32
    return %c0_i32, %c0_i32_0 : i32, i32
  }
  func.func @transform_21(%arg0: i32) -> (i32, i32) {
    %c0_i32 = arith.constant 0 : i32
    %c0_i32_0 = arith.constant 0 : i32
    %c0_i32_1 = arith.constant 0 : i32
    return %c0_i32, %c0_i32_0 : i32, i32
  }
  func.func @transform_22(%arg0: i32) -> (i32, i32) {
    %c0_i32 = arith.constant 0 : i32
    %c0_i32_0 = arith.constant 0 : i32
    %c0_i32_1 = arith.constant 0 : i32
    return %c0_i32, %c0_i32_0 : i32, i32
  }
  func.func @transform_23(%arg0: i32) -> (i32, i32) {
    %c0_i32 = arith.constant 0 : i32
    %c0_i32_0 = arith.constant 0 : i32
    %c0_i32_1 = arith.constant 0 : i32
    return %c0_i32, %c0_i32_0 : i32, i32
  }
  func.func @transform_24(%arg0: i32) -> (i32, i32, i32) {
    %c0_i32 = arith.constant 0 : i32
    %c0_i32_0 = arith.constant 0 : i32
    %c0_i32_1 = arith.constant 0 : i32
    return %arg0, %c0_i32, %c0_i32_0 : i32, i32, i32
  }
}

</mosaic_0001>

<bundles_post_ra>
// kernel: vq_decoder_forward.1
= control target key start
LH: loop header
LB: loop body
LE: loop exit
PB: predicated region body
PF: predicated region fallthrough
CT: control target
= control target key end

     0   :  { %s7579_s0 = inlined_call_operand.vmem [shape: f32[2,4,64], index: 0, kind: input, shape index: {}]   ;;  %s7580_s1 = inlined_call_operand.vmem [shape: f32[4,4], index: 1, kind: input, shape index: {}]   ;;  %s7581_s2 = inlined_call_operand.vmem [shape: f32[4,1], index: 2, kind: input, shape index: {}]   ;;  %s7582_s3 = inlined_call_operand.vmem [shape: f32[32,36], index: 3, kind: input, shape index: {}]   ;;  %s7583_s4 = inlined_call_operand.vmem [shape: f32[32,1], index: 4, kind: input, shape index: {}]   ;;  %s7584_s5 = inlined_call_operand.vmem [shape: f32[32,1], index: 5, kind: input, shape index: {}]   ;;  %s7585_s6 = inlined_call_operand.vmem [shape: f32[32,1], index: 6, kind: input, shape index: {}]   ;;  %s7586_s7 = inlined_call_operand.vmem [shape: f32[32,288], index: 7, kind: input, shape index: {}]   ;;  %s7587_s8 = inlined_call_operand.vmem [shape: f32[32,1], index: 8, kind: input, shape index: {}]   ;;  %s7588_s9 = inlined_call_operand.vmem [shape: f32[32,1], index: 9, kind: input, shape index: {}]   ;;  %s7589_s10 = inlined_call_operand.vmem [shape: f32[32,1], index: 10, kind: input, shape index: {}]   ;;  %s7590_s11 = inlined_call_operand.vmem [shape: f32[32,288], index: 11, kind: input, shape index: {}]   ;;  %s7591_s12 = inlined_call_operand.vmem [shape: f32[32,1], index: 12, kind: input, shape index: {}]   ;;  %s7592_s13 = inlined_call_operand.vmem [shape: f32[64,256], index: 13, kind: input, shape index: {}]   ;;  %s7593_s14 = inlined_call_operand.vmem [shape: f32[32,288], index: 14, kind: input, shape index: {}]   ;;  %s7594_s15 = inlined_call_operand.vmem [shape: f32[32,1], index: 15, kind: input, shape index: {}]   ;;  %s7595_s16 = inlined_call_operand.vmem [shape: f32[32,1], index: 16, kind: input, shape index: {}]   ;;  %s7596_s17 = inlined_call_operand.vmem [shape: f32[32,1], index: 17, kind: input, shape index: {}]   ;;  %s7597_s18 = inlined_call_operand.vmem [shape: f32[3,288], index: 18, kind: input, shape index: {}]   ;;  %s7598_s19 = inlined_call_operand.vmem [shape: f32[3,1], index: 19, kind: input, shape index: {}]   ;;  %s7599_s20 = inlined_call_operand.vmem [shape: f32[8,32], index: 20, kind: input, shape index: {}]   ;;  %s7600_s21 = inlined_call_operand.vmem [shape: f32[32,8], index: 21, kind: input, shape index: {}]   ;;  %s7601_s22 = inlined_call_operand.vmem [shape: f32[9,64], index: 22, kind: input, shape index: {}]   ;;  %s7602_s23 = inlined_call_operand.vmem [shape: f32[9,256], index: 23, kind: input, shape index: {}]   ;;  %s7603_s24 = inlined_call_operand.vmem [shape: f32[2,3,256], index: 24, kind: output, shape index: {}]  }
   0x1   :  { %7669 = sst [smem:[#allocation11_spill]] %s7579_s0 }
   0x2   :  { %7670 = sst [smem:[#allocation12_spill]] %s7580_s1 }
   0x3   :  { %7671 = sst [smem:[#allocation13_spill]] %s7581_s2 }
   0x4   :  { %7672 = sst [smem:[#allocation14_spill]] %s7582_s3 }
   0x5   :  { %7673 = sst [smem:[#allocation15_spill]] %s7583_s4 }
   0x6   :  { %7674 = sst [smem:[#allocation16_spill]] %s7584_s5  ;;  %s5459_s5 = smov 0  }
   0x7   :  { %7675 = sst [smem:[#allocation17_spill]] %s7585_s6 }
   0x8   :  { %7676 = sst [smem:[#allocation18_spill]] %s7586_s7 }
   0x9   :  { %7677 = sst [smem:[#allocation19_spill]] %s7587_s8 }
   0xa   :  { %7678 = sst [smem:[#allocation20_spill]] %s7592_s13 }
   0xb   :  { %7679 = sst [smem:[#allocation21_spill]] %s7593_s14 }
   0xc   :  { %7680 = sst [smem:[#allocation22_spill]] %s7594_s15 }
   0xd   :  { %7681 = sst [smem:[#allocation23_spill]] %s7595_s16 }
   0xe   :  { %7682 = sst [smem:[#allocation24_spill]] %s7596_s17 }
   0xf   :  { %7683 = sst [smem:[#allocation25_spill]] %s7597_s18 }
  0x10   :  { %7684 = sst [smem:[#allocation26_spill]] %s7598_s19 }
  0x11   :  { %7685 = sst [smem:[#allocation27_spill]] %s7599_s20 }
  0x12   :  { %7686 = sst [smem:[#allocation28_spill]] %s7600_s21 }
  0x13   :  { %7687 = sst [smem:[#allocation29_spill]] %s7602_s23 }
  0x14   :  { %7688 = sst [smem:[#allocation30_spill]] %s7603_s24 }
  0x15 LB: > { %7689 = sst [smem:[#allocation2_spill]] %s5307_s5  ;;  %s4803_s26 = sadd.s32 4294967295, %s5307_s5   ;;  %s5307_s5 = sphi %s5459_s5, %s34_s5  }
  0x16   : > { %p4807_p0 = scmp.ge.s32.totalorder %s5307_s5, 1  ;;  %p661_p1 = scmp.lt.s32.totalorder %s5307_s5, 3 }
  0x18   : > { %p662_p2 = pnand %p4807_p0, %p661_p1 }
  0x1a   : > { %665 = sbr.rel (%p662_p2) target bundleno = 6003 (0x1773), region = 116 }
  0x1f   : > { %p726_p3 = scmp.lt.s32.totalorder %s4803_s26, 1  ;;  %v7656_v0 = vmov 0.0   ;;  %vm5310_vm0 = vmmov 0   ;;  %s7690_s6 = sld [smem:[#allocation13_spill]]  ;;  %v5311_v2 = vmov 0   ;;  %vm747_vm1 = vcmask 1043456  }
  0x20   : > { %5056 = vmatprep.subr.mxu0 %v7656_v0  ;;  %5058 = vmatprep.mubr.msk.f32.mxu0 %vm5310_vm0, %v7656_v0  ;;  %s7692_s7 = sld [smem:[#allocation11_spill]]  ;;  %vm743_vm2 = vcmask 31744   ;;  %s7640_s4 = smov 56   ;;  %vm984_vm3 = vcmask 293888   ;;  %vm932_vm4 = vcmask 449536   ;;  %vm918_vm5 = vcmask 457728  }
  0x21   : > { %s7756_s26 = smov (!%p726_p3, %s4803_s26), 1  ;;  %5214 = vset.pattern.permute.xlu0 %v5311_v2  ;;  %5215 = vset.pattern.permute.xlu1 %v5311_v2  ;;  %s7693_s8 = sld [smem:[#allocation12_spill]]  ;;  %v5539_v16 = vld [vmem:[%s7601_s22 + $0x8] ss:$0 sm:$0xff]  ;;  %vm890_vm6 = vcmask 515072   ;;  %vm904_vm7 = vcmask 465920  }
  0x22   : > { %7691 = sst [smem:[#allocation3_spill]] %s7756_s26  ;;  %s4808_s2 = sshll.u32 %s7756_s26, 2  ;;  %v5546_v21 = vld [vmem:[%s7601_s22 + $0x7] ss:$0 sm:$0xff]  ;;  %v5552_v23 = vld [vmem:[%s7601_s22 + $0x5] ss:$0 sm:$0xff] }
  0x23   : > { %s7638_s1 = smov 120   ;;  %s7610_s27 = smov 119   ;;  %v5562_v29 = vld [vmem:[%s7601_s22 + $0x6] ss:$0 sm:$0xff]  ;;  %v5568_v33 = vld [vmem:[%s7601_s22 + $0x4] ss:$0 sm:$0xff] }
  0x24   : > { %s7612_s28 = smov 55   ;;  %s7622_s29 = smov 121   ;;  %vm870_vm8 = vcmask 7168   ;;  %v5578_v42 = vld [vmem:[%s7601_s22 + $0x3] ss:$0 sm:$0xff]  ;;  %vm842_vm9 = vcmask 64512  }
  0x25   : > { %v737_v1 = vld [vmem:[%s7690_s6] sm:$0xf]  ;;  %s7614_s6 = smov 127   ;;  %s7624_s0 = smov 57   ;;  %vm856_vm10 = vcmask 56320   ;;  %vm828_vm11 = vcmask 72704  }
  0x26   : > { %740 = vperm.xlu0 %5214, %v737_v1   ;;  %s729_s30 = scalar_lea.vmem %s7692_s7, %s4808_s2  ;;  %s7616_s2 = smov 63   ;;  %v5585_v47 = vld [vmem:[%s7601_s22 + $0x1] ss:$0 sm:$0xff]  ;;  %v5591_v49 = vld [vmem:[%s7601_s22 + $0x2] ss:$0 sm:$0xff]  ;;  %vm1090_vm12 = vcmask 261120  }
  0x27   : > { %v736_v3 = vld [vmem:[%s7693_s8] sm:$0xf]  ;;  %s7626_s7 = smov 65   ;;  %s7694_s8 = sld [smem:[#allocation14_spill]]  ;;  %vm1164_vm13 = vcmask 523264   ;;  %vm3167_vm14 = vcmask 121856  }
  0x28   : > { %v735_v4 = vld [vmem:[%s729_s30] sm:$0xf]  ;;  %s7632_s30 = smov 1   ;;  %s7634_s3 = smov 73   ;;  %vm3109_vm15 = vcmask 130048  }
  0x29   : > { %5057 = vmatpush3.msk.msra.mxu0 %vm747_vm1, %v735_v4  ;;  %s7636_s25 = smov 9   ;;  %v5599_v56 = vld [vmem:[%s7601_s22] ss:$0 sm:$0xff]  ;;  %s7700_s20 = sld [smem:[#allocation27_spill]] }
  0x2a   : > { %5059 = vmatmul.mubr.msk.f32.vlgmr.msra.gmra.mxu0 %vm743_vm2, %v736_v3  ;;  %5077 = vmatprep.subr.mxu0 %v7656_v0  ;;  %s7701_s21 = sld [smem:[#allocation28_spill]]  ;;  %s7717_s5 = smov 73   ;;  %vm3357_vm2 = vcmask 924672  }
  0x2b   : > { %5085 = vmatprep.mubr.msk.f32.mxu0 %vm5310_vm0, %v7656_v0  ;;  %s7718_s19 = sld [smem:[#allocation18_spill]]  ;;  %s7719_s24 = smov 55  }
  0x2c   : > { %s7720_s26 = smov 119   ;;  %s7721_s17 = sld [smem:[#allocation19_spill]] }
  0x2d   : > { %v956_v9 = vld [vmem:[%s7694_s8] sm:$0xff]  ;;  %v957_v1 = vld [vmem:[%s7694_s8 + $0x8] sm:$0xff]  ;;  %v958_v2 = vld [vmem:[%s7694_s8 + $0x10] sm:$0xff]  ;;  %s5328_s13 = smov 15   ;;  %s5329_s14 = smov 16  }
  0x2e   : > { %5071 = vmatprep.mubr.msk.f32.mxu1 %vm984_vm3, %v956_v9  ;;  %v959_v3 = vld [vmem:[%s7694_s8 + $0x18] sm:$0xff]  ;;  %s7713_s8 = smov 8   ;;  %s5330_s15 = smov 17  }
  0x2f   : > { %s5331_s16 = smov 112   ;;  %s7734_s18 = sld [smem:[#allocation24_spill]] }
  0xa1   : > { %v741_v5 = vpop.permute.xlu0 %740 }
  0xea   : > { %v817_v6 = vpop.f32.mrf.mxu0 }
  0xeb   : > { %v5486_v7 = vadd.f32 %v817_v6, %v741_v5 }
  0xec   : > { %v5060_v8 = vpop.f32.mrf.mxu0 }
  0xed   : > { %915 = vrot.lane.b32.xlu1 %v5486_v7, %s7640_s4  ;;  %912 = vrot.lane.b32.xlu0 %v5486_v7, %s7638_s1  ;;  %v883_v40 = vmul.f32 %v5568_v33, %v5486_v7  ;;  %s7710_s1 = smov 71  }
  0xf1   : > { %926 = vrot.lane.b32.xlu1 %v5486_v7, %s7610_s27  ;;  %929 = vrot.lane.b32.xlu0 %v5486_v7, %s7612_s28  ;;  %s7618_s27 = smov 72   ;;  %s7620_s28 = smov 8  }
  0xf5   : > { %884 = vrot.lane.b32.xlu1 %v5486_v7, %s7614_s6  ;;  %887 = vrot.lane.b32.xlu0 %v5486_v7, %s7616_s2  ;;  %s7628_s6 = smov 71   ;;  %s7630_s2 = smov 7  }
  0xf9   : > { %898 = vrot.lane.b32.xlu1 %v5486_v7, %s7622_s29  ;;  %901 = vrot.lane.b32.xlu0 %v5486_v7, %s7624_s0  ;;  %s7695_s29 = sld [smem:[#allocation15_spill]]  ;;  %s7706_s0 = smov 65  }
  0xfd   : > { %864 = vrot.lane.b32.xlu1 %v5486_v7, %s7626_s7  ;;  %867 = vrot.lane.b32.xlu0 %v5486_v7, %s7632_s30  ;;  %s7702_s30 = sld [smem:[#allocation16_spill]]  ;;  %s7707_s7 = smov 57  }
  0xff   : > { %v962_v10 = vld [vmem:[%s7695_s29 + $0x10] sm:$0xff]  ;;  %v963_v11 = vld [vmem:[%s7695_s29 + $0x18] sm:$0xff]  ;;  %v960_v12 = vld [vmem:[%s7695_s29] sm:$0xff] }
 0x100   : > { %v961_v13 = vld [vmem:[%s7695_s29 + $0x8] sm:$0xff]  ;;  %s7715_s29 = smov 56  }
 0x101   : > { %836 = vrot.lane.b32.xlu1 %v5486_v7, %s7618_s27  ;;  %839 = vrot.lane.b32.xlu0 %v5486_v7, %s7620_s28  ;;  %s7703_s28 = sld [smem:[#allocation17_spill]]  ;;  %s7709_s27 = smov 7  }
 0x105   : > { %850 = vrot.lane.b32.xlu1 %v5486_v7, %s7628_s6  ;;  %853 = vrot.lane.b32.xlu0 %v5486_v7, %s7630_s2  ;;  %s7704_s6 = smov 120   ;;  %s7705_s2 = smov 1  }
 0x109   : > { %822 = vrot.lane.b32.xlu1 %v5486_v7, %s7634_s3  ;;  %825 = vrot.lane.b32.xlu0 %v5486_v7, %s7636_s25  ;;  %s7708_s3 = smov 121   ;;  %s7711_s25 = smov 63  }
 0x10d   : > { %976 = vperm.xlu0 %5214, %v962_v10   ;;  %981 = vperm.xlu1 %5215, %v963_v11  }
 0x111   : > { %966 = vperm.xlu0 %5214, %v960_v12   ;;  %971 = vperm.xlu1 %5215, %v961_v13  }
 0x15f   : > { %v916_v14 = vpop.permute.xlu1 %915  ;;  %v913_v15 = vpop.permute.xlu0 %912 }
 0x160   : > { %v919_v22 = vsel %vm918_vm5, %v913_v15, %v916_v14 }
 0x161   : > { %v925_v27 = vmul.f32 %v5546_v21, %v919_v22  ;;  %v5643_v22 = vld [vmem:[%s7701_s21] sm:$0xff] }
 0x163   : > { %v927_v17 = vpop.permute.xlu1 %926  ;;  %v930_v18 = vpop.permute.xlu0 %929  ;;  %v950_v34 = vrot.slane %v925_v27, 4  ;;  %v1468_v27 = vld [vmem:[%s7703_s28 + $0x8] sm:$0xff] }
 0x164   : > { %v933_v19 = vsel %vm932_vm4, %v927_v17, %v930_v18  ;;  %v5633_v17 = vld [vmem:[%s7700_s20] sm:$0xff] }
 0x165   : > { %v939_v20 = vmul.f32 %v5539_v16, %v933_v19 }
 0x167   : > { %v885_v24 = vpop.permute.xlu1 %884  ;;  %5061 = vmatprep.subr.msk.mxu1 %vm747_vm1, %v939_v20  ;;  %v888_v25 = vpop.permute.xlu0 %887 }
 0x168   : > { %v891_v26 = vsel %vm890_vm6, %v885_v24, %v888_v25  ;;  %5062 = vmatpush3.msk.msra.mxu1 %vm747_vm1, %v939_v20  ;;  %v1441_v24 = vld [vmem:[%s7702_s30 + $0x10] sm:$0xff]  ;;  %v1470_v25 = vld [vmem:[%s7703_s28 + $0x18] sm:$0xff] }
 0x169   : > { %v897_v28 = vmul.f32 %v5552_v23, %v891_v26  ;;  %v1469_v26 = vld [vmem:[%s7703_s28 + $0x10] sm:$0xff] }
 0x16b   : > { %v899_v30 = vpop.permute.xlu1 %898  ;;  %v902_v31 = vpop.permute.xlu0 %901  ;;  %v947_v35 = vrot.slane %v897_v28, 4 }
 0x16c   : > { %v905_v32 = vsel %vm904_vm7, %v899_v30, %v902_v31  ;;  %v5662_v31 = vld [vmem:[%s7701_s21 + $0x8] sm:$0xff] }
 0x16d   : > { %v911_v36 = vmul.f32 %v5562_v29, %v905_v32  ;;  %v954_v41 = vsel %vm747_vm1, %v883_v40, %v947_v35  ;;  %v5667_v32 = vld [vmem:[%s7701_s21 + $0x10] sm:$0xff] }
 0x16f   : > { %v865_v37 = vpop.permute.xlu1 %864  ;;  %v868_v38 = vpop.permute.xlu0 %867  ;;  %v955_v39 = vsel %vm747_vm1, %v911_v36, %v950_v34  ;;  %v5677_v34 = vld [vmem:[%s7701_s21 + $0x18] sm:$0xff] }
 0x170   : > { %5063 = vmatprep.subr.mxu1 %v955_v39  ;;  %v871_v43 = vsel %vm870_vm8, %v865_v37, %v868_v38 }
 0x171   : > { %5064 = vmatpush3.msra.mxu1 %v955_v39  ;;  %v877_v46 = vmul.f32 %v5578_v42, %v871_v43 }
 0x172   : > { %5065 = vmatprep.subr.mxu1 %v954_v41 }
 0x173   : > { %v837_v44 = vpop.permute.xlu1 %836  ;;  %v840_v45 = vpop.permute.xlu0 %839  ;;  %5066 = vmatpush3.msra.mxu1 %v954_v41  ;;  %v944_v53 = vrot.slane %v877_v46, 4 }
 0x174   : > { %v843_v48 = vsel %vm842_vm9, %v837_v44, %v840_v45 }
 0x175   : > { %v849_v54 = vmul.f32 %v5585_v47, %v843_v48 }
 0x177   : > { %v851_v50 = vpop.permute.xlu1 %850  ;;  %v854_v51 = vpop.permute.xlu0 %853  ;;  %v941_v61 = vrot.slane %v849_v54, 4  ;;  %v1440_v54 = vld [vmem:[%s7702_s30 + $0x8] sm:$0xff] }
 0x178   : > { %v857_v52 = vsel %vm856_vm10, %v851_v50, %v854_v51 }
 0x179   : > { %v863_v55 = vmul.f32 %v5591_v49, %v857_v52 }
 0x17b   : > { %v823_v57 = vpop.permute.xlu1 %822  ;;  %v826_v58 = vpop.permute.xlu0 %825  ;;  %v953_v59 = vsel %vm747_vm1, %v863_v55, %v944_v53  ;;  %v1442_v53 = vld [vmem:[%s7702_s30 + $0x18] sm:$0xff]  ;;  %v1439_v55 = vld [vmem:[%s7702_s30] sm:$0xff]  ;;  %s7716_s30 = smov 9  }
 0x17c   : > { %v829_v60 = vsel %vm828_vm11, %v823_v57, %v826_v58  ;;  %5067 = vmatprep.subr.mxu1 %v953_v59  ;;  %v1467_v57 = vld [vmem:[%s7703_s28] sm:$0xff]  ;;  %s7714_s28 = smov 72  }
 0x17d   : > { %v835_v62 = vmul.f32 %v5599_v56, %v829_v60  ;;  %5068 = vmatpush3.msra.mxu1 %v953_v59 }
 0x17f   : > { %v952_v63 = vsel %vm747_vm1, %v835_v62, %v941_v61  ;;  %vm3415_vm1 = vcmask 916480  }
 0x180   : > { %5069 = vmatprep.subr.mxu1 %v952_v63 }
 0x181   : > { %5070 = vmatpush3.msra.mxu1 %v952_v63 }
 0x182   : > { %5072 = vmatmul.mubr.msk.f32.vlgmr.msra.gmra.mxu1 %vm984_vm3, %v957_v1 }
 0x183   : > { %5074 = vmatprep.mubr.msk.f32.mxu1 %vm984_vm3, %v958_v2 }
 0x186   : > { %5075 = vmatmul.mubr.msk.f32.gmra.mxu1 %vm984_vm3, %v959_v3  ;;  %vm3299_vm3 = vcmask 1039360  }
 0x188   : > { %v982_v4 = vpop.permute.xlu1 %981  ;;  %v977_v7 = vpop.permute.xlu0 %976 }
 0x18c   : > { %v972_v10 = vpop.permute.xlu1 %971  ;;  %v967_v14 = vpop.permute.xlu0 %966 }
 0x242   : > { %v5073_v5 = vpop.f32.mrf.mxu1 }
 0x243   : > { %v5623_v13 = vadd.f32 %v5073_v5, %v972_v10 }
 0x244   : > { %v1066_v6 = vpop.f32.mrf.mxu1 }
 0x245   : > { %7698 = vst [vmem:[#allocation6_spill] sm:$0xff] %v5623_v13  ;;  %v5627_v15 = vadd.f32 %v1066_v6, %v967_v14 }
 0x246   : > { %v5076_v8 = vpop.f32.mrf.mxu1 }
 0x247   : > { %v5617_v9 = vadd.f32 %v5076_v8, %v982_v4  ;;  %7699 = vst [vmem:[#allocation7_spill] sm:$0xff] %v5627_v15 }
 0x248   : > { %v1076_v11 = vpop.f32.mrf.mxu1 }
 0x249   : > { %7696 = vst [vmem:[#allocation4_spill] sm:$0xff] %v5617_v9  ;;  %v5619_v12 = vadd.f32 %v1076_v11, %v977_v7  ;;  %5078 = vmatpush3.msra.mxu0 %v5617_v9 }
 0x24a   : > { %5079 = vmatprep.subr.mxu0 %v7656_v0 }
 0x24b   : > { %7697 = vst [vmem:[#allocation5_spill] sm:$0xff] %v5619_v12  ;;  %5080 = vmatpush3.msra.mxu0 %v5619_v12 }
 0x24c   : > { %5081 = vmatprep.subr.mxu0 %v7656_v0 }
 0x24d   : > { %5082 = vmatpush3.msra.mxu0 %v5623_v13 }
 0x24e   : > { %5083 = vmatprep.subr.mxu0 %v7656_v0 }
 0x24f   : > { %5084 = vmatpush3.msra.mxu0 %v5627_v15 }
 0x250   : > { %5086 = vmatmul.mubr.msk.f32.vlgmr.msra.gmra.mxu0 %vm1090_vm12, %v5633_v17 }
 0x251   : > { %5090 = vmatprep.mubr.msk.f32.mxu0 %vm842_vm9, %v5643_v22 }
 0x310   : > { %v1160_v18 = vpop.f32.mrf.mxu0 }
 0x311   : > { %v1165_v19 = vsel %vm1164_vm13, %v1160_v18, 0.0 }
 0x312   : > { %1166 = vadd.xlane.f32.xlu1 %v1165_v19  ;;  %v5087_v20 = vpop.f32.mrf.mxu0 }
 0x323   : > { %1455 = vperm.xlu1 %5215, %v1441_v24  }
 0x327   : > { %1488 = vperm.xlu1 %5215, %v1470_v25  }
 0x32b   : > { %1483 = vperm.xlu1 %5215, %v1469_v26  }
 0x32f   : > { %1478 = vperm.xlu1 %5215, %v1468_v27  }
 0x39b   : > { %v1167_v28 = vpop.xlane.xlu1 %1166 }
 0x39c   : > { %v1168_v30 = vmul.f32 0.00390625, %v1167_v28 }
 0x39e   : > { %5088 = vmatprep.subr.mxu0 %v1168_v30 }
 0x39f   : > { %5089 = vmatpush3.msra.mxu0 %v1168_v30  ;;  %v1456_v62 = vpop.permute.xlu1 %1455 }
 0x3a0   : > { %5091 = vmatmul.mubr.msk.f32.vlgmr.msra.gmra.mxu0 %vm842_vm9, %v5662_v31  ;;  %5096 = vmatprep.subr.mxu0 %v7656_v0 }
 0x3a1   : > { %5093 = vmatprep.mubr.msk.f32.mxu0 %vm842_vm9, %v5667_v32 }
 0x3a3   : > { %v1489_v63 = vpop.permute.xlu1 %1488 }
 0x3a4   : > { %5094 = vmatmul.mubr.msk.f32.gmra.mxu0 %vm842_vm9, %v5677_v34 }
 0x3a5   : > { %5104 = vmatprep.mubr.msk.f32.mxu0 %vm5310_vm0, %v7656_v0 }
 0x3a7   : > { %v1484_v2 = vpop.permute.xlu1 %1483 }
 0x3ab   : > { %v1479_v7 = vpop.permute.xlu1 %1478 }
 0x460   : > { %v5092_v35 = vpop.f32.mrf.mxu0 }
 0x461   : > { %v1267_v40 = vsub.f32 %v5623_v13, %v5092_v35 }
 0x462   : > { %v1247_v36 = vpop.f32.mrf.mxu0 }
 0x463   : > { %v1266_v44 = vsub.f32 %v5627_v15, %v1247_v36  ;;  %v1271_v46 = vmul.f32 %v1267_v40, %v1267_v40 }
 0x464   : > { %v5095_v37 = vpop.f32.mrf.mxu0 }
 0x465   : > { %v5684_v38 = vsub.f32 %v5617_v9, %v5095_v37  ;;  %v1270_v48 = vmul.f32 %v1266_v44, %v1266_v44 }
 0x466   : > { %v1257_v39 = vpop.f32.mrf.mxu0 }
 0x467   : > { %v1273_v41 = vmul.f32 %v5684_v38, %v5684_v38  ;;  %v5690_v43 = vsub.f32 %v5619_v12, %v1257_v39 }
 0x469   : > { %v1272_v45 = vmul.f32 %v5690_v43, %v5690_v43  ;;  %5097 = vmatpush3.msra.mxu0 %v1273_v41 }
 0x46a   : > { %5098 = vmatprep.subr.mxu0 %v7656_v0 }
 0x46b   : > { %5099 = vmatpush3.msra.mxu0 %v1272_v45 }
 0x46c   : > { %5100 = vmatprep.subr.mxu0 %v7656_v0 }
 0x46d   : > { %5101 = vmatpush3.msra.mxu0 %v1271_v46 }
 0x46e   : > { %5102 = vmatprep.subr.mxu0 %v7656_v0 }
 0x46f   : > { %5103 = vmatpush3.msra.mxu0 %v1270_v48 }
 0x470   : > { %5105 = vmatmul.mubr.msk.f32.vlgmr.msra.gmra.mxu0 %vm1090_vm12, %v5633_v17 }
 0x471   : > { %5109 = vmatprep.mubr.msk.f32.mxu0 %vm842_vm9, %v5643_v22 }
 0x530   : > { %v1340_v50 = vpop.f32.mrf.mxu0 }
 0x531   : > { %v1344_v51 = vsel %vm1164_vm13, %v1340_v50, 0.0 }
 0x532   : > { %1345 = vadd.xlane.f32.xlu0 %v1344_v51  ;;  %v5106_v52 = vpop.f32.mrf.mxu0 }
 0x548   : > { %1460 = vperm.xlu0 %5214, %v1442_v53  }
 0x54c   : > { %1450 = vperm.xlu0 %5214, %v1440_v54  }
 0x550   : > { %1445 = vperm.xlu0 %5214, %v1439_v55  }
 0x554   : > { %1473 = vperm.xlu0 %5214, %v1467_v57  }
 0x5bb   : > { %v1346_v58 = vpop.xlane.xlu0 %1345 }
 0x5bc   : > { %v1347_v59 = vmul.f32 0.00390625, %v1346_v58 }
 0x5be   : > { %v1348_v60 = vadd.f32 1e-06, %v1347_v59 }
 0x5c0   : > { %5217 = vrsqrt.f32 %v1348_v60 }
 0x5c3   : > { %v1461_v1 = vpop.permute.xlu0 %1460 }
 0x5c7   : > { %v1451_v5 = vpop.permute.xlu0 %1450 }
 0x5cb   : > { %v1446_v18 = vpop.permute.xlu0 %1445 }
 0x5cd   : > { %v5218_v61 = vpop.eup %5217 }
 0x5ce   : > { %5107 = vmatprep.subr.mxu0 %v5218_v61 }
 0x5cf   : > { %5108 = vmatpush3.msra.mxu0 %v5218_v61  ;;  %v1474_v20 = vpop.permute.xlu0 %1473  ;;  %v1788_v61 = vld [vmem:[%s7718_s19 + $0x8] sm:$0xff] }
 0x5d0   : > { %5110 = vmatmul.mubr.msk.f32.vlgmr.msra.gmra.mxu0 %vm842_vm9, %v5662_v31  ;;  %1899 = vmatprep.mubr.f32.mxu1 %v1788_v61 }
 0x5d1   : > { %5112 = vmatprep.mubr.msk.f32.mxu0 %vm842_vm9, %v5667_v32 }
 0x5d4   : > { %5113 = vmatmul.mubr.msk.f32.gmra.mxu0 %vm842_vm9, %v5677_v34 }
 0x690   : > { %v5111_v3 = vpop.f32.mrf.mxu0 }
 0x691   : > { %v1436_v4 = vmul.f32 %v5111_v3, %v1267_v40 }
 0x692   : > { %v1416_v11 = vpop.f32.mrf.mxu0 }
 0x693   : > { %v1464_v6 = vmul.f32 %v1451_v5, %v1436_v4  ;;  %v1435_v14 = vmul.f32 %v1416_v11, %v1266_v44  ;;  %v1799_v11 = vld [vmem:[%s7721_s17] sm:$0xff] }
 0x694   : > { %v5114_v28 = vpop.f32.mrf.mxu0 }
 0x695   : > { %v1492_v8 = vadd.f32 %v1479_v7, %v1464_v6  ;;  %v1463_v19 = vmul.f32 %v1446_v18, %v1435_v14  ;;  %v1438_v30 = vmul.f32 %v5114_v28, %v5684_v38  ;;  %v1801_v6 = vld [vmem:[%s7721_s17 + $0x10] sm:$0xff]  ;;  %v1802_v7 = vld [vmem:[%s7721_s17 + $0x18] sm:$0xff]  ;;  %v1800_v14 = vld [vmem:[%s7721_s17 + $0x8] sm:$0xff] }
 0x696   : > { %v1426_v45 = vpop.f32.mrf.mxu0 }
 0x697   : > { %v4838_v10 = vmul.f32 -1.442695, %v1492_v8  ;;  %v1491_v24 = vadd.f32 %v1474_v20, %v1463_v19  ;;  %v1466_v37 = vmul.f32 %v1461_v1, %v1438_v30  ;;  %v1437_v48 = vmul.f32 %v1426_v45, %v5690_v43  ;;  %v1789_v1 = vld [vmem:[%s7718_s19 + $0x10] sm:$0xff] }
 0x698   : > { %5123 = vmatprep.mubr.msk.f32.mxu0 %vm1090_vm12, %v1789_v1 }
 0x699   : > { %5219 = vpow2.f32 %v4838_v10  ;;  %v4837_v27 = vmul.f32 -1.442695, %v1491_v24  ;;  %v1494_v41 = vadd.f32 %v1489_v63, %v1466_v37  ;;  %v1465_v52 = vmul.f32 %v1456_v62, %v1437_v48 }
 0x69b   : > { %v4840_v38 = vmul.f32 -1.442695, %v1494_v41  ;;  %v1493_v53 = vadd.f32 %v1484_v2, %v1465_v52 }
 0x69d   : > { %v4839_v43 = vmul.f32 -1.442695, %v1493_v53 }
 0x6a6   : > { %v5220_v25 = vpop.eup %5219 }
 0x6a7   : > { %v1508_v26 = vadd.f32 1.0, %v5220_v25 }
 0x6a9   : > { %5221 = vrcp.f32 %v1508_v26 }
 0x6aa   : > { %5223 = vpow2.f32 %v4837_v27 }
 0x6b6   : > { %v5222_v35 = vpop.eup %5221 }
 0x6b7   : > { %v5722_v36 = vmul.f32 %v5222_v35, %v1492_v8  ;;  %v5224_v39 = vpop.eup %5223 }
 0x6b8   : > { %v1507_v40 = vadd.f32 1.0, %v5224_v39 }
 0x6b9   : > { %1737 = vrot.lane.b32.xlu0 %v5722_v36, %s7640_s4  ;;  %1725 = vrot.lane.b32.xlu1 %v5722_v36, %s7704_s6  ;;  %s7712_s4 = smov 127  }
 0x6ba   : > { %5225 = vrcp.f32 %v1507_v40 }
 0x6bb   : > { %5227 = vpow2.f32 %v4840_v38 }
 0x6bd   : > { %1637 = vrot.lane.b32.xlu0 %v5722_v36, %s7705_s2  ;;  %1625 = vrot.lane.b32.xlu1 %v5722_v36, %s7706_s0 }
 0x6c1   : > { %1705 = vrot.lane.b32.xlu0 %v5722_v36, %s7707_s7  ;;  %1693 = vrot.lane.b32.xlu1 %v5722_v36, %s7708_s3 }
 0x6c5   : > { %1605 = vrot.lane.b32.xlu0 %v5722_v36, %s7709_s27  ;;  %1593 = vrot.lane.b32.xlu1 %v5722_v36, %s7710_s1 }
 0x6c7   : > { %v5226_v44 = vpop.eup %5225 }
 0x6c8   : > { %v5748_v46 = vmul.f32 %v5226_v44, %v1491_v24  ;;  %v5228_v50 = vpop.eup %5227 }
 0x6c9   : > { %1673 = vrot.lane.b32.xlu0 %v5722_v36, %s7711_s25  ;;  %1661 = vrot.lane.b32.xlu1 %v5722_v36, %s7712_s4  ;;  %v1510_v51 = vadd.f32 1.0, %v5228_v50 }
 0x6cb   : > { %5229 = vrcp.f32 %v1510_v51 }
 0x6cc   : > { %5231 = vpow2.f32 %v4839_v43 }
 0x6cd   : > { %1573 = vrot.lane.b32.xlu0 %v5722_v36, %s7713_s8  ;;  %1561 = vrot.lane.b32.xlu1 %v5722_v36, %s7714_s28 }
 0x6d1   : > { %1735 = vrot.lane.b32.xlu0 %v5748_v46, %s7715_s29  ;;  %1723 = vrot.lane.b32.xlu1 %v5748_v46, %s7704_s6 }
 0x6d5   : > { %1635 = vrot.lane.b32.xlu0 %v5748_v46, %s7705_s2  ;;  %1623 = vrot.lane.b32.xlu1 %v5748_v46, %s7706_s0 }
 0x6d8   : > { %v5230_v54 = vpop.eup %5229 }
 0x6d9   : > { %1703 = vrot.lane.b32.xlu0 %v5748_v46, %s7707_s7  ;;  %1691 = vrot.lane.b32.xlu1 %v5748_v46, %s7708_s3  ;;  %v5775_v55 = vmul.f32 %v5230_v54, %v1494_v41  ;;  %v5232_v57 = vpop.eup %5231 }
 0x6da   : > { %v1509_v58 = vadd.f32 1.0, %v5232_v57 }
 0x6dc   : > { %5233 = vrcp.f32 %v1509_v58 }
 0x6dd   : > { %1603 = vrot.lane.b32.xlu0 %v5748_v46, %s7709_s27  ;;  %1591 = vrot.lane.b32.xlu1 %v5748_v46, %s7710_s1 }
 0x6e1   : > { %1671 = vrot.lane.b32.xlu0 %v5748_v46, %s7711_s25  ;;  %1659 = vrot.lane.b32.xlu1 %v5748_v46, %s7712_s4 }
 0x6e5   : > { %1571 = vrot.lane.b32.xlu0 %v5748_v46, %s7713_s8  ;;  %1559 = vrot.lane.b32.xlu1 %v5748_v46, %s7714_s28 }
 0x6e9   : > { %1741 = vrot.lane.b32.xlu0 %v5775_v55, %s7715_s29  ;;  %1729 = vrot.lane.b32.xlu1 %v5775_v55, %s7704_s6  ;;  %v5234_v59 = vpop.eup %5233 }
 0x6ea   : > { %v5805_v60 = vmul.f32 %v5234_v59, %v1493_v53 }
 0x6ed   : > { %1641 = vrot.lane.b32.xlu0 %v5775_v55, %s7705_s2  ;;  %1629 = vrot.lane.b32.xlu1 %v5775_v55, %s7706_s0 }
 0x6f1   : > { %1709 = vrot.lane.b32.xlu0 %v5775_v55, %s7707_s7  ;;  %1697 = vrot.lane.b32.xlu1 %v5775_v55, %s7708_s3 }
 0x6f5   : > { %1609 = vrot.lane.b32.xlu0 %v5775_v55, %s7709_s27  ;;  %1597 = vrot.lane.b32.xlu1 %v5775_v55, %s7710_s1 }
 0x6f9   : > { %1677 = vrot.lane.b32.xlu0 %v5775_v55, %s7711_s25  ;;  %1665 = vrot.lane.b32.xlu1 %v5775_v55, %s7712_s4 }
 0x6fd   : > { %1577 = vrot.lane.b32.xlu0 %v5775_v55, %s7713_s8  ;;  %1565 = vrot.lane.b32.xlu1 %v5775_v55, %s7714_s28 }
 0x701   : > { %1545 = vrot.lane.b32.xlu0 %v5775_v55, %s7716_s30  ;;  %1533 = vrot.lane.b32.xlu1 %v5775_v55, %s7717_s5 }
 0x705   : > { %1739 = vrot.lane.b32.xlu0 %v5805_v60, %s7715_s29  ;;  %1727 = vrot.lane.b32.xlu1 %v5805_v60, %s7704_s6 }
 0x709   : > { %1639 = vrot.lane.b32.xlu0 %v5805_v60, %s7705_s2  ;;  %1627 = vrot.lane.b32.xlu1 %v5805_v60, %s7706_s0 }
 0x70d   : > { %1707 = vrot.lane.b32.xlu0 %v5805_v60, %s7707_s7  ;;  %1695 = vrot.lane.b32.xlu1 %v5805_v60, %s7708_s3 }
 0x711   : > { %1607 = vrot.lane.b32.xlu0 %v5805_v60, %s7709_s27  ;;  %1595 = vrot.lane.b32.xlu1 %v5805_v60, %s7710_s1 }
 0x715   : > { %1675 = vrot.lane.b32.xlu0 %v5805_v60, %s7711_s25  ;;  %1663 = vrot.lane.b32.xlu1 %v5805_v60, %s7712_s4 }
 0x719   : > { %1575 = vrot.lane.b32.xlu0 %v5805_v60, %s7713_s8  ;;  %1563 = vrot.lane.b32.xlu1 %v5805_v60, %s7714_s28 }
 0x71d   : > { %1541 = vrot.lane.b32.xlu0 %v5722_v36, %s7716_s30  ;;  %1529 = vrot.lane.b32.xlu1 %v5722_v36, %s7717_s5 }
 0x721   : > { %1543 = vrot.lane.b32.xlu0 %v5805_v60, %s7716_s30  ;;  %1531 = vrot.lane.b32.xlu1 %v5805_v60, %s7717_s5 }
 0x725   : > { %1539 = vrot.lane.b32.xlu0 %v5748_v46, %s7716_s30  ;;  %1527 = vrot.lane.b32.xlu1 %v5748_v46, %s7717_s5 }
 0x729   : > { %1773 = vrot.lane.b32.xlu0 %v5775_v55, %s7719_s24  ;;  %1761 = vrot.lane.b32.xlu1 %v5775_v55, %s7720_s26 }
 0x72b   : > { %v5850_v62 = vpop.permute.xlu0 %1737  ;;  %v5852_v63 = vpop.permute.xlu1 %1725 }
 0x72d   : > { %1769 = vrot.lane.b32.xlu0 %v5722_v36, %s7719_s24  ;;  %1757 = vrot.lane.b32.xlu1 %v5722_v36, %s7720_s26 }
 0x72f   : > { %v5862_v2 = vpop.permute.xlu0 %1637  ;;  %v1626_v3 = vpop.permute.xlu1 %1625 }
 0x730   : > { %v1648_v0 = vsel %vm870_vm8, %v1626_v3, %v5862_v2 }
 0x731   : > { %1771 = vrot.lane.b32.xlu0 %v5805_v60, %s7719_s24  ;;  %1759 = vrot.lane.b32.xlu1 %v5805_v60, %s7720_s26 }
 0x733   : > { %v5868_v4 = vpop.permute.xlu0 %1705  ;;  %v5870_v5 = vpop.permute.xlu1 %1693 }
 0x735   : > { %1767 = vrot.lane.b32.xlu0 %v5748_v46, %s7719_s24  ;;  %1755 = vrot.lane.b32.xlu1 %v5748_v46, %s7720_s26 }
 0x737   : > { %v5882_v8 = vpop.permute.xlu0 %1605  ;;  %v5884_v10 = vpop.permute.xlu1 %1593 }
 0x739   : > { %1815 = vperm.xlu0 %5214, %v1801_v6   ;;  %1820 = vperm.xlu1 %5215, %v1802_v7  }
 0x73b   : > { %v5892_v18 = vpop.permute.xlu0 %1673  ;;  %v5894_v19 = vpop.permute.xlu1 %1661 }
 0x73d   : > { %1805 = vperm.xlu0 %5214, %v1799_v11   ;;  %1810 = vperm.xlu1 %5215, %v1800_v14  }
 0x73f   : > { %v5896_v20 = vpop.permute.xlu0 %1573  ;;  %v5898_v24 = vpop.permute.xlu1 %1561 }
 0x743   : > { %v1736_v25 = vpop.permute.xlu0 %1735  ;;  %v1724_v26 = vpop.permute.xlu1 %1723 }
 0x744   : > { %v1747_v12 = vsel %vm918_vm5, %v1724_v26, %v1736_v25 }
 0x745   : > { %v1751_v15 = vmul.f32 %v5546_v21, %v1747_v12  ;;  %v1616_v12 = vsel %vm856_vm10, %v5884_v10, %v5882_v8 }
 0x746   : > { %v1620_v8 = vmul.f32 %v5591_v49, %v1616_v12  ;;  %v1793_v12 = vld [vmem:[%s7718_s19 + $0x30] sm:$0xff] }
 0x747   : > { %v1636_v27 = vpop.permute.xlu0 %1635  ;;  %v1624_v28 = vpop.permute.xlu1 %1623 }
 0x74b   : > { %v5900_v30 = vpop.permute.xlu0 %1703  ;;  %v5902_v35 = vpop.permute.xlu1 %1691 }
 0x74f   : > { %v5904_v37 = vpop.permute.xlu0 %1603  ;;  %v5906_v39 = vpop.permute.xlu1 %1591 }
 0x753   : > { %v5908_v40 = vpop.permute.xlu0 %1671  ;;  %v5910_v41 = vpop.permute.xlu1 %1659 }
 0x757   : > { %v5912_v38 = vpop.permute.xlu0 %1571  ;;  %v5914_v44 = vpop.permute.xlu1 %1559 }
 0x75b   : > { %v1742_v45 = vpop.permute.xlu0 %1741  ;;  %v1730_v48 = vpop.permute.xlu1 %1729 }
 0x75c   : > { %v1750_v50 = vsel %vm918_vm5, %v1730_v48, %v1742_v45 }
 0x75d   : > { %v1754_v51 = vmul.f32 %v5546_v21, %v1750_v50 }
 0x75f   : > { %v1642_v52 = vpop.permute.xlu0 %1641  ;;  %4932 = vmatprep.subr.mxu1 %v1754_v51  ;;  %v1630_v53 = vpop.permute.xlu1 %1629 }
 0x760   : > { %v1650_v43 = vsel %vm870_vm8, %v1630_v53, %v1642_v52  ;;  %v1748_v53 = vsel %vm918_vm5, %v5852_v63, %v5850_v62 }
 0x761   : > { %v1654_v54 = vmul.f32 %v5578_v42, %v1650_v43 }
 0x763   : > { %v1710_v57 = vpop.permute.xlu0 %1709  ;;  %4933 = vmatpush3.msra.mxu1 %v1654_v54  ;;  %v1698_v58 = vpop.permute.xlu1 %1697 }
 0x764   : > { %v1718_v62 = vsel %vm904_vm7, %v1698_v58, %v1710_v57 }
 0x765   : > { %v1722_v25 = vmul.f32 %v5562_v29, %v1718_v62 }
 0x767   : > { %v1610_v59 = vpop.permute.xlu0 %1609  ;;  %v1598_v61 = vpop.permute.xlu1 %1597 }
 0x768   : > { %v1618_v2 = vsel %vm856_vm10, %v1598_v61, %v1610_v59 }
 0x76b   : > { %v1678_v1 = vpop.permute.xlu0 %1677  ;;  %v1666_v6 = vpop.permute.xlu1 %1665 }
 0x76c   : > { %v1686_v10 = vsel %vm890_vm6, %v1666_v6, %v1678_v1 }
 0x76f   : > { %v1578_v7 = vpop.permute.xlu0 %1577  ;;  %v1566_v11 = vpop.permute.xlu1 %1565 }
 0x773   : > { %v5920_v14 = vpop.permute.xlu0 %1545  ;;  %v5922_v45 = vpop.permute.xlu1 %1533 }
 0x777   : > { %v1740_v48 = vpop.permute.xlu0 %1739  ;;  %v1728_v50 = vpop.permute.xlu1 %1727 }
 0x778   : > { %v1749_v51 = vsel %vm918_vm5, %v1728_v50, %v1740_v48  ;;  %v1752_v48 = vmul.f32 %v5546_v21, %v1748_v53  ;;  %v1647_v50 = vsel %vm870_vm8, %v1624_v28, %v1636_v27  ;;  %v1615_v28 = vsel %vm856_vm10, %v5906_v39, %v5904_v37 }
 0x779   : > { %v1753_v52 = vmul.f32 %v5546_v21, %v1749_v51  ;;  %v1652_v51 = vmul.f32 %v5578_v42, %v1648_v0  ;;  %v1651_v3 = vmul.f32 %v5578_v42, %v1647_v50  ;;  %v1716_v0 = vsel %vm904_vm7, %v5870_v5, %v5868_v4 }
 0x77a   : > { %v1720_v5 = vmul.f32 %v5562_v29, %v1716_v0  ;;  %v1690_v37 = vmul.f32 %v5552_v23, %v1686_v10  ;;  %v1684_v39 = vsel %vm890_vm6, %v5894_v19, %v5892_v18  ;;  %v1683_v53 = vsel %vm890_vm6, %v5910_v41, %v5908_v40 }
 0x77b   : > { %v1640_v43 = vpop.permute.xlu0 %1639  ;;  %4934 = vmatprep.subr.mxu1 %v1753_v52  ;;  %v1628_v54 = vpop.permute.xlu1 %1627  ;;  %v1688_v19 = vmul.f32 %v5552_v23, %v1684_v39  ;;  %v1554_v40 = vsel %vm828_vm11, %v5922_v45, %v5920_v14  ;;  %v1657_v14 = vmul.f32 %v5568_v33, %v5805_v60 }
 0x77c   : > { %v1649_v9 = vsel %vm870_vm8, %v1628_v54, %v1640_v43  ;;  %v1583_v43 = vsel %vm842_vm9, %v5914_v44, %v5912_v38  ;;  %v1658_v38 = vmul.f32 %v5568_v33, %v5775_v55  ;;  %v1558_v44 = vmul.f32 %v5599_v56, %v1554_v40 }
 0x77d   : > { %v1653_v13 = vmul.f32 %v5578_v42, %v1649_v9  ;;  %v1587_v41 = vmul.f32 %v5585_v47, %v1583_v43  ;;  %v1656_v55 = vmul.f32 %v5568_v33, %v5722_v36  ;;  %v1791_v36 = vld [vmem:[%s7718_s19 + $0x20] sm:$0xff] }
 0x77f   : > { %v1708_v63 = vpop.permute.xlu0 %1707  ;;  %4935 = vmatpush3.msra.mxu1 %v1653_v13  ;;  %v1696_v52 = vpop.permute.xlu1 %1695  ;;  %v1622_v13 = vmul.f32 %v5591_v49, %v1618_v2 }
 0x780   : > { %4936 = vmatprep.subr.mxu1 %v1752_v48  ;;  %v1717_v9 = vsel %vm904_vm7, %v1696_v52, %v1708_v63  ;;  %v1687_v48 = vmul.f32 %v5552_v23, %v1683_v53 }
 0x781   : > { %4937 = vmatpush3.msra.mxu1 %v1652_v51  ;;  %v1721_v42 = vmul.f32 %v5562_v29, %v1717_v9  ;;  %v1787_v9 = vld [vmem:[%s7718_s19] sm:$0xff] }
 0x782   : > { %4938 = vmatprep.subr.mxu1 %v1751_v15  ;;  %v1715_v15 = vsel %vm904_vm7, %v5902_v35, %v5900_v30  ;;  %v1586_v30 = vsel %vm842_vm9, %v1566_v11, %v1578_v7  ;;  %v1619_v35 = vmul.f32 %v5591_v49, %v1615_v28  ;;  %v1584_v7 = vsel %vm842_vm9, %v5898_v24, %v5896_v20 }
 0x783   : > { %v1608_v26 = vpop.permute.xlu0 %1607  ;;  %4939 = vmatpush3.msra.mxu1 %v1651_v3  ;;  %v1596_v21 = vpop.permute.xlu1 %1595  ;;  %v1719_v59 = vmul.f32 %v5562_v29, %v1715_v15  ;;  %v1590_v1 = vmul.f32 %v5585_v47, %v1586_v30  ;;  %v1588_v20 = vmul.f32 %v5585_v47, %v1584_v7  ;;  %v1655_v3 = vmul.f32 %v5568_v33, %v5748_v46  ;;  %v1794_v46 = vld [vmem:[%s7718_s19 + $0x38] sm:$0xff] }
 0x784   : > { %v1617_v27 = vsel %vm856_vm10, %v1596_v21, %v1608_v26  ;;  %4940 = vmatprep.subr.mxu1 %v1722_v25 }
 0x785   : > { %v1621_v4 = vmul.f32 %v5591_v49, %v1617_v27  ;;  %4941 = vmatpush3.msra.mxu1 %v1622_v13 }
 0x786   : > { %4942 = vmatprep.subr.mxu1 %v1721_v42  ;;  %v1797_v42 = vld [vmem:[%s7718_s19 + $0x50] sm:$0xff] }
 0x787   : > { %v1676_v57 = vpop.permute.xlu0 %1675  ;;  %4943 = vmatpush3.msra.mxu1 %v1621_v4  ;;  %v1664_v58 = vpop.permute.xlu1 %1663 }
 0x788   : > { %4944 = vmatprep.subr.mxu1 %v1720_v5  ;;  %v1685_v61 = vsel %vm890_vm6, %v1664_v58, %v1676_v57 }
 0x789   : > { %4945 = vmatpush3.msra.mxu1 %v1620_v8  ;;  %v1689_v49 = vmul.f32 %v5552_v23, %v1685_v61  ;;  %v1796_v8 = vld [vmem:[%s7718_s19 + $0x48] sm:$0xff]  ;;  %v1795_v61 = vld [vmem:[%s7718_s19 + $0x40] sm:$0xff] }
 0x78a   : > { %4946 = vmatprep.subr.mxu1 %v1719_v59 }
 0x78b   : > { %v1576_v6 = vpop.permute.xlu0 %1575  ;;  %4947 = vmatpush3.msra.mxu1 %v1619_v35  ;;  %v1564_v29 = vpop.permute.xlu1 %1563  ;;  %v1792_v35 = vld [vmem:[%s7718_s19 + $0x28] sm:$0xff] }
 0x78c   : > { %v1585_v11 = vsel %vm842_vm9, %v1564_v29, %v1576_v6  ;;  %4948 = vmatprep.subr.mxu1 %v1690_v37  ;;  %v7722_v37 = vmov 0.0  }
 0x78d   : > { %v1589_v18 = vmul.f32 %v5585_v47, %v1585_v11  ;;  %4949 = vmatpush3.msra.mxu1 %v1590_v1 }
 0x78e   : > { %4950 = vmatprep.subr.mxu1 %v1689_v49 }
 0x78f   : > { %v1542_v24 = vpop.permute.xlu0 %1541  ;;  %4951 = vmatpush3.msra.mxu1 %v1589_v18  ;;  %v1530_v54 = vpop.permute.xlu1 %1529 }
 0x790   : > { %4952 = vmatprep.subr.mxu1 %v1688_v19  ;;  %v1552_v62 = vsel %vm828_vm11, %v1530_v54, %v1542_v24 }
 0x791   : > { %4953 = vmatpush3.msra.mxu1 %v1588_v20  ;;  %v1556_v45 = vmul.f32 %v5599_v56, %v1552_v62 }
 0x792   : > { %4954 = vmatprep.subr.mxu1 %v1687_v48 }
 0x793   : > { %v1544_v50 = vpop.permute.xlu0 %1543  ;;  %4955 = vmatpush3.msra.mxu1 %v1587_v41  ;;  %v1532_v51 = vpop.permute.xlu1 %1531 }
 0x794   : > { %v1553_v23 = vsel %vm828_vm11, %v1532_v51, %v1544_v50  ;;  %4956 = vmatprep.subr.mxu1 %v1658_v38 }
 0x795   : > { %v1557_v47 = vmul.f32 %v5599_v56, %v1553_v23  ;;  %4957 = vmatpush3.msra.mxu1 %v1558_v44 }
 0x796   : > { %4958 = vmatprep.subr.mxu1 %v1657_v14 }
 0x797   : > { %v1540_v63 = vpop.permute.xlu0 %1539  ;;  %v1528_v52 = vpop.permute.xlu1 %1527  ;;  %4959 = vmatpush3.msra.mxu1 %v1557_v47 }
 0x798   : > { %v1551_v2 = vsel %vm828_vm11, %v1528_v52, %v1540_v63  ;;  %4960 = vmatprep.subr.mxu1 %v1656_v55 }
 0x799   : > { %v1555_v60 = vmul.f32 %v5599_v56, %v1551_v2  ;;  %4961 = vmatpush3.msra.mxu1 %v1556_v45  ;;  %v1790_v56 = vld [vmem:[%s7718_s19 + $0x18] sm:$0xff] }
 0x79a   : > { %4962 = vmatprep.subr.mxu1 %v1655_v3 }
 0x79b   : > { %v1774_v25 = vpop.permute.xlu0 %1773  ;;  %v1762_v0 = vpop.permute.xlu1 %1761  ;;  %4963 = vmatpush3.msra.mxu1 %v1555_v60  ;;  %v2339_v60 = vld [vmem:[%s7588_s9 + $0x10] sm:$0xff] }
 0x79c   : > { %v1782_v13 = vsel %vm932_vm4, %v1762_v0, %v1774_v25  ;;  %1900 = vmatmul.mubr.f32.vlgmr.msra.gmra.mxu1 %v1787_v9  ;;  %v2368_v9 = vld [vmem:[%s7589_s10 + $0x18] sm:$0xff]  ;;  %v2366_v25 = vld [vmem:[%s7589_s10 + $0x8] sm:$0xff] }
 0x79d   : > { %v1786_v33 = vmul.f32 %v5539_v16, %v1782_v13  ;;  %1904 = vmatprep.mubr.f32.mxu1 %v1791_v36  ;;  %v2367_v36 = vld [vmem:[%s7589_s10 + $0x10] sm:$0xff] }
 0x79f   : > { %v1770_v26 = vpop.permute.xlu0 %1769  ;;  %5115 = vmatprep.subr.mxu0 %v1786_v33  ;;  %v1758_v21 = vpop.permute.xlu1 %1757 }
 0x7a0   : > { %1905 = vmatmul.mubr.f32.gmra.mxu1 %v1790_v56  ;;  %5116 = vmatpush3.msra.mxu0 %v1786_v33  ;;  %v1780_v4 = vsel %vm932_vm4, %v1758_v21, %v1770_v26 }
 0x7a1   : > { %1909 = vmatprep.mubr.f32.mxu1 %v1794_v46  ;;  %v1784_v10 = vmul.f32 %v5539_v16, %v1780_v4 }
 0x7a3   : > { %v1772_v27 = vpop.permute.xlu0 %1771  ;;  %v1760_v15 = vpop.permute.xlu1 %1759 }
 0x7a4   : > { %v1781_v5 = vsel %vm932_vm4, %v1760_v15, %v1772_v27  ;;  %1910 = vmatmul.mubr.f32.gmra.mxu1 %v1793_v12 }
 0x7a5   : > { %v1785_v28 = vmul.f32 %v5539_v16, %v1781_v5  ;;  %1914 = vmatprep.mubr.f32.mxu1 %v1797_v42 }
 0x7a7   : > { %v1768_v57 = vpop.permute.xlu0 %1767  ;;  %5117 = vmatprep.subr.mxu0 %v1785_v28  ;;  %v1756_v58 = vpop.permute.xlu1 %1755 }
 0x7a8   : > { %v1779_v59 = vsel %vm932_vm4, %v1756_v58, %v1768_v57  ;;  %1915 = vmatmul.mubr.f32.gmra.mxu1 %v1796_v8  ;;  %5118 = vmatpush3.msra.mxu0 %v1785_v28  ;;  %v2340_v58 = vld [vmem:[%s7588_s9 + $0x18] sm:$0xff] }
 0x7a9   : > { %v1783_v30 = vmul.f32 %v5539_v16, %v1779_v59  ;;  %5119 = vmatprep.subr.mxu0 %v1784_v10  ;;  %v1798_v16 = vld [vmem:[%s7718_s19 + $0x58] sm:$0xff]  ;;  %v2338_v59 = vld [vmem:[%s7588_s9 + $0x8] sm:$0xff] }
 0x7aa   : > { %5120 = vmatpush3.msra.mxu0 %v1784_v10 }
 0x7ab   : > { %5121 = vmatprep.subr.mxu0 %v1783_v30 }
 0x7ac   : > { %5122 = vmatpush3.msra.mxu0 %v1783_v30 }
 0x7ad   : > { %5124 = vmatmul.mubr.msk.f32.vlgmr.msra.gmra.mxu0 %vm1090_vm12, %v1792_v35  ;;  %5129 = vmatprep.subr.mxu0 %v7722_v37 }
 0x7ae   : > { %5126 = vmatprep.mubr.msk.f32.mxu0 %vm1090_vm12, %v1795_v61 }
 0x7b1   : > { %5127 = vmatmul.mubr.msk.f32.gmra.mxu0 %vm1090_vm12, %v1798_v16 }
 0x7b2   : > { %5137 = vmatprep.mubr.msk.f32.mxu0 %vm5310_vm0, %v7722_v37 }
 0x7b4   : > { %v1821_v19 = vpop.permute.xlu1 %1820  ;;  %v1816_v24 = vpop.permute.xlu0 %1815 }
 0x7b8   : > { %v1811_v51 = vpop.permute.xlu1 %1810  ;;  %v1806_v47 = vpop.permute.xlu0 %1805 }
 0x85c   : > { %v4964_v39 = vpop.f32.mrf.mxu1 }
 0x85e   : > { %v4965_v1 = vpop.f32.mrf.mxu1 }
 0x85f   : > { %v4966_v38 = vadd.f32 %v4965_v1, %v4964_v39 }
 0x860   : > { %v4967_v6 = vpop.f32.mrf.mxu1 }
 0x861   : > { %v1902_v45 = vadd.f32 %v4966_v38, %v1806_v47 }
 0x862   : > { %v4968_v29 = vpop.f32.mrf.mxu1 }
 0x863   : > { %v4969_v48 = vadd.f32 %v4968_v29, %v4967_v6 }
 0x864   : > { %v4970_v7 = vpop.f32.mrf.mxu1 }
 0x865   : > { %v1907_v23 = vadd.f32 %v4969_v48, %v1811_v51 }
 0x866   : > { %v4971_v49 = vpop.f32.mrf.mxu1 }
 0x867   : > { %v4972_v20 = vadd.f32 %v4971_v49, %v4970_v7 }
 0x868   : > { %v4973_v11 = vpop.f32.mrf.mxu1 }
 0x869   : > { %v1912_v50 = vadd.f32 %v4972_v20, %v1816_v24 }
 0x86a   : > { %v4974_v53 = vpop.f32.mrf.mxu1 }
 0x86b   : > { %v4975_v18 = vadd.f32 %v4974_v53, %v4973_v11 }
 0x86d   : > { %v5125_v43 = vpop.f32.mrf.mxu0  ;;  %v1917_v40 = vadd.f32 %v4975_v18, %v1821_v19 }
 0x86e   : > { %v1992_v55 = vadd.f32 %v5125_v43, %v1907_v23 }
 0x86f   : > { %v1986_v54 = vpop.f32.mrf.mxu0 }
 0x870   : > { %v1987_v63 = vadd.f32 %v1986_v54, %v1902_v45 }
 0x871   : > { %v5128_v41 = vpop.f32.mrf.mxu0 }
 0x872   : > { %v2002_v44 = vadd.f32 %v5128_v41, %v1917_v40 }
 0x873   : > { %v1996_v62 = vpop.f32.mrf.mxu0 }
 0x874   : > { %v1997_v14 = vadd.f32 %v1996_v62, %v1912_v50  ;;  %5130 = vmatpush3.msra.mxu0 %v2002_v44 }
 0x875   : > { %5131 = vmatprep.subr.mxu0 %v7722_v37 }
 0x876   : > { %5132 = vmatpush3.msra.mxu0 %v1997_v14 }
 0x877   : > { %5133 = vmatprep.subr.mxu0 %v7722_v37 }
 0x878   : > { %5134 = vmatpush3.msra.mxu0 %v1992_v55 }
 0x879   : > { %5135 = vmatprep.subr.mxu0 %v7722_v37 }
 0x87a   : > { %5136 = vmatpush3.msra.mxu0 %v1987_v63 }
 0x87b   : > { %5138 = vmatmul.mubr.msk.f32.vlgmr.msra.gmra.mxu0 %vm1090_vm12, %v5633_v17 }
 0x87c   : > { %5142 = vmatprep.mubr.msk.f32.mxu0 %vm842_vm9, %v5643_v22 }
 0x93b   : > { %v2071_v52 = vpop.f32.mrf.mxu0 }
 0x93c   : > { %v2075_v2 = vsel %vm1164_vm13, %v2071_v52, 0.0 }
 0x93d   : > { %2076 = vadd.xlane.f32.xlu1 %v2075_v2  ;;  %v5139_v3 = vpop.f32.mrf.mxu0 }
 0x94e   : > { %2353 = vperm.xlu1 %5215, %v2339_v60  }
 0x952   : > { %2386 = vperm.xlu1 %5215, %v2368_v9  }
 0x956   : > { %2381 = vperm.xlu1 %5215, %v2367_v36  }
 0x95a   : > { %2376 = vperm.xlu1 %5215, %v2366_v25  }
 0x9c6   : > { %v2077_v0 = vpop.xlane.xlu1 %2076 }
 0x9c7   : > { %v2078_v13 = vmul.f32 0.00390625, %v2077_v0 }
 0x9c9   : > { %5140 = vmatprep.subr.mxu0 %v2078_v13 }
 0x9ca   : > { %5141 = vmatpush3.msra.mxu0 %v2078_v13  ;;  %v2354_v39 = vpop.permute.xlu1 %2353 }
 0x9cb   : > { %5143 = vmatmul.mubr.msk.f32.vlgmr.msra.gmra.mxu0 %vm842_vm9, %v5662_v31  ;;  %5148 = vmatprep.subr.mxu0 %v7722_v37 }
 0x9cc   : > { %5145 = vmatprep.mubr.msk.f32.mxu0 %vm842_vm9, %v5667_v32 }
 0x9ce   : > { %v2387_v1 = vpop.permute.xlu1 %2386 }
 0x9cf   : > { %5146 = vmatmul.mubr.msk.f32.gmra.mxu0 %vm842_vm9, %v5677_v34 }
 0x9d0   : > { %5156 = vmatprep.mubr.msk.f32.mxu0 %vm5310_vm0, %v7722_v37  ;;  %vm3052_vm0 = vcmask 138240  }
 0x9d2   : > { %v2382_v29 = vpop.permute.xlu1 %2381 }
 0x9d6   : > { %v2377_v18 = vpop.permute.xlu1 %2376 }
 0xa8b   : > { %v5144_v33 = vpop.f32.mrf.mxu0 }
 0xa8c   : > { %v2165_v12 = vsub.f32 %v1992_v55, %v5144_v33 }
 0xa8d   : > { %v2145_v56 = vpop.f32.mrf.mxu0 }
 0xa8e   : > { %v2164_v15 = vsub.f32 %v1987_v63, %v2145_v56  ;;  %v2169_v5 = vmul.f32 %v2165_v12, %v2165_v12 }
 0xa8f   : > { %v5147_v46 = vpop.f32.mrf.mxu0 }
 0xa90   : > { %v6078_v26 = vsub.f32 %v2002_v44, %v5147_v46  ;;  %v2168_v28 = vmul.f32 %v2164_v15, %v2164_v15 }
 0xa91   : > { %v2155_v21 = vpop.f32.mrf.mxu0 }
 0xa92   : > { %v2171_v42 = vmul.f32 %v6078_v26, %v6078_v26  ;;  %v6082_v27 = vsub.f32 %v1997_v14, %v2155_v21  ;;  %v2686_v21 = vld [vmem:[%s7590_s11 + $0x8] sm:$0xff] }
 0xa93   : > { %2797 = vmatprep.mubr.f32.mxu1 %v2686_v21 }
 0xa94   : > { %v2170_v4 = vmul.f32 %v6082_v27, %v6082_v27  ;;  %5149 = vmatpush3.msra.mxu0 %v2171_v42 }
 0xa95   : > { %5150 = vmatprep.subr.mxu0 %v7722_v37 }
 0xa96   : > { %5151 = vmatpush3.msra.mxu0 %v2170_v4 }
 0xa97   : > { %5152 = vmatprep.subr.mxu0 %v7722_v37 }
 0xa98   : > { %5153 = vmatpush3.msra.mxu0 %v2169_v5 }
 0xa99   : > { %5154 = vmatprep.subr.mxu0 %v7722_v37 }
 0xa9a   : > { %5155 = vmatpush3.msra.mxu0 %v2168_v28 }
 0xa9b   : > { %5157 = vmatmul.mubr.msk.f32.vlgmr.msra.gmra.mxu0 %vm1090_vm12, %v5633_v17  ;;  %v2337_v17 = vld [vmem:[%s7588_s9] sm:$0xff] }
 0xa9c   : > { %5161 = vmatprep.mubr.msk.f32.mxu0 %vm842_vm9, %v5643_v22  ;;  %v2365_v22 = vld [vmem:[%s7589_s10] sm:$0xff] }
 0xb5b   : > { %v2238_v8 = vpop.f32.mrf.mxu0 }
 0xb5c   : > { %v2242_v10 = vsel %vm1164_vm13, %v2238_v8, 0.0  ;;  %v2698_v8 = vld [vmem:[%s7591_s12 + $0x8] sm:$0xff] }
 0xb5d   : > { %2243 = vadd.xlane.f32.xlu0 %v2242_v10  ;;  %v5158_v57 = vpop.f32.mrf.mxu0  ;;  %v2697_v10 = vld [vmem:[%s7591_s12] sm:$0xff] }
 0xb73   : > { %2358 = vperm.xlu0 %5214, %v2340_v58  }
 0xb77   : > { %2348 = vperm.xlu0 %5214, %v2338_v59   ;;  %v2700_v59 = vld [vmem:[%s7591_s12 + $0x18] sm:$0xff] }
 0xb7b   : > { %2343 = vperm.xlu0 %5214, %v2337_v17   ;;  %v2699_v17 = vld [vmem:[%s7591_s12 + $0x10] sm:$0xff] }
 0xb7f   : > { %2371 = vperm.xlu0 %5214, %v2365_v22  }
 0xbe6   : > { %v2244_v30 = vpop.xlane.xlu0 %2243 }
 0xbe7   : > { %v2245_v35 = vmul.f32 0.00390625, %v2244_v30 }
 0xbe9   : > { %v2246_v61 = vadd.f32 1e-06, %v2245_v35 }
 0xbeb   : > { %5235 = vrsqrt.f32 %v2246_v61 }
 0xbee   : > { %v2359_v6 = vpop.permute.xlu0 %2358 }
 0xbf2   : > { %v2349_v11 = vpop.permute.xlu0 %2348 }
 0xbf6   : > { %v2344_v24 = vpop.permute.xlu0 %2343 }
 0xbf8   : > { %v5236_v16 = vpop.eup %5235 }
 0xbf9   : > { %5159 = vmatprep.subr.mxu0 %v5236_v16 }
 0xbfa   : > { %5160 = vmatpush3.msra.mxu0 %v5236_v16  ;;  %v2372_v48 = vpop.permute.xlu0 %2371 }
 0xbfb   : > { %5162 = vmatmul.mubr.msk.f32.vlgmr.msra.gmra.mxu0 %vm842_vm9, %v5662_v31 }
 0xbfc   : > { %5164 = vmatprep.mubr.msk.f32.mxu0 %vm842_vm9, %v5667_v32 }
 0xbff   : > { %5165 = vmatmul.mubr.msk.f32.gmra.mxu0 %vm842_vm9, %v5677_v34 }
 0xcbb   : > { %v5163_v7 = vpop.f32.mrf.mxu0 }
 0xcbc   : > { %v2334_v49 = vmul.f32 %v5163_v7, %v2165_v12 }
 0xcbd   : > { %v2314_v20 = vpop.f32.mrf.mxu0 }
 0xcbe   : > { %v2362_v53 = vmul.f32 %v2349_v11, %v2334_v49  ;;  %v2333_v31 = vmul.f32 %v2314_v20, %v2164_v15 }
 0xcbf   : > { %v5166_v50 = vpop.f32.mrf.mxu0 }
 0xcc0   : > { %v2390_v19 = vadd.f32 %v2377_v18, %v2362_v53  ;;  %v2361_v54 = vmul.f32 %v2344_v24, %v2333_v31  ;;  %v2336_v51 = vmul.f32 %v5166_v50, %v6078_v26 }
 0xcc1   : > { %v2324_v2 = vpop.f32.mrf.mxu0 }
 0xcc2   : > { %v4856_v43 = vmul.f32 -1.442695, %v2390_v19  ;;  %v2389_v34 = vadd.f32 %v2372_v48, %v2361_v54  ;;  %v2364_v14 = vmul.f32 %v2359_v6, %v2336_v51  ;;  %v2335_v60 = vmul.f32 %v2324_v2, %v6082_v27  ;;  %v2687_v27 = vld [vmem:[%s7590_s11 + $0x10] sm:$0xff] }
 0xcc3   : > { %5175 = vmatprep.mubr.msk.f32.mxu0 %vm1090_vm12, %v2687_v27 }
 0xcc4   : > { %5237 = vpow2.f32 %v4856_v43  ;;  %v4855_v41 = vmul.f32 -1.442695, %v2389_v34  ;;  %v2392_v47 = vadd.f32 %v2387_v1, %v2364_v14  ;;  %v2363_v9 = vmul.f32 %v2354_v39, %v2335_v60 }
 0xcc6   : > { %v4858_v55 = vmul.f32 -1.442695, %v2392_v47  ;;  %v2391_v36 = vadd.f32 %v2382_v29, %v2363_v9 }
 0xcc8   : > { %v4857_v25 = vmul.f32 -1.442695, %v2391_v36 }
 0xcd1   : > { %v5238_v32 = vpop.eup %5237 }
 0xcd2   : > { %v2406_v40 = vadd.f32 1.0, %v5238_v32 }
 0xcd4   : > { %5239 = vrcp.f32 %v2406_v40 }
 0xcd5   : > { %5241 = vpow2.f32 %v4855_v41 }
 0xce1   : > { %v5240_v38 = vpop.eup %5239 }
 0xce2   : > { %v6112_v44 = vmul.f32 %v5240_v38, %v2390_v19  ;;  %v5242_v62 = vpop.eup %5241 }
 0xce3   : > { %v2405_v23 = vadd.f32 1.0, %v5242_v62  ;;  %v5288_v62 = vld [vmem:[%s7601_s22 + $0x3] ss:$0 sm:$0xff] }
 0xce4   : > { %2635 = vrot.lane.b32.xlu0 %v6112_v44, %s7715_s29  ;;  %2623 = vrot.lane.b32.xlu1 %v6112_v44, %s7704_s6 }
 0xce5   : > { %5243 = vrcp.f32 %v2405_v23 }
 0xce6   : > { %5245 = vpow2.f32 %v4858_v55 }
 0xce8   : > { %2535 = vrot.lane.b32.xlu0 %v6112_v44, %s7705_s2  ;;  %2523 = vrot.lane.b32.xlu1 %v6112_v44, %s7706_s0 }
 0xcec   : > { %2603 = vrot.lane.b32.xlu0 %v6112_v44, %s7707_s7  ;;  %2591 = vrot.lane.b32.xlu1 %v6112_v44, %s7708_s3 }
 0xcf0   : > { %2503 = vrot.lane.b32.xlu0 %v6112_v44, %s7709_s27  ;;  %2491 = vrot.lane.b32.xlu1 %v6112_v44, %s7710_s1 }
 0xcf2   : > { %v5244_v45 = vpop.eup %5243 }
 0xcf3   : > { %v6143_v63 = vmul.f32 %v5244_v45, %v2389_v34  ;;  %v5246_v52 = vpop.eup %5245  ;;  %v5287_v34 = vld [vmem:[%s7601_s22 + $0x7] ss:$0 sm:$0xff] }
 0xcf4   : > { %2571 = vrot.lane.b32.xlu0 %v6112_v44, %s7711_s25  ;;  %2559 = vrot.lane.b32.xlu1 %v6112_v44, %s7712_s4  ;;  %v2408_v3 = vadd.f32 1.0, %v5246_v52 }
 0xcf6   : > { %5247 = vrcp.f32 %v2408_v3 }
 0xcf7   : > { %5249 = vpow2.f32 %v4857_v25 }
 0xcf8   : > { %2471 = vrot.lane.b32.xlu0 %v6112_v44, %s7713_s8  ;;  %2459 = vrot.lane.b32.xlu1 %v6112_v44, %s7714_s28 }
 0xcfc   : > { %2439 = vrot.lane.b32.xlu0 %v6112_v44, %s7716_s30  ;;  %2427 = vrot.lane.b32.xlu1 %v6112_v44, %s7717_s5 }
 0xd00   : > { %2633 = vrot.lane.b32.xlu0 %v6143_v63, %s7715_s29  ;;  %2621 = vrot.lane.b32.xlu1 %v6143_v63, %s7704_s6 }
 0xd03   : > { %v5248_v0 = vpop.eup %5247 }
 0xd04   : > { %2533 = vrot.lane.b32.xlu0 %v6143_v63, %s7705_s2  ;;  %2521 = vrot.lane.b32.xlu1 %v6143_v63, %s7706_s0  ;;  %v6174_v13 = vmul.f32 %v5248_v0, %v2392_v47  ;;  %v5250_v33 = vpop.eup %5249 }
 0xd05   : > { %v2407_v56 = vadd.f32 1.0, %v5250_v33 }
 0xd07   : > { %5251 = vrcp.f32 %v2407_v56  ;;  %v6333_v56 = vld [vmem:[%s7601_s22 + $0x8] ss:$0 sm:$0xff] }
 0xd08   : > { %2601 = vrot.lane.b32.xlu0 %v6143_v63, %s7707_s7  ;;  %2589 = vrot.lane.b32.xlu1 %v6143_v63, %s7708_s3 }
 0xd0c   : > { %2501 = vrot.lane.b32.xlu0 %v6143_v63, %s7709_s27  ;;  %2489 = vrot.lane.b32.xlu1 %v6143_v63, %s7710_s1 }
 0xd10   : > { %2569 = vrot.lane.b32.xlu0 %v6143_v63, %s7711_s25  ;;  %2557 = vrot.lane.b32.xlu1 %v6143_v63, %s7712_s4 }
 0xd14   : > { %2469 = vrot.lane.b32.xlu0 %v6143_v63, %s7713_s8  ;;  %2457 = vrot.lane.b32.xlu1 %v6143_v63, %s7714_s28  ;;  %v5252_v46 = vpop.eup %5251 }
 0xd15   : > { %v6208_v26 = vmul.f32 %v5252_v46, %v2391_v36 }
 0xd18   : > { %2437 = vrot.lane.b32.xlu0 %v6143_v63, %s7716_s30  ;;  %2425 = vrot.lane.b32.xlu1 %v6143_v63, %s7717_s5 }
 0xd1c   : > { %2639 = vrot.lane.b32.xlu0 %v6174_v13, %s7715_s29  ;;  %2627 = vrot.lane.b32.xlu1 %v6174_v13, %s7704_s6 }
 0xd20   : > { %2539 = vrot.lane.b32.xlu0 %v6174_v13, %s7705_s2  ;;  %2527 = vrot.lane.b32.xlu1 %v6174_v13, %s7706_s0 }
 0xd24   : > { %2607 = vrot.lane.b32.xlu0 %v6174_v13, %s7707_s7  ;;  %2595 = vrot.lane.b32.xlu1 %v6174_v13, %s7708_s3 }
 0xd28   : > { %2507 = vrot.lane.b32.xlu0 %v6174_v13, %s7709_s27  ;;  %2495 = vrot.lane.b32.xlu1 %v6174_v13, %s7710_s1 }
 0xd2c   : > { %2575 = vrot.lane.b32.xlu0 %v6174_v13, %s7711_s25  ;;  %2563 = vrot.lane.b32.xlu1 %v6174_v13, %s7712_s4 }
 0xd30   : > { %2475 = vrot.lane.b32.xlu0 %v6174_v13, %s7713_s8  ;;  %2463 = vrot.lane.b32.xlu1 %v6174_v13, %s7714_s28 }
 0xd34   : > { %2443 = vrot.lane.b32.xlu0 %v6174_v13, %s7716_s30  ;;  %2431 = vrot.lane.b32.xlu1 %v6174_v13, %s7717_s5 }
 0xd38   : > { %2671 = vrot.lane.b32.xlu0 %v6174_v13, %s7719_s24  ;;  %2659 = vrot.lane.b32.xlu1 %v6174_v13, %s7720_s26 }
 0xd3c   : > { %2637 = vrot.lane.b32.xlu0 %v6208_v26, %s7715_s29  ;;  %2625 = vrot.lane.b32.xlu1 %v6208_v26, %s7704_s6  ;;  %s7723_s29 = sld [smem:[#allocation20_spill]]  ;;  %s5332_s6 = smov 113  }
 0xd40   : > { %2537 = vrot.lane.b32.xlu0 %v6208_v26, %s7705_s2  ;;  %2525 = vrot.lane.b32.xlu1 %v6208_v26, %s7706_s0  ;;  %s7731_s0 = sld [smem:[#allocation29_spill]] }
 0xd44   : > { %2605 = vrot.lane.b32.xlu0 %v6208_v26, %s7707_s7  ;;  %2593 = vrot.lane.b32.xlu1 %v6208_v26, %s7708_s3 }
 0xd48   : > { %2505 = vrot.lane.b32.xlu0 %v6208_v26, %s7709_s27  ;;  %2493 = vrot.lane.b32.xlu1 %v6208_v26, %s7710_s1  ;;  %s7730_s27 = sld [smem:[#allocation22_spill]] }
 0xd49   : > { %s7732_s1 = sld [smem:[#allocation27_spill]] }
 0xd4c   : > { %2573 = vrot.lane.b32.xlu0 %v6208_v26, %s7711_s25  ;;  %2561 = vrot.lane.b32.xlu1 %v6208_v26, %s7712_s4  ;;  %s7735_s25 = sld [smem:[#allocation28_spill]] }
 0xd50   : > { %2473 = vrot.lane.b32.xlu0 %v6208_v26, %s7713_s8  ;;  %2461 = vrot.lane.b32.xlu1 %v6208_v26, %s7714_s28  ;;  %s5333_s28 = smov 111   ;;  %s7751_s8 = sld [smem:[#allocation3_spill]] }
 0xd54   : > { %2667 = vrot.lane.b32.xlu0 %v6112_v44, %s7719_s24  ;;  %2655 = vrot.lane.b32.xlu1 %v6112_v44, %s7720_s26 }
 0xd56   : > { %v6241_v12 = vpop.permute.xlu0 %2635  ;;  %v6243_v42 = vpop.permute.xlu1 %2623 }
 0xd58   : > { %2441 = vrot.lane.b32.xlu0 %v6208_v26, %s7716_s30  ;;  %2429 = vrot.lane.b32.xlu1 %v6208_v26, %s7717_s5  ;;  %s7728_s5 = sld [smem:[#allocation21_spill]] }
 0xd5a   : > { %v6253_v15 = vpop.permute.xlu0 %2535  ;;  %v6255_v4 = vpop.permute.xlu1 %2523 }
 0xd5c   : > { %2669 = vrot.lane.b32.xlu0 %v6208_v26, %s7719_s24  ;;  %2657 = vrot.lane.b32.xlu1 %v6208_v26, %s7720_s26 }
 0xd5e   : > { %v6261_v5 = vpop.permute.xlu0 %2603  ;;  %v6263_v28 = vpop.permute.xlu1 %2591  ;;  %s7729_s30 = smov %s7728_s5 }
 0xd60   : > { %2665 = vrot.lane.b32.xlu0 %v6143_v63, %s7719_s24  ;;  %2653 = vrot.lane.b32.xlu1 %v6143_v63, %s7720_s26  ;;  %s7733_s26 = sld [smem:[#allocation23_spill]] }
 0xd62   : > { %v6275_v57 = vpop.permute.xlu0 %2503  ;;  %v6277_v58 = vpop.permute.xlu1 %2491 }
 0xd64   : > { %2708 = vperm.xlu0 %5214, %v2698_v8   ;;  %2703 = vperm.xlu1 %5215, %v2697_v10  }
 0xd66   : > { %v6285_v22 = vpop.permute.xlu0 %2571  ;;  %v6287_v30 = vpop.permute.xlu1 %2559 }
 0xd68   : > { %2718 = vperm.xlu0 %5214, %v2700_v59   ;;  %2713 = vperm.xlu1 %5215, %v2699_v17   ;;  %v2646_v59 = vsel %vm918_vm5, %v6243_v42, %v6241_v12 }
 0xd6a   : > { %v6289_v35 = vpop.permute.xlu0 %2471  ;;  %v6291_v61 = vpop.permute.xlu1 %2459 }
 0xd6e   : > { %v6293_v16 = vpop.permute.xlu0 %2439  ;;  %v6295_v39 = vpop.permute.xlu1 %2427 }
 0xd72   : > { %v2634_v1 = vpop.permute.xlu0 %2633  ;;  %v2622_v6 = vpop.permute.xlu1 %2621 }
 0xd76   : > { %v2534_v29 = vpop.permute.xlu0 %2533  ;;  %v2522_v7 = vpop.permute.xlu1 %2521 }
 0xd7a   : > { %v6297_v49 = vpop.permute.xlu0 %2601  ;;  %v6299_v11 = vpop.permute.xlu1 %2589 }
 0xd7e   : > { %v6301_v53 = vpop.permute.xlu0 %2501  ;;  %v6303_v18 = vpop.permute.xlu1 %2489 }
 0xd82   : > { %v6305_v19 = vpop.permute.xlu0 %2569  ;;  %v6307_v43 = vpop.permute.xlu1 %2557 }
 0xd86   : > { %v6309_v20 = vpop.permute.xlu0 %2469  ;;  %v6311_v31 = vpop.permute.xlu1 %2457 }
 0xd8a   : > { %v6313_v24 = vpop.permute.xlu0 %2437  ;;  %v6315_v54 = vpop.permute.xlu1 %2425 }
 0xd8e   : > { %v2640_v32 = vpop.permute.xlu0 %2639  ;;  %v2628_v48 = vpop.permute.xlu1 %2627 }
 0xd8f   : > { %v2648_v40 = vsel %vm918_vm5, %v2628_v48, %v2640_v32  ;;  %v2546_v48 = vsel %vm870_vm8, %v6255_v4, %v6253_v15  ;;  %v5290_v4 = vld [vmem:[%s7601_s22 + $0x6] ss:$0 sm:$0xff] }
 0xd90   : > { %v2652_v41 = vmul.f32 %v5287_v34, %v2648_v40 }
 0xd92   : > { %v2540_v38 = vpop.permute.xlu0 %2539  ;;  %5004 = vmatprep.subr.mxu1 %v2652_v41  ;;  %v2528_v50 = vpop.permute.xlu1 %2527  ;;  %v2645_v41 = vsel %vm918_vm5, %v2622_v6, %v2634_v1  ;;  %v2614_v6 = vsel %vm904_vm7, %v6263_v28, %v6261_v5  ;;  %v2613_v5 = vsel %vm904_vm7, %v6299_v11, %v6297_v49  ;;  %v5292_v11 = vld [vmem:[%s7601_s22 + $0x5] ss:$0 sm:$0xff] }
 0xd93   : > { %v2548_v51 = vsel %vm870_vm8, %v2528_v50, %v2540_v38  ;;  %v2650_v50 = vmul.f32 %v5287_v34, %v2646_v59  ;;  %v2649_v42 = vmul.f32 %v5287_v34, %v2645_v41 }
 0xd94   : > { %v2552_v23 = vmul.f32 %v5288_v62, %v2548_v51  ;;  %v2545_v51 = vsel %vm870_vm8, %v2522_v7, %v2534_v29  ;;  %v5291_v29 = vld [vmem:[%s7601_s22 + $0x2] ss:$0 sm:$0xff] }
 0xd96   : > { %v2608_v14 = vpop.permute.xlu0 %2607  ;;  %5005 = vmatpush3.msra.mxu1 %v2552_v23  ;;  %v2596_v47 = vpop.permute.xlu1 %2595  ;;  %v2550_v23 = vmul.f32 %v5288_v62, %v2546_v48 }
 0xd9a   : > { %v2508_v55 = vpop.permute.xlu0 %2507  ;;  %v2496_v45 = vpop.permute.xlu1 %2495 }
 0xd9e   : > { %v2576_v52 = vpop.permute.xlu0 %2575  ;;  %v2564_v2 = vpop.permute.xlu1 %2563 }
 0xda2   : > { %v2476_v3 = vpop.permute.xlu0 %2475  ;;  %v2464_v60 = vpop.permute.xlu1 %2463 }
 0xda3   : > { %v2484_v59 = vsel %vm842_vm9, %v2464_v60, %v2476_v3 }
 0xda6   : > { %v6325_v9 = vpop.permute.xlu0 %2443  ;;  %v6327_v36 = vpop.permute.xlu1 %2431 }
 0xdaa   : > { %v2672_v25 = vpop.permute.xlu0 %2671  ;;  %v2660_v0 = vpop.permute.xlu1 %2659 }
 0xdab   : > { %v2680_v33 = vsel %vm932_vm4, %v2660_v0, %v2672_v25  ;;  %v2616_v25 = vsel %vm904_vm7, %v2596_v47, %v2608_v14  ;;  %v2514_v14 = vsel %vm856_vm10, %v6277_v58, %v6275_v57 }
 0xdac   : > { %v2684_v46 = vmul.f32 %v6333_v56, %v2680_v33  ;;  %v2516_v33 = vsel %vm856_vm10, %v2496_v45, %v2508_v55  ;;  %v2620_v1 = vmul.f32 %v5290_v4, %v2616_v25  ;;  %v2618_v45 = vmul.f32 %v5290_v4, %v2614_v6 }
 0xdad   : > { %v2520_v7 = vmul.f32 %v5291_v29, %v2516_v33 }
 0xdae   : > { %5167 = vmatprep.subr.mxu0 %v2684_v46  ;;  %v2638_v21 = vpop.permute.xlu0 %2637  ;;  %v2626_v27 = vpop.permute.xlu1 %2625 }
 0xdaf   : > { %v2647_v8 = vsel %vm918_vm5, %v2626_v27, %v2638_v21  ;;  %5168 = vmatpush3.msra.mxu0 %v2684_v46  ;;  %v2549_v46 = vmul.f32 %v5288_v62, %v2545_v51  ;;  %v2513_v21 = vsel %vm856_vm10, %v6303_v18, %v6301_v53  ;;  %v2518_v27 = vmul.f32 %v5291_v29, %v2514_v14  ;;  %v2688_v14 = vld [vmem:[%s7590_s11 + $0x18] sm:$0xff] }
 0xdb0   : > { %v2651_v10 = vmul.f32 %v5287_v34, %v2647_v8  ;;  %v2584_v8 = vsel %vm890_vm6, %v2564_v2, %v2576_v52  ;;  %v2582_v18 = vsel %vm890_vm6, %v6287_v30, %v6285_v22  ;;  %v5293_v52 = vld [vmem:[%s7601_s22 + $0x1] ss:$0 sm:$0xff]  ;;  %v2581_v22 = vsel %vm890_vm6, %v6307_v43, %v6305_v19  ;;  %v5294_v19 = vld [vmem:[%s7601_s22 + $0x4] ss:$0 sm:$0xff] }
 0xdb1   : > { %v2588_v53 = vmul.f32 %v5292_v11, %v2584_v8  ;;  %v2488_v2 = vmul.f32 %v5293_v52, %v2484_v59  ;;  %v2586_v41 = vmul.f32 %v5292_v11, %v2582_v18  ;;  %v2556_v43 = vmul.f32 %v5294_v19, %v6174_v13  ;;  %v2696_v8 = vld [vmem:[%s7590_s11 + $0x58] sm:$0xff]  ;;  %v2917_v59 = vld [vmem:[%s7723_s29 + $0x50] sm:$0xff]  ;;  %v2912_v18 = vld [vmem:[%s7723_s29 + $0x28] sm:$0xff] }
 0xdb2   : > { %v2538_v17 = vpop.permute.xlu0 %2537  ;;  %5006 = vmatprep.subr.mxu1 %v2651_v10  ;;  %v2526_v32 = vpop.permute.xlu1 %2525  ;;  %v2617_v10 = vmul.f32 %v5290_v4, %v2613_v5  ;;  %v2449_v13 = vsel %vm828_vm11, %v6315_v54, %v6313_v24  ;;  %v2685_v24 = vld [vmem:[%s7590_s11] sm:$0xff]  ;;  %v2922_v5 = vld [vmem:[%s7723_s29 + $0x78] sm:$0xff] }
 0xdb3   : > { %v2547_v40 = vsel %vm870_vm8, %v2526_v32, %v2538_v17  ;;  %v2517_v17 = vmul.f32 %v5291_v29, %v2513_v21  ;;  %v2482_v32 = vsel %vm842_vm9, %v6291_v61, %v6289_v35  ;;  %v2585_v61 = vmul.f32 %v5292_v11, %v2581_v22  ;;  %v2920_v21 = vld [vmem:[%s7723_s29 + $0x68] sm:$0xff] }
 0xdb4   : > { %v2551_v38 = vmul.f32 %v5288_v62, %v2547_v40 }
 0xdb6   : > { %v2606_v0 = vpop.permute.xlu0 %2605  ;;  %5007 = vmatpush3.msra.mxu1 %v2551_v38  ;;  %v2594_v12 = vpop.permute.xlu1 %2593  ;;  %v2481_v38 = vsel %vm842_vm9, %v6311_v31, %v6309_v20  ;;  %v5295_v20 = vld [vmem:[%s7601_s22] ss:$0 sm:$0xff] }
 0xdb7   : > { %5008 = vmatprep.subr.mxu1 %v2650_v50  ;;  %v2615_v15 = vsel %vm904_vm7, %v2594_v12, %v2606_v0  ;;  %v2486_v50 = vmul.f32 %v5293_v52, %v2482_v32  ;;  %v2485_v25 = vmul.f32 %v5293_v52, %v2481_v38  ;;  %v2453_v6 = vmul.f32 %v5295_v20, %v2449_v13  ;;  %v2907_v32 = vld [vmem:[%s7723_s29] sm:$0xff] }
 0xdb8   : > { %5009 = vmatpush3.msra.mxu1 %v2550_v23  ;;  %v2619_v47 = vmul.f32 %v5290_v4, %v2615_v15  ;;  %v2452_v23 = vsel %vm828_vm11, %v6327_v36, %v6325_v9  ;;  %v2450_v9 = vsel %vm828_vm11, %v6295_v39, %v6293_v16 }
 0xdb9   : > { %5010 = vmatprep.subr.mxu1 %v2649_v42  ;;  %v2456_v31 = vmul.f32 %v5295_v20, %v2452_v23  ;;  %v2555_v42 = vmul.f32 %v5294_v19, %v6208_v26  ;;  %v2454_v15 = vmul.f32 %v5295_v20, %v2450_v9  ;;  %v2553_v26 = vmul.f32 %v5294_v19, %v6143_v63 }
 0xdba   : > { %v2506_v34 = vpop.permute.xlu0 %2505  ;;  %5011 = vmatpush3.msra.mxu1 %v2549_v46  ;;  %v2494_v62 = vpop.permute.xlu1 %2493  ;;  %v2554_v46 = vmul.f32 %v5294_v19, %v6112_v44  ;;  %v2689_v44 = vld [vmem:[%s7590_s11 + $0x20] sm:$0xff] }
 0xdbb   : > { %v2515_v55 = vsel %vm856_vm10, %v2494_v62, %v2506_v34  ;;  %5012 = vmatprep.subr.mxu1 %v2620_v1 }
 0xdbc   : > { %v2519_v28 = vmul.f32 %v5291_v29, %v2515_v55  ;;  %5013 = vmatpush3.msra.mxu1 %v2520_v7  ;;  %v2692_v55 = vld [vmem:[%s7590_s11 + $0x38] sm:$0xff] }
 0xdbd   : > { %5014 = vmatprep.subr.mxu1 %v2619_v47  ;;  %v2690_v47 = vld [vmem:[%s7590_s11 + $0x28] sm:$0xff] }
 0xdbe   : > { %v2574_v57 = vpop.permute.xlu0 %2573  ;;  %5015 = vmatpush3.msra.mxu1 %v2519_v28  ;;  %v2562_v58 = vpop.permute.xlu1 %2561  ;;  %v2921_v28 = vld [vmem:[%s7723_s29 + $0x70] sm:$0xff] }
 0xdbf   : > { %5016 = vmatprep.subr.mxu1 %v2618_v45  ;;  %v2583_v49 = vsel %vm890_vm6, %v2562_v58, %v2574_v57  ;;  %v2691_v45 = vld [vmem:[%s7590_s11 + $0x30] sm:$0xff]  ;;  %v2919_v57 = vld [vmem:[%s7723_s29 + $0x60] sm:$0xff]  ;;  %v2694_v58 = vld [vmem:[%s7590_s11 + $0x48] sm:$0xff] }
 0xdc0   : > { %5017 = vmatpush3.msra.mxu1 %v2518_v27  ;;  %v2587_v48 = vmul.f32 %v5292_v11, %v2583_v49  ;;  %v2695_v27 = vld [vmem:[%s7590_s11 + $0x50] sm:$0xff]  ;;  %v2915_v49 = vld [vmem:[%s7723_s29 + $0x40] sm:$0xff]  ;;  %v2914_v11 = vld [vmem:[%s7723_s29 + $0x38] sm:$0xff] }
 0xdc1   : > { %5018 = vmatprep.subr.mxu1 %v2617_v10  ;;  %v2918_v10 = vld [vmem:[%s7723_s29 + $0x58] sm:$0xff] }
 0xdc2   : > { %v2474_v3 = vpop.permute.xlu0 %2473  ;;  %5019 = vmatpush3.msra.mxu1 %v2517_v17  ;;  %v2462_v60 = vpop.permute.xlu1 %2461  ;;  %v2916_v17 = vld [vmem:[%s7723_s29 + $0x48] sm:$0xff] }
 0xdc3   : > { %v2483_v40 = vsel %vm842_vm9, %v2462_v60, %v2474_v3  ;;  %5020 = vmatprep.subr.mxu1 %v2588_v53  ;;  %v2913_v53 = vld [vmem:[%s7723_s29 + $0x30] sm:$0xff]  ;;  %v2908_v60 = vld [vmem:[%s7723_s29 + $0x8] sm:$0xff] }
 0xdc4   : > { %v2487_v30 = vmul.f32 %v5293_v52, %v2483_v40  ;;  %5021 = vmatpush3.msra.mxu1 %v2488_v2  ;;  %v2911_v52 = vld [vmem:[%s7723_s29 + $0x20] sm:$0xff]  ;;  %v2910_v2 = vld [vmem:[%s7723_s29 + $0x18] sm:$0xff]  ;;  %v2909_v3 = vld [vmem:[%s7723_s29 + $0x10] sm:$0xff] }
 0xdc5   : > { %5022 = vmatprep.subr.mxu1 %v2587_v48 }
 0xdc6   : > { %v2668_v51 = vpop.permute.xlu0 %2667  ;;  %5023 = vmatpush3.msra.mxu1 %v2487_v30  ;;  %v2656_v35 = vpop.permute.xlu1 %2655 }
 0xdc7   : > { %5024 = vmatprep.subr.mxu1 %v2586_v41  ;;  %v2678_v16 = vsel %vm932_vm4, %v2656_v35, %v2668_v51 }
 0xdc8   : > { %5025 = vmatpush3.msra.mxu1 %v2486_v50  ;;  %v2682_v54 = vmul.f32 %v6333_v56, %v2678_v16 }
 0xdc9   : > { %5026 = vmatprep.subr.mxu1 %v2585_v61 }
 0xdca   : > { %v2442_v0 = vpop.permute.xlu0 %2441  ;;  %5027 = vmatpush3.msra.mxu1 %v2485_v25  ;;  %v2430_v12 = vpop.permute.xlu1 %2429 }
 0xdcb   : > { %v2451_v36 = vsel %vm828_vm11, %v2430_v12, %v2442_v0  ;;  %5028 = vmatprep.subr.mxu1 %v2556_v43 }
 0xdcc   : > { %v2455_v33 = vmul.f32 %v5295_v20, %v2451_v36  ;;  %5029 = vmatpush3.msra.mxu1 %v2456_v31  ;;  %v7724_v31 = vld [vmem:[#allocation7_spill] sm:$0xff] }
 0xdcd   : > { %5030 = vmatprep.subr.mxu1 %v2555_v42 }
 0xdce   : > { %v2670_v4 = vpop.permute.xlu0 %2669  ;;  %v2658_v1 = vpop.permute.xlu1 %2657  ;;  %5031 = vmatpush3.msra.mxu1 %v2455_v33 }
 0xdcf   : > { %v2679_v39 = vsel %vm932_vm4, %v2658_v1, %v2670_v4  ;;  %5032 = vmatprep.subr.mxu1 %v2554_v46  ;;  %v7725_v46 = vld [vmem:[#allocation6_spill] sm:$0xff] }
 0xdd0   : > { %v2683_v29 = vmul.f32 %v6333_v56, %v2679_v39  ;;  %5033 = vmatpush3.msra.mxu1 %v2454_v15 }
 0xdd1   : > { %5034 = vmatprep.subr.mxu1 %v2553_v26 }
 0xdd2   : > { %v2666_v7 = vpop.permute.xlu0 %2665  ;;  %5169 = vmatprep.subr.mxu0 %v2683_v29  ;;  %v2654_v34 = vpop.permute.xlu1 %2653  ;;  %5035 = vmatpush3.msra.mxu1 %v2453_v6 }
 0xdd3   : > { %v2677_v63 = vsel %vm932_vm4, %v2654_v34, %v2666_v7  ;;  %2798 = vmatmul.mubr.f32.vlgmr.msra.gmra.mxu1 %v2685_v24  ;;  %5170 = vmatpush3.msra.mxu0 %v2683_v29  ;;  %v7726_v29 = vld [vmem:[#allocation5_spill] sm:$0xff]  ;;  %vm3473_vm4 = vcmask 908288  }
 0xdd4   : > { %v2681_v62 = vmul.f32 %v6333_v56, %v2677_v63  ;;  %5171 = vmatprep.subr.mxu0 %v2682_v54  ;;  %2802 = vmatprep.mubr.f32.mxu1 %v2689_v44  ;;  %v2693_v56 = vld [vmem:[%s7590_s11 + $0x40] sm:$0xff] }
 0xdd5   : > { %5172 = vmatpush3.msra.mxu0 %v2682_v54  ;;  %v7727_v54 = vld [vmem:[#allocation4_spill] sm:$0xff] }
 0xdd6   : > { %5173 = vmatprep.subr.mxu0 %v2681_v62 }
 0xdd7   : > { %2803 = vmatmul.mubr.f32.gmra.mxu1 %v2688_v14  ;;  %5174 = vmatpush3.msra.mxu0 %v2681_v62 }
 0xdd8   : > { %5176 = vmatmul.mubr.msk.f32.vlgmr.msra.gmra.mxu0 %vm1090_vm12, %v2690_v47  ;;  %2807 = vmatprep.mubr.f32.mxu1 %v2692_v55 }
 0xdd9   : > { %5178 = vmatprep.mubr.msk.f32.mxu0 %vm1090_vm12, %v2693_v56  ;;  %2951 = vmatprep.subr.mxu0 %v2922_v5 }
 0xdda   : > { %2952 = vmatpush1.msra.mxu0 %v2921_v28  ;;  %v3516_v28 = vld [vmem:[%s7728_s5 + $0x8] sm:$0xff]  ;;  %s4900_s5 = sshll.u32 %s7751_s8, 3 }
 0xddb   : > { %2808 = vmatmul.mubr.f32.gmra.mxu1 %v2691_v45  ;;  %2953 = vmatprep.subr.mxu0 %v2920_v21 }
 0xddc   : > { %2812 = vmatprep.mubr.f32.mxu1 %v2695_v27  ;;  %5179 = vmatmul.mubr.msk.f32.gmra.mxu0 %vm1090_vm12, %v2696_v8 }
 0xddd   : > { %2954 = vmatpush1.msra.mxu0 %v2919_v57  ;;  %2999 = vmatprep.mubr.f32.mxu0 %v7722_v37 }
 0xdde   : > { %2955 = vmatprep.subr.mxu0 %v2918_v10  ;;  %v3529_v10 = vld [vmem:[%s7730_s27 + $0x10] sm:$0xff] }
 0xddf   : > { %2813 = vmatmul.mubr.f32.gmra.mxu1 %v2694_v58  ;;  %2956 = vmatpush1.msra.mxu0 %v2917_v59  ;;  %v2704_v30 = vpop.permute.xlu1 %2703  ;;  %v2709_v23 = vpop.permute.xlu0 %2708 }
 0xde0   : > { %3805 = vmatprep.mubr.f32.mxu1 %v7722_v37  ;;  %2957 = vmatprep.subr.mxu0 %v2916_v17  ;;  %v3530_v17 = vld [vmem:[%s7730_s27 + $0x18] sm:$0xff] }
 0xde1   : > { %2958 = vmatpush1.msra.mxu0 %v2915_v49 }
 0xde2   : > { %2959 = vmatprep.subr.mxu0 %v2914_v11  ;;  %v3527_v11 = vld [vmem:[%s7730_s27] sm:$0xff] }
 0xde3   : > { %2960 = vmatpush1.msra.mxu0 %v2913_v53  ;;  %v2714_v9 = vpop.permute.xlu1 %2713  ;;  %v2719_v26 = vpop.permute.xlu0 %2718 }
 0xde4   : > { %2961 = vmatprep.subr.mxu0 %v2912_v18  ;;  %v3528_v18 = vld [vmem:[%s7730_s27 + $0x8] sm:$0xff] }
 0xde5   : > { %2962 = vmatpush1.msra.mxu0 %v2911_v52 }
 0xde6   : > { %2963 = vmatprep.subr.mxu0 %v2910_v2 }
 0xde7   : > { %2964 = vmatpush1.msra.mxu0 %v2909_v3 }
 0xde8   : > { %2965 = vmatprep.subr.mxu0 %v2908_v60 }
 0xde9   : > { %2966 = vmatpush1.msra.mxu0 %v2907_v32 }
 0xe93   : > { %v5036_v48 = vpop.f32.mrf.mxu1 }
 0xe95   : > { %v5037_v40 = vpop.f32.mrf.mxu1 }
 0xe96   : > { %v5038_v22 = vadd.f32 %v5037_v40, %v5036_v48 }
 0xe97   : > { %v5039_v41 = vpop.f32.mrf.mxu1 }
 0xe98   : > { %v5177_v38 = vpop.f32.mrf.mxu0  ;;  %v2800_v50 = vadd.f32 %v5038_v22, %v2704_v30 }
 0xe99   : > { %v5040_v51 = vpop.f32.mrf.mxu1 }
 0xe9a   : > { %v5041_v35 = vadd.f32 %v5040_v51, %v5039_v41  ;;  %v2884_v61 = vpop.f32.mrf.mxu0 }
 0xe9b   : > { %v2885_v25 = vadd.f32 %v2884_v61, %v2800_v50  ;;  %v5042_v19 = vpop.f32.mrf.mxu1 }
 0xe9c   : > { %v2805_v43 = vadd.f32 %v5041_v35, %v2709_v23  ;;  %v5180_v20 = vpop.f32.mrf.mxu0  ;;  %v3071_v35 = vlaneseq }
 0xe9d   : > { %v2903_v0 = vadd.f32 %v2885_v25, %v7724_v31  ;;  %v5043_v12 = vpop.f32.mrf.mxu1 }
 0xe9e   : > { %v2890_v36 = vadd.f32 %v5177_v38, %v2805_v43  ;;  %v5044_v42 = vadd.f32 %v5043_v12, %v5042_v19  ;;  %v2894_v13 = vpop.f32.mrf.mxu0  ;;  %v3072_v25 = vshrl.u32 %v3071_v35, 7 }
 0xe9f   : > { %v5045_v33 = vpop.f32.mrf.mxu1  ;;  %4863 = vmatmul.mubr.msk.f32.vlgmr.msra.gmra.mxu0 %vm1164_vm13, %v2903_v0 }
 0xea0   : > { %v2904_v15 = vadd.f32 %v2890_v36, %v7725_v46  ;;  %v2810_v4 = vadd.f32 %v5044_v42, %v2714_v9  ;;  %3005 = vmatprep.mubr.f32.mxu0 %v7722_v37  ;;  %v6710_v31 = vsub.s32 0, %v3072_v25  ;;  %v6712_v12 = vsub.s32 1, %v3072_v25 }
 0xea1   : > { %v5046_v1 = vpop.f32.mrf.mxu1 }
 0xea2   : > { %v5047_v16 = vadd.f32 %v5046_v1, %v5045_v33  ;;  %v2895_v39 = vadd.f32 %v2894_v13, %v2810_v4 }
 0xea3   : > { %4864 = vmatmul.mubr.msk.f32.gmra.mxu0 %vm1164_vm13, %v2904_v15 }
 0xea4   : > { %v2815_v6 = vadd.f32 %v5047_v16, %v2719_v26  ;;  %v2905_v24 = vadd.f32 %v2895_v39, %v7726_v29  ;;  %3011 = vmatprep.mubr.f32.mxu0 %v7722_v37 }
 0xea6   : > { %v2900_v44 = vadd.f32 %v5180_v20, %v2815_v6  ;;  %v4869_v20 = vld [vmem:[%s7731_s0 + $0x3] ss:$8 sm:$0x3] }
 0xea7   : > { %4865 = vmatmul.mubr.msk.f32.gmra.mxu0 %vm1164_vm13, %v2905_v24  ;;  %v6715_v9 = vrot.slane %v4869_v20, %v6710_v31  ;;  %v6718_v42 = vrot.slane %v4869_v20, %v6712_v12 }
 0xea8   : > { %v2906_v7 = vadd.f32 %v2900_v44, %v7727_v54  ;;  %3017 = vmatprep.mubr.f32.mxu0 %v7722_v37  ;;  %v4868_v44 = vld [vmem:[%s7731_s0 + $0x2] ss:$8 sm:$0x3] }
 0xeab   : > { %4866 = vmatmul.mubr.msk.f32.gmra.mxu0 %vm1164_vm13, %v2906_v7 }
 0xeac   : > { %3627 = vmatprep.mubr.f32.mxu0 %v3516_v28 }
 0xf5f   : > { %v6510_v34 = vpop.f32.mrf.mxu0 }
 0xf60   : > { %3217 = vrot.lane.b32.xlu0 %v6510_v34, %s7705_s2 }
 0xf61   : > { %v6514_v63 = vpop.f32.mrf.mxu0 }
 0xf62   : > { %3205 = vrot.lane.b32.xlu1 %v6514_v63, %s7705_s2 }
 0xf63   : > { %v6528_v62 = vpop.f32.mrf.mxu0 }
 0xf64   : > { %3159 = vrot.lane.b32.xlu0 %v6510_v34, %s5328_s13 }
 0xf65   : > { %v6534_v14 = vpop.f32.mrf.mxu0 }
 0xf66   : > { %3147 = vrot.lane.b32.xlu1 %v6514_v63, %s5328_s13 }
 0xf67   : > { %v6548_v47 = vpop.f32.mrf.mxu0 }
 0xf68   : > { %3101 = vrot.lane.b32.xlu0 %v6510_v34, %s5329_s14 }
 0xf69   : > { %v6554_v55 = vpop.f32.mrf.mxu0 }
 0xf6a   : > { %3089 = vrot.lane.b32.xlu1 %v6514_v63, %s5329_s14 }
 0xf6b   : > { %v6570_v56 = vpop.f32.mrf.mxu0 }
 0xf6c   : > { %3044 = vrot.lane.b32.xlu0 %v6510_v34, %s5330_s15 }
 0xf6d   : > { %v6578_v5 = vpop.f32.mrf.mxu0 }
 0xf6e   : > { %3028 = vrot.lane.b32.xlu1 %v6514_v63, %s5330_s15 }
 0xf70   : > { %3219 = vrot.lane.b32.xlu0 %v6528_v62, %s7705_s2 }
 0xf72   : > { %3207 = vrot.lane.b32.xlu1 %v6534_v14, %s7705_s2 }
 0xf74   : > { %3161 = vrot.lane.b32.xlu0 %v6528_v62, %s5328_s13 }
 0xf76   : > { %3149 = vrot.lane.b32.xlu1 %v6534_v14, %s5328_s13 }
 0xf78   : > { %3103 = vrot.lane.b32.xlu0 %v6528_v62, %s5329_s14 }
 0xf7a   : > { %3091 = vrot.lane.b32.xlu1 %v6534_v14, %s5329_s14 }
 0xf7c   : > { %3046 = vrot.lane.b32.xlu0 %v6528_v62, %s5330_s15 }
 0xf7e   : > { %3030 = vrot.lane.b32.xlu1 %v6534_v14, %s5330_s15 }
 0xf80   : > { %3221 = vrot.lane.b32.xlu0 %v6548_v47, %s7705_s2 }
 0xf82   : > { %3209 = vrot.lane.b32.xlu1 %v6554_v55, %s7705_s2 }
 0xf84   : > { %3163 = vrot.lane.b32.xlu0 %v6548_v47, %s5328_s13 }
 0xf86   : > { %3151 = vrot.lane.b32.xlu1 %v6554_v55, %s5328_s13 }
 0xf88   : > { %3105 = vrot.lane.b32.xlu0 %v6548_v47, %s5329_s14 }
 0xf8a   : > { %3093 = vrot.lane.b32.xlu1 %v6554_v55, %s5329_s14 }
 0xf8c   : > { %3048 = vrot.lane.b32.xlu0 %v6548_v47, %s5330_s15 }
 0xf8e   : > { %3032 = vrot.lane.b32.xlu1 %v6554_v55, %s5330_s15 }
 0xf90   : > { %3223 = vrot.lane.b32.xlu0 %v6570_v56, %s7705_s2 }
 0xf92   : > { %3411 = vrot.lane.b32.xlu1 %v6570_v56, %s5331_s16 }
 0xf94   : > { %3165 = vrot.lane.b32.xlu0 %v6570_v56, %s5328_s13 }
 0xf96   : > { %3211 = vrot.lane.b32.xlu1 %v6578_v5, %s7705_s2 }
 0xf98   : > { %3107 = vrot.lane.b32.xlu0 %v6570_v56, %s5329_s14 }
 0xf9a   : > { %3407 = vrot.lane.b32.xlu1 %v6548_v47, %s5331_s16 }
 0xf9c   : > { %3050 = vrot.lane.b32.xlu0 %v6570_v56, %s5330_s15 }
 0xf9e   : > { %3153 = vrot.lane.b32.xlu1 %v6578_v5, %s5328_s13 }
 0xfa0   : > { %3409 = vrot.lane.b32.xlu0 %v6554_v55, %s5331_s16 }
 0xfa2   : > { %3403 = vrot.lane.b32.xlu1 %v6528_v62, %s5331_s16 }
 0xfa4   : > { %3405 = vrot.lane.b32.xlu0 %v6534_v14, %s5331_s16 }
 0xfa6   : > { %3095 = vrot.lane.b32.xlu1 %v6578_v5, %s5329_s14 }
 0xfa8   : > { %3401 = vrot.lane.b32.xlu0 %v6514_v63, %s5331_s16 }
 0xfaa   : > { %3399 = vrot.lane.b32.xlu1 %v6510_v34, %s5331_s16 }
 0xfac   : > { %3351 = vrot.lane.b32.xlu0 %v6554_v55, %s5332_s6 }
 0xfae   : > { %3034 = vrot.lane.b32.xlu1 %v6578_v5, %s5330_s15 }
 0xfb0   : > { %3347 = vrot.lane.b32.xlu0 %v6534_v14, %s5332_s6 }
 0xfb2   : > { %3353 = vrot.lane.b32.xlu1 %v6570_v56, %s5332_s6 }
 0xfb4   : > { %3413 = vrot.lane.b32.xlu0 %v6578_v5, %s5331_s16 }
 0xfb6   : > { %3349 = vrot.lane.b32.xlu1 %v6548_v47, %s5332_s6 }
 0xfb8   : > { %3343 = vrot.lane.b32.xlu0 %v6514_v63, %s5332_s6 }
 0xfba   : > { %3345 = vrot.lane.b32.xlu1 %v6528_v62, %s5332_s6 }
 0xfbc   : > { %3355 = vrot.lane.b32.xlu0 %v6578_v5, %s5332_s6 }
 0xfbe   : > { %3341 = vrot.lane.b32.xlu1 %v6510_v34, %s5332_s6 }
 0xfc0   : > { %3293 = vrot.lane.b32.xlu0 %v6554_v55, %s7712_s4 }
 0xfc2   : > { %3295 = vrot.lane.b32.xlu1 %v6570_v56, %s7712_s4 }
 0xfc4   : > { %3297 = vrot.lane.b32.xlu0 %v6578_v5, %s7712_s4 }
 0xfc6   : > { %3291 = vrot.lane.b32.xlu1 %v6548_v47, %s7712_s4 }
 0xfc8   : > { %3289 = vrot.lane.b32.xlu0 %v6534_v14, %s7712_s4 }
 0xfca   : > { %3287 = vrot.lane.b32.xlu1 %v6528_v62, %s7712_s4 }
 0xfcc   : > { %3285 = vrot.lane.b32.xlu0 %v6514_v63, %s7712_s4 }
 0xfce   : > { %3283 = vrot.lane.b32.xlu1 %v6510_v34, %s7712_s4 }
 0xfd0   : > { %3467 = vrot.lane.b32.xlu0 %v6554_v55, %s5333_s28 }
 0xfd2   : > { %v6643_v45 = vpop.permute.xlu0 %3217  ;;  %3469 = vrot.lane.b32.xlu1 %v6570_v56, %s5333_s28 }
 0xfd4   : > { %v6647_v21 = vpop.permute.xlu1 %3205  ;;  %3471 = vrot.lane.b32.xlu0 %v6578_v5, %s5333_s28 }
 0xfd5   : > { %v3225_v24 = vsel %vm870_vm8, %v6643_v45, %v6647_v21  ;;  %v3237_v7 = vsel %vm870_vm8, %v6647_v21, %v6643_v45 }
 0xfd6   : > { %v6651_v27 = vpop.permute.xlu0 %3159  ;;  %3465 = vrot.lane.b32.xlu1 %v6548_v47, %s5333_s28  ;;  %v3254_v45 = vmul.f32 %v6715_v9, %v3237_v7 }
 0xfd8   : > { %v6655_v8 = vpop.permute.xlu1 %3147  ;;  %3463 = vrot.lane.b32.xlu0 %v6534_v14, %s5333_s28 }
 0xfda   : > { %v6659_v57 = vpop.permute.xlu0 %3101  ;;  %3461 = vrot.lane.b32.xlu1 %v6528_v62, %s5333_s28 }
 0xfdc   : > { %v6663_v58 = vpop.permute.xlu1 %3089  ;;  %3459 = vrot.lane.b32.xlu0 %v6514_v63, %s5333_s28 }
 0xfde   : > { %v6670_v59 = vpop.permute.xlu0 %3044  ;;  %3457 = vrot.lane.b32.xlu1 %v6510_v34, %s5333_s28 }
 0xfe0   : > { %v6677_v49 = vpop.permute.xlu1 %3028  ;;  %3543 = vperm.xlu0 %5214, %v3529_v10  }
 0xfe2   : > { %v3220_v53 = vpop.permute.xlu0 %3219  ;;  %3548 = vperm.xlu1 %5215, %v3530_v17  }
 0xfe4   : > { %v3208_v52 = vpop.permute.xlu1 %3207  ;;  %3533 = vperm.xlu0 %5214, %v3527_v11   ;;  %v6746_v11 = vrot.slane %v4868_v44, %v6710_v31 }
 0xfe5   : > { %v3226_v39 = vsel %vm870_vm8, %v3220_v53, %v3208_v52  ;;  %v3238_v26 = vsel %vm870_vm8, %v3208_v52, %v3220_v53  ;;  %v6750_v52 = vrot.slane %v4868_v44, %v6712_v12 }
 0xfe6   : > { %v6685_v2 = vpop.permute.xlu0 %3161  ;;  %3538 = vperm.xlu1 %5215, %v3528_v18   ;;  %v3257_v10 = vmul.f32 %v6718_v42, %v3226_v39  ;;  %v3256_v17 = vmul.f32 %v6715_v9, %v3238_v26  ;;  %v3255_v18 = vmul.f32 %v6718_v42, %v3225_v24 }
 0xfe8   : > { %v6687_v3 = vpop.permute.xlu1 %3149 }
 0xfea   : > { %v6689_v60 = vpop.permute.xlu0 %3103 }
 0xfec   : > { %v6691_v32 = vpop.permute.xlu1 %3091 }
 0xfee   : > { %v6693_v48 = vpop.permute.xlu0 %3046 }
 0xff0   : > { %v6695_v40 = vpop.permute.xlu1 %3030 }
 0xff2   : > { %v3222_v22 = vpop.permute.xlu0 %3221 }
 0xff4   : > { %v3210_v30 = vpop.permute.xlu1 %3209 }
 0xff5   : > { %v3227_v33 = vsel %vm870_vm8, %v3222_v22, %v3210_v30  ;;  %v3239_v15 = vsel %vm870_vm8, %v3210_v30, %v3222_v22 }
 0xff6   : > { %v3164_v41 = vpop.permute.xlu0 %3163  ;;  %v3259_v29 = vmul.f32 %v6718_v42, %v3227_v33  ;;  %v3258_v54 = vmul.f32 %v6715_v9, %v3239_v15  ;;  %v3181_v33 = vsel %vm3167_vm14, %v6687_v3, %v6685_v2 }
 0xff8   : > { %v3152_v38 = vpop.permute.xlu1 %3151 }
 0xff9   : > { %v3170_v21 = vsel %vm3167_vm14, %v3164_v41, %v3152_v38  ;;  %v3182_v35 = vsel %vm3167_vm14, %v3152_v38, %v3164_v41  ;;  %v3168_v38 = vsel %vm3167_vm14, %v6651_v27, %v6655_v8 }
 0xffa   : > { %v6697_v50 = vpop.permute.xlu0 %3105  ;;  %v3202_v41 = vmul.f32 %v6750_v52, %v3170_v21  ;;  %v3198_v26 = vmul.f32 %v6750_v52, %v3168_v38 }
 0xffc   : > { %v6699_v51 = vpop.permute.xlu1 %3093 }
 0xffe   : > { %v6701_v61 = vpop.permute.xlu0 %3048 }
0x1000   : > { %v6703_v23 = vpop.permute.xlu1 %3032 }
0x1001   : > { %v3067_v38 = vsel %vm3052_vm0, %v6703_v23, %v6701_v61 }
0x1002   : > { %v3224_v19 = vpop.permute.xlu0 %3223 }
0x1004   : > { %v6705_v43 = vpop.permute.xlu1 %3411 }
0x1006   : > { %v3166_v0 = vpop.permute.xlu0 %3165 }
0x1008   : > { %v3212_v36 = vpop.permute.xlu1 %3211 }
0x1009   : > { %v3228_v13 = vsel %vm870_vm8, %v3224_v19, %v3212_v36  ;;  %v3240_v46 = vsel %vm870_vm8, %v3212_v36, %v3224_v19  ;;  %v3169_v36 = vsel %vm3167_vm14, %v6685_v2, %v6687_v3  ;;  %v3180_v2 = vsel %vm3167_vm14, %v6655_v8, %v6651_v27 }
0x100a   : > { %v3260_v4 = vmul.f32 %v6715_v9, %v3240_v46  ;;  %v3108_v1 = vpop.permute.xlu0 %3107  ;;  %v3261_v16 = vmul.f32 %v6718_v42, %v3228_v13  ;;  %v4867_v13 = vld [vmem:[%s7731_s0 + $0x1] ss:$8 sm:$0x3]  ;;  %v3201_v46 = vmul.f32 %v6746_v11, %v3182_v35  ;;  %v3200_v15 = vmul.f32 %v6750_v52, %v3169_v36 }
0x100b   : > { %v3197_v27 = vmul.f32 %v6746_v11, %v3180_v2  ;;  %v3112_v8 = vsel %vm3109_vm15, %v6697_v50, %v6699_v51 }
0x100c   : > { %3563 = vmatprep.subr.mxu0 %v3261_v16  ;;  %v6728_v6 = vpop.permute.xlu1 %3407  ;;  %v6785_v16 = vrot.slane %v4867_v13, %v6710_v31 }
0x100d   : > { %3564 = vmatpush1.msra.mxu0 %v3260_v4  ;;  %v3199_v4 = vmul.f32 %v6746_v11, %v3181_v33 }
0x100e   : > { %v6741_v28 = vpop.permute.xlu0 %3050  ;;  %3565 = vmatprep.subr.mxu0 %v3259_v29  ;;  %v6789_v29 = vrot.slane %v4867_v13, %v6712_v12 }
0x100f   : > { %3566 = vmatpush1.msra.mxu0 %v3258_v54  ;;  %v3124_v54 = vsel %vm3109_vm15, %v6699_v51, %v6697_v50  ;;  %v3110_v51 = vsel %vm3109_vm15, %v6659_v57, %v6663_v58 }
0x1010   : > { %3567 = vmatprep.subr.mxu0 %v3257_v10  ;;  %v3154_v53 = vpop.permute.xlu1 %3153  ;;  %v3144_v50 = vmul.f32 %v6789_v29, %v3112_v8  ;;  %v3143_v21 = vmul.f32 %v6785_v16, %v3124_v54 }
0x1011   : > { %v3171_v22 = vsel %vm3167_vm14, %v3166_v0, %v3154_v53  ;;  %v3183_v30 = vsel %vm3167_vm14, %v3154_v53, %v3166_v0  ;;  %3568 = vmatpush1.msra.mxu0 %v3256_v17  ;;  %v3111_v53 = vsel %vm3109_vm15, %v6689_v60, %v6691_v32 }
0x1012   : > { %v3203_v25 = vmul.f32 %v6746_v11, %v3183_v30  ;;  %v6758_v19 = vpop.permute.xlu0 %3409  ;;  %3569 = vmatprep.subr.mxu0 %v3255_v18  ;;  %v3204_v20 = vmul.f32 %v6750_v52, %v3171_v22  ;;  %v3142_v22 = vmul.f32 %v6789_v29, %v3111_v53 }
0x1013   : > { %3570 = vmatpush1.msra.mxu0 %v3254_v45  ;;  %v3069_v45 = vld [vmem:[%s7731_s0] ss:$8 sm:$0x3]  ;;  %v3434_v53 = vsel %vm3415_vm1, %v6758_v19, %v6728_v6 }
0x1014   : > { %3571 = vmatprep.subr.mxu0 %v3204_v20  ;;  %v6767_v0 = vpop.permute.xlu1 %3403  ;;  %v6828_v35 = vrot.slane %v3069_v45, %v6710_v31  ;;  %v3140_v20 = vmul.f32 %v6789_v29, %v3110_v51  ;;  %v6832_v36 = vrot.slane %v3069_v45, %v6712_v12 }
0x1015   : > { %3572 = vmatpush1.msra.mxu0 %v3203_v25 }
0x1016   : > { %v6780_v3 = vpop.permute.xlu0 %3405  ;;  %3573 = vmatprep.subr.mxu0 %v3202_v41 }
0x1017   : > { %3574 = vmatpush1.msra.mxu0 %v3201_v46  ;;  %v3433_v51 = vsel %vm3415_vm1, %v6780_v3, %v6767_v0 }
0x1018   : > { %3575 = vmatprep.subr.mxu0 %v3200_v15  ;;  %v3096_v39 = vpop.permute.xlu1 %3095  ;;  %v3054_v15 = vsel %vm3052_vm0, %v6693_v48, %v6695_v40 }
0x1019   : > { %v3113_v24 = vsel %vm3109_vm15, %v3108_v1, %v3096_v39  ;;  %v3125_v44 = vsel %vm3109_vm15, %v3096_v39, %v3108_v1  ;;  %3576 = vmatpush1.msra.mxu0 %v3199_v4  ;;  %v3123_v1 = vsel %vm3109_vm15, %v6691_v32, %v6689_v60  ;;  %v3122_v60 = vsel %vm3109_vm15, %v6663_v58, %v6659_v57 }
0x101a   : > { %v3145_v7 = vmul.f32 %v6785_v16, %v3125_v44  ;;  %v6801_v10 = vpop.permute.xlu0 %3401  ;;  %3577 = vmatprep.subr.mxu0 %v3198_v26  ;;  %v3146_v17 = vmul.f32 %v6789_v29, %v3113_v24  ;;  %v3141_v30 = vmul.f32 %v6785_v16, %v3123_v1  ;;  %v3139_v57 = vmul.f32 %v6785_v16, %v3122_v60  ;;  %v4873_v26 = vld [vmem:[%s7731_s0 + $0x7] ss:$8 sm:$0x3] }
0x101b   : > { %3578 = vmatpush1.msra.mxu0 %v3197_v27  ;;  %v3055_v58 = vsel %vm3052_vm0, %v6701_v61, %v6703_v23  ;;  %v3053_v23 = vsel %vm3052_vm0, %v6670_v59, %v6677_v49  ;;  %v3085_v39 = vmul.f32 %v6828_v35, %v3067_v38  ;;  %v3065_v27 = vsel %vm3052_vm0, %v6677_v49, %v6670_v59 }
0x101c   : > { %3579 = vmatprep.subr.mxu0 %v3146_v17  ;;  %v6810_v18 = vpop.permute.xlu1 %3399  ;;  %v3086_v61 = vmul.f32 %v6832_v36, %v3055_v58  ;;  %v6874_v59 = vrot.slane %v4873_v26, %v6712_v12  ;;  %v3081_v49 = vmul.f32 %v6828_v35, %v3065_v27  ;;  %v6878_v17 = vrot.slane %v4873_v26, %v6710_v31 }
0x101d   : > { %3580 = vmatpush1.msra.mxu0 %v3145_v7  ;;  %v3082_v7 = vmul.f32 %v6832_v36, %v3053_v23  ;;  %v4871_v23 = vld [vmem:[%s7731_s0 + $0x5] ss:$8 sm:$0x3] }
0x101e   : > { %v6823_v32 = vpop.permute.xlu0 %3351  ;;  %3581 = vmatprep.subr.mxu0 %v3144_v50 }
0x101f   : > { %3582 = vmatpush1.msra.mxu0 %v3143_v21  ;;  %v3417_v21 = vsel %vm3415_vm1, %v6767_v0, %v6780_v3  ;;  %v3452_v3 = vmul.f32 %v6874_v59, %v3433_v51 }
0x1020   : > { %3583 = vmatprep.subr.mxu0 %v3142_v22  ;;  %v3035_v25 = vpop.permute.xlu1 %3034  ;;  %v3454_v22 = vmul.f32 %v6874_v59, %v3434_v53 }
0x1021   : > { %v3056_v33 = vsel %vm3052_vm0, %v6741_v28, %v3035_v25  ;;  %v3068_v41 = vsel %vm3052_vm0, %v3035_v25, %v6741_v28  ;;  %3584 = vmatpush1.msra.mxu0 %v3141_v30  ;;  %v3066_v28 = vsel %vm3052_vm0, %v6695_v40, %v6693_v48  ;;  %v3084_v40 = vmul.f32 %v6832_v36, %v3054_v15  ;;  %v4872_v30 = vld [vmem:[%s7731_s0 + $0x6] ss:$8 sm:$0x3] }
0x1022   : > { %v3087_v13 = vmul.f32 %v6828_v35, %v3068_v41  ;;  %v6846_v46 = vpop.permute.xlu0 %3347  ;;  %3585 = vmatprep.subr.mxu0 %v3140_v20  ;;  %v3088_v2 = vmul.f32 %v6832_v36, %v3056_v33  ;;  %v3083_v8 = vmul.f32 %v6828_v35, %v3066_v28  ;;  %v3416_v25 = vsel %vm3415_vm1, %v6810_v18, %v6801_v10 }
0x1023   : > { %3586 = vmatpush1.msra.mxu0 %v3139_v57  ;;  %v3451_v20 = vmul.f32 %v6878_v17, %v3417_v21  ;;  %v6909_v58 = vrot.slane %v4872_v30, %v6712_v12 }
0x1024   : > { %3587 = vmatprep.subr.mxu0 %v3088_v2  ;;  %v3354_v4 = vpop.permute.xlu1 %3353 }
0x1025   : > { %3588 = vmatpush1.msra.mxu0 %v3087_v13 }
0x1026   : > { %v3414_v48 = vpop.permute.xlu0 %3413  ;;  %3589 = vmatprep.subr.mxu0 %v3086_v61 }
0x1027   : > { %v3435_v24 = vsel %vm3415_vm1, %v3414_v48, %v6705_v43  ;;  %3590 = vmatpush1.msra.mxu0 %v3085_v39  ;;  %v3419_v44 = vsel %vm3415_vm1, %v6705_v43, %v3414_v48  ;;  %v3418_v43 = vsel %vm3415_vm1, %v6728_v6, %v6758_v19  ;;  %v3432_v19 = vsel %vm3415_vm1, %v6801_v10, %v6810_v18 }
0x1028   : > { %3591 = vmatprep.subr.mxu0 %v3084_v40  ;;  %v3350_v54 = vpop.permute.xlu1 %3349  ;;  %v3456_v50 = vmul.f32 %v6874_v59, %v3435_v24  ;;  %v3455_v45 = vmul.f32 %v6878_v17, %v3419_v44  ;;  %v3453_v6 = vmul.f32 %v6878_v17, %v3418_v43  ;;  %v3450_v38 = vmul.f32 %v6874_v59, %v3432_v19 }
0x1029   : > { %3592 = vmatpush1.msra.mxu0 %v3083_v8  ;;  %v3449_v10 = vmul.f32 %v6878_v17, %v3416_v25  ;;  %v6915_v18 = vrot.slane %v4872_v30, %v6710_v31  ;;  %v3376_v13 = vsel %vm3357_vm2, %v6823_v32, %v3350_v54  ;;  %v3360_v2 = vsel %vm3357_vm2, %v3350_v54, %v6823_v32 }
0x102a   : > { %v3344_v1 = vpop.permute.xlu0 %3343  ;;  %3593 = vmatprep.subr.mxu0 %v3082_v7  ;;  %v3396_v32 = vmul.f32 %v6909_v58, %v3376_v13  ;;  %v6935_v8 = vrot.slane %v4871_v23, %v6712_v12  ;;  %v6940_v54 = vrot.slane %v4871_v23, %v6710_v31  ;;  %v4874_v23 = vld [vmem:[%s7731_s0 + $0x10] ss:$8 sm:$0x3] }
0x102b   : > { %3594 = vmatpush1.msra.mxu0 %v3081_v49  ;;  %v3395_v27 = vmul.f32 %v6915_v18, %v3360_v2 }
0x102c   : > { %3595 = vmatprep.subr.mxu0 %v3456_v50  ;;  %v3346_v60 = vpop.permute.xlu1 %3345 }
0x102d   : > { %3596 = vmatpush2.msra.mxu0 %v3455_v45  ;;  %v3359_v39 = vsel %vm3357_vm2, %v3346_v60, %v6846_v46 }
0x102e   : > { %v3356_v0 = vpop.permute.xlu0 %3355  ;;  %3597 = vmatprep.subr.mxu0 %v3454_v22 }
0x102f   : > { %v3377_v57 = vsel %vm3357_vm2, %v3356_v0, %v3354_v4  ;;  %3598 = vmatpush2.msra.mxu0 %v3453_v6  ;;  %v3361_v33 = vsel %vm3357_vm2, %v3354_v4, %v3356_v0  ;;  %v3375_v4 = vsel %vm3357_vm2, %v6846_v46, %v3346_v60  ;;  %v3393_v46 = vmul.f32 %v6915_v18, %v3359_v39 }
0x1030   : > { %3599 = vmatprep.subr.mxu0 %v3452_v3  ;;  %v3342_v41 = vpop.permute.xlu1 %3341  ;;  %v3398_v15 = vmul.f32 %v6909_v58, %v3377_v57  ;;  %v3397_v61 = vmul.f32 %v6915_v18, %v3361_v33  ;;  %v3394_v44 = vmul.f32 %v6909_v58, %v3375_v4  ;;  %v4870_v33 = vld [vmem:[%s7731_s0 + $0x4] ss:$8 sm:$0x3] }
0x1031   : > { %3600 = vmatpush2.msra.mxu0 %v3451_v20  ;;  %v3374_v48 = vsel %vm3357_vm2, %v3344_v1, %v3342_v41  ;;  %v3358_v40 = vsel %vm3357_vm2, %v3342_v41, %v3344_v1 }
0x1032   : > { %v3294_v28 = vpop.permute.xlu0 %3293  ;;  %3601 = vmatprep.subr.mxu0 %v3450_v38  ;;  %v3392_v49 = vmul.f32 %v6909_v58, %v3374_v48  ;;  %v3391_v1 = vmul.f32 %v6915_v18, %v3358_v40 }
0x1033   : > { %3602 = vmatpush2.msra.mxu0 %v3449_v10 }
0x1034   : > { %3603 = vmatprep.subr.mxu0 %v3398_v15  ;;  %v3296_v26 = vpop.permute.xlu1 %3295  ;;  %v6964_v15 = vrot.slane %v4870_v33, %v6712_v12 }
0x1035   : > { %3604 = vmatpush2.msra.mxu0 %v3397_v61 }
0x1036   : > { %v3298_v24 = vpop.permute.xlu0 %3297  ;;  %3605 = vmatprep.subr.mxu0 %v3396_v32  ;;  %v3282_v61 = vmul.f32 %v6964_v15, %v6578_v5  ;;  %v3280_v32 = vmul.f32 %v6964_v15, %v6554_v55  ;;  %v6981_v5 = vrot.slane %v4874_v23, %v6712_v12  ;;  %v3278_v40 = vmul.f32 %v6964_v15, %v6534_v14 }
0x1037   : > { %v3319_v7 = vsel %vm3299_vm3, %v3298_v24, %v3296_v26  ;;  %3606 = vmatpush2.msra.mxu0 %v3395_v27  ;;  %v3303_v53 = vsel %vm3299_vm3, %v3296_v26, %v3298_v24  ;;  %v3276_v12 = vmul.f32 %v6964_v15, %v6514_v63  ;;  %v3519_v63 = vld [vmem:[%s7729_s30 + $0x20] sm:$0xff] }
0x1038   : > { %3607 = vmatprep.subr.mxu0 %v3394_v44  ;;  %v3292_v43 = vpop.permute.xlu1 %3291  ;;  %v3340_v51 = vmul.f32 %v6935_v8, %v3319_v7  ;;  %v3339_v60 = vmul.f32 %v6940_v54, %v3303_v53 }
0x1039   : > { %v3318_v50 = vsel %vm3299_vm3, %v3294_v28, %v3292_v43  ;;  %3608 = vmatpush2.msra.mxu0 %v3393_v46  ;;  %v3302_v45 = vsel %vm3299_vm3, %v3292_v43, %v3294_v28  ;;  %v6967_v28 = vrot.slane %v4870_v33, %v6710_v31  ;;  %v3517_v33 = vld [vmem:[%s7729_s30 + $0x10] sm:$0xff] }
0x103a   : > { %v3290_v21 = vpop.permute.xlu0 %3289  ;;  %3609 = vmatprep.subr.mxu0 %v3392_v49  ;;  %v3338_v22 = vmul.f32 %v6935_v8, %v3318_v50  ;;  %v3337_v19 = vmul.f32 %v6940_v54, %v3302_v45 }
0x103b   : > { %3610 = vmatpush2.msra.mxu0 %v3391_v1  ;;  %v3281_v39 = vmul.f32 %v6967_v28, %v6570_v56  ;;  %v3279_v27 = vmul.f32 %v6967_v28, %v6548_v47  ;;  %v6986_v56 = vrot.slane %v4874_v23, %v6710_v31  ;;  %v3277_v55 = vmul.f32 %v6967_v28, %v6528_v62  ;;  %v3515_v31 = vld [vmem:[%s7729_s30] sm:$0xff] }
0x103c   : > { %3611 = vmatprep.subr.mxu0 %v3340_v51  ;;  %v3288_v6 = vpop.permute.xlu1 %3287  ;;  %v3275_v14 = vmul.f32 %v6967_v28, %v6510_v34  ;;  %v3518_v51 = vld [vmem:[%s7729_s30 + $0x18] sm:$0xff] }
0x103d   : > { %v3301_v30 = vsel %vm3299_vm3, %v3288_v6, %v3290_v21  ;;  %v3317_v25 = vsel %vm3299_vm3, %v3290_v21, %v3288_v6  ;;  %3612 = vmatpush2.msra.mxu0 %v3339_v60 }
0x103e   : > { %v3335_v0 = vmul.f32 %v6940_v54, %v3301_v30  ;;  %v3336_v3 = vmul.f32 %v6935_v8, %v3317_v25  ;;  %v3286_v20 = vpop.permute.xlu0 %3285  ;;  %3613 = vmatprep.subr.mxu0 %v3338_v22  ;;  %v3522_v22 = vld [vmem:[%s7729_s30 + $0x38] sm:$0xff] }
0x103f   : > { %3614 = vmatpush2.msra.mxu0 %v3337_v19 }
0x1040   : > { %3615 = vmatprep.subr.mxu0 %v3336_v3  ;;  %v3284_v57 = vpop.permute.xlu1 %3283  ;;  %v3521_v3 = vld [vmem:[%s7729_s30 + $0x30] sm:$0xff] }
0x1041   : > { %v3300_v41 = vsel %vm3299_vm3, %v3284_v57, %v3286_v20  ;;  %v3316_v38 = vsel %vm3299_vm3, %v3286_v20, %v3284_v57  ;;  %3616 = vmatpush2.msra.mxu0 %v3335_v0  ;;  %v3525_v20 = vld [vmem:[%s7729_s30 + $0x50] sm:$0xff]  ;;  %v3524_v57 = vld [vmem:[%s7729_s30 + $0x48] sm:$0xff] }
0x1042   : > { %v3333_v10 = vmul.f32 %v6940_v54, %v3300_v41  ;;  %v3334_v13 = vmul.f32 %v6935_v8, %v3316_v38  ;;  %v3468_v2 = vpop.permute.xlu0 %3467  ;;  %v3520_v41 = vld [vmem:[%s7729_s30 + $0x28] sm:$0xff]  ;;  %v3523_v38 = vld [vmem:[%s7729_s30 + $0x40] sm:$0xff] }
0x1044   : > { %3617 = vmatprep.subr.mxu0 %v3334_v13  ;;  %v3470_v4 = vpop.permute.xlu1 %3469 }
0x1045   : > { %3618 = vmatpush2.msra.mxu0 %v3333_v10  ;;  %v3526_v10 = vld [vmem:[%s7729_s30 + $0x58] sm:$0xff] }
0x1046   : > { %v3472_v26 = vpop.permute.xlu0 %3471  ;;  %3619 = vmatprep.subr.mxu0 %v3282_v61 }
0x1047   : > { %3620 = vmatpush2.msra.mxu0 %v3281_v39  ;;  %v3493_v24 = vsel %vm3473_vm4, %v3472_v26, %v3470_v4  ;;  %v3477_v44 = vsel %vm3473_vm4, %v3470_v4, %v3472_v26 }
0x1048   : > { %v3466_v48 = vpop.permute.xlu1 %3465  ;;  %3621 = vmatprep.subr.mxu0 %v3280_v32  ;;  %v3514_v7 = vmul.f32 %v6981_v5, %v3493_v24  ;;  %v3513_v53 = vmul.f32 %v6986_v56, %v3477_v44 }
0x1049   : > { %3622 = vmatpush2.msra.mxu0 %v3279_v27  ;;  %v3492_v46 = vsel %vm3473_vm4, %v3468_v2, %v3466_v48  ;;  %v3476_v62 = vsel %vm3473_vm4, %v3466_v48, %v3468_v2 }
0x104a   : > { %v3464_v47 = vpop.permute.xlu0 %3463  ;;  %3623 = vmatprep.subr.mxu0 %v3278_v40  ;;  %v3512_v34 = vmul.f32 %v6981_v5, %v3492_v46  ;;  %v3511_v50 = vmul.f32 %v6986_v56, %v3476_v62 }
0x104b   : > { %3624 = vmatpush2.msra.mxu0 %v3277_v55 }
0x104c   : > { %v3462_v49 = vpop.permute.xlu1 %3461  ;;  %3625 = vmatprep.subr.mxu0 %v3276_v12 }
0x104d   : > { %v3491_v43 = vsel %vm3473_vm4, %v3464_v47, %v3462_v49  ;;  %3626 = vmatpush2.msra.mxu0 %v3275_v14  ;;  %v3475_v1 = vsel %vm3473_vm4, %v3462_v49, %v3464_v47 }
0x104e   : > { %3628 = vmatmul.mubr.f32.vlgmr.msra.gmra.mxu0 %v3515_v31  ;;  %3676 = vmatprep.subr.mxu0 %v3514_v7  ;;  %v3510_v45 = vmul.f32 %v6981_v5, %v3491_v43  ;;  %v3460_v21 = vpop.permute.xlu0 %3459  ;;  %v3509_v6 = vmul.f32 %v6986_v56, %v3475_v1 }
0x104f   : > { %3677 = vmatpush1.msra.mxu0 %v3513_v53  ;;  %3633 = vmatprep.mubr.f32.mxu0 %v3519_v63 }
0x1050   : > { %v3458_v60 = vpop.permute.xlu1 %3457  ;;  %3678 = vmatprep.subr.mxu0 %v3512_v34 }
0x1051   : > { %v3474_v19 = vsel %vm3473_vm4, %v3458_v60, %v3460_v21  ;;  %v3490_v30 = vsel %vm3473_vm4, %v3460_v21, %v3458_v60  ;;  %3679 = vmatpush1.msra.mxu0 %v3511_v50 }
0x1052   : > { %v3507_v25 = vmul.f32 %v6986_v56, %v3474_v19  ;;  %v3508_v0 = vmul.f32 %v6981_v5, %v3490_v30  ;;  %3634 = vmatmul.mubr.f32.gmra.mxu0 %v3518_v51  ;;  %3680 = vmatprep.subr.mxu0 %v3510_v45 }
0x1053   : > { %3681 = vmatpush1.msra.mxu0 %v3509_v6  ;;  %3639 = vmatprep.mubr.f32.mxu0 %v3522_v22 }
0x1054   : > { %3682 = vmatprep.subr.mxu0 %v3508_v0 }
0x1055   : > { %3683 = vmatpush1.msra.mxu0 %v3507_v25  ;;  %v7058_v25 = vld [vmem:[%s7732_s1] sm:$0xff]  ;;  %s7753_s1 = sld [smem:[#allocation30_spill]] }
0x1056   : > { %3640 = vmatmul.mubr.f32.gmra.mxu0 %v3521_v3 }
0x1057   : > { %3645 = vmatprep.mubr.f32.mxu0 %v3525_v20 }
0x105a   : > { %3646 = vmatmul.mubr.f32.gmra.mxu0 %v3524_v57  ;;  %v4097_v57 = vld [vmem:[%s7733_s26 + $0x10] sm:$0xff] }
0x105b   : > { %3716 = vmatprep.mubr.f32.mxu0 %v7722_v37  ;;  %v3544_v12 = vpop.permute.xlu0 %3543 }
0x105d   : > { %v3549_v44 = vpop.permute.xlu1 %3548 }
0x105e   : > { %4875 = vmatmul.mubr.msk.f32.vlgmr.msra.gmra.mxu0 %vm1090_vm12, %v3517_v33  ;;  %v4130_v33 = vld [vmem:[%s7734_s18 + $0x18] sm:$0xff] }
0x105f   : > { %3722 = vmatprep.mubr.f32.mxu0 %v7722_v37  ;;  %v3534_v50 = vpop.permute.xlu0 %3533 }
0x1061   : > { %v3539_v63 = vpop.permute.xlu1 %3538 }
0x1062   : > { %4876 = vmatmul.mubr.msk.f32.gmra.mxu0 %vm1090_vm12, %v3520_v41  ;;  %v4129_v41 = vld [vmem:[%s7734_s18 + $0x10] sm:$0xff] }
0x1063   : > { %3728 = vmatprep.mubr.f32.mxu0 %v7722_v37 }
0x1066   : > { %4877 = vmatmul.mubr.msk.f32.gmra.mxu0 %vm1090_vm12, %v3523_v38  ;;  %v4128_v38 = vld [vmem:[%s7734_s18 + $0x8] sm:$0xff] }
0x1067   : > { %3734 = vmatprep.mubr.f32.mxu0 %v7722_v37 }
0x106a   : > { %4878 = vmatmul.mubr.msk.f32.gmra.mxu0 %vm1090_vm12, %v3526_v10 }
0x106b   : > { %4732 = vmatprep.mubr.f32.mxu0 %v7722_v37 }
0x110e   : > { %v3629_v13 = vpop.f32.mrf.mxu0 }
0x110f   : > { %v3630_v22 = vadd.f32 %v3629_v13, %v3534_v50 }
0x1110   : > { %v3631_v2 = vpop.f32.mrf.mxu0 }
0x1111   : > { %v3632_v21 = vadd.f32 %v3631_v2, %v3534_v50  ;;  %v7078_v2 = vld [vmem:[%s7735_s25] sm:$0xff] }
0x1112   : > { %v3635_v4 = vpop.f32.mrf.mxu0 }
0x1113   : > { %v3636_v51 = vadd.f32 %v3635_v4, %v3539_v63  ;;  %v7086_v4 = vld [vmem:[%s7735_s25 + $0x8] sm:$0xff] }
0x1114   : > { %v3637_v61 = vpop.f32.mrf.mxu0 }
0x1115   : > { %v3638_v34 = vadd.f32 %v3637_v61, %v3539_v63  ;;  %v7094_v61 = vld [vmem:[%s7735_s25 + $0x10] sm:$0xff] }
0x1116   : > { %v3641_v23 = vpop.f32.mrf.mxu0 }
0x1117   : > { %v3642_v53 = vadd.f32 %v3641_v23, %v3544_v12  ;;  %v5300_v23 = vld [vmem:[%s7735_s25 + $0x18] sm:$0xff]  ;;  %s734_s25 = scalar_lea.vmem %s7753_s1, %s4900_s5 }
0x1118   : > { %v3643_v39 = vpop.f32.mrf.mxu0 }
0x1119   : > { %v3644_v62 = vadd.f32 %v3643_v39, %v3544_v12 }
0x111a   : > { %v3647_v26 = vpop.f32.mrf.mxu0 }
0x111b   : > { %v3648_v31 = vadd.f32 %v3647_v26, %v3549_v44 }
0x111c   : > { %v3649_v32 = vpop.f32.mrf.mxu0 }
0x111d   : > { %v3650_v14 = vadd.f32 %v3649_v32, %v3549_v44 }
0x111e   : > { %v3718_v27 = vpop.f32.mrf.mxu0 }
0x111f   : > { %v3719_v30 = vadd.f32 %v3718_v27, %v3630_v22  ;;  %v4098_v22 = vld [vmem:[%s7733_s26 + $0x18] sm:$0xff] }
0x1120   : > { %v3720_v48 = vpop.f32.mrf.mxu0 }
0x1121   : > { %v3721_v19 = vadd.f32 %v3720_v48, %v3632_v21 }
0x1122   : > { %v3724_v40 = vpop.f32.mrf.mxu0 }
0x1123   : > { %v3725_v6 = vadd.f32 %v3724_v40, %v3636_v51 }
0x1124   : > { %v3726_v24 = vpop.f32.mrf.mxu0 }
0x1125   : > { %v3727_v60 = vadd.f32 %v3726_v24, %v3638_v34 }
0x1126   : > { %v3730_v55 = vpop.f32.mrf.mxu0 }
0x1127   : > { %v3731_v45 = vadd.f32 %v3730_v55, %v3642_v53 }
0x1128   : > { %v3732_v47 = vpop.f32.mrf.mxu0 }
0x1129   : > { %v3733_v1 = vadd.f32 %v3732_v47, %v3644_v62 }
0x112a   : > { %v3736_v46 = vpop.f32.mrf.mxu0 }
0x112b   : > { %v3737_v43 = vadd.f32 %v3736_v46, %v3648_v31 }
0x112c   : > { %v3738_v7 = vpop.f32.mrf.mxu0 }
0x112d   : > { %v7052_v49 = vadd.f32 %v3738_v7, %v3650_v14 }
0x112f   : > { %3765 = vmatprep.subr.mxu1 %v7052_v49 }
0x1130   : > { %3766 = vmatpush1.msra.mxu1 %v3737_v43 }
0x1131   : > { %3767 = vmatprep.subr.mxu1 %v3733_v1 }
0x1132   : > { %3768 = vmatpush1.msra.mxu1 %v3731_v45 }
0x1133   : > { %3769 = vmatprep.subr.mxu1 %v3727_v60 }
0x1134   : > { %3770 = vmatpush1.msra.mxu1 %v3725_v6 }
0x1135   : > { %3771 = vmatprep.subr.mxu1 %v3721_v19 }
0x1136   : > { %3772 = vmatpush1.msra.mxu1 %v3719_v30 }
0x1137   : > { %4879 = vmatmul.mubr.msk.f32.vlgmr.msra.gmra.mxu1 %vm1090_vm12, %v7058_v25 }
0x1138   : > { %3880 = vmatprep.mubr.f32.mxu1 %v7722_v37 }
0x11f7   : > { %v3807_v0 = vpop.f32.mrf.mxu1 }
0x11f9   : > { %v3809_v3 = vpop.f32.mrf.mxu1 }
0x11fa   : > { %v3812_v20 = vadd.f32 %v3809_v3, %v3807_v0 }
0x11fc   : > { %3813 = vadd.xlane.f32.xlu1 %v3812_v20 }
0x120d   : > { %4111 = vperm.xlu1 %5215, %v4097_v57  }
0x1211   : > { %4148 = vperm.xlu1 %5215, %v4130_v33  }
0x1215   : > { %4143 = vperm.xlu1 %5215, %v4129_v41  }
0x1219   : > { %4138 = vperm.xlu1 %5215, %v4128_v38  }
0x1285   : > { %v3814_v10 = vpop.xlane.xlu1 %3813 }
0x1286   : > { %v3815_v13 = vmul.f32 0.0009765625, %v3814_v10 }
0x1288   : > { %3846 = vmatprep.subr.mxu1 %v3815_v13 }
0x1289   : > { %3847 = vmatpush1.msra.mxu1 %v3815_v13  ;;  %v4112_v33 = vpop.permute.xlu1 %4111 }
0x128a   : > { %4880 = vmatmul.mubr.msk.f32.vlgmr.msra.gmra.mxu1 %vm842_vm9, %v7078_v2 }
0x128b   : > { %3886 = vmatprep.mubr.f32.mxu1 %v7722_v37 }
0x128d   : > { %v7152_v38 = vpop.permute.xlu1 %4148 }
0x128e   : > { %4881 = vmatmul.mubr.msk.f32.gmra.mxu1 %vm842_vm9, %v7086_v4 }
0x128f   : > { %3892 = vmatprep.mubr.f32.mxu1 %v7722_v37 }
0x1292   : > { %4882 = vmatmul.mubr.msk.f32.gmra.mxu1 %vm842_vm9, %v7094_v61 }
0x1293   : > { %3898 = vmatprep.mubr.f32.mxu1 %v7722_v37 }
0x1296   : > { %4883 = vmatmul.mubr.msk.f32.gmra.mxu1 %vm842_vm9, %v5300_v23 }
0x1297   : > { %3985 = vmatprep.mubr.f32.mxu1 %v7722_v37 }
0x134a   : > { %v3882_v39 = vpop.f32.mrf.mxu1 }
0x134c   : > { %v3884_v26 = vpop.f32.mrf.mxu1 }
0x134d   : > { %v3906_v63 = vsub.f32 %v3721_v19, %v3884_v26  ;;  %v4095_v19 = vld [vmem:[%s7733_s26] sm:$0xff] }
0x134e   : > { %v3888_v32 = vpop.f32.mrf.mxu1 }
0x134f   : > { %v3907_v7 = vsub.f32 %v3725_v6, %v3888_v32  ;;  %v3914_v50 = vmul.f32 %v3906_v63, %v3906_v63  ;;  %v4096_v6 = vld [vmem:[%s7733_s26 + $0x8] sm:$0xff] }
0x1350   : > { %v3890_v27 = vpop.f32.mrf.mxu1 }
0x1351   : > { %v7113_v14 = vsub.f32 %v3727_v60, %v3890_v27 }
0x1352   : > { %v3894_v48 = vpop.f32.mrf.mxu1 }
0x1353   : > { %v7111_v46 = vsub.f32 %v3731_v45, %v3894_v48  ;;  %v3916_v34 = vmul.f32 %v7113_v14, %v7113_v14 }
0x1354   : > { %v3896_v40 = vpop.f32.mrf.mxu1 }
0x1355   : > { %v7106_v47 = vsub.f32 %v3733_v1, %v3896_v40  ;;  %v3915_v1 = vmul.f32 %v3907_v7, %v3907_v7 }
0x1356   : > { %v3900_v24 = vpop.f32.mrf.mxu1 }
0x1357   : > { %v7104_v55 = vsub.f32 %v3737_v43, %v3900_v24  ;;  %v3918_v53 = vmul.f32 %v7106_v47, %v7106_v47  ;;  %v3905_v43 = vsub.f32 %v3719_v30, %v3882_v39  ;;  %v4127_v30 = vld [vmem:[%s7734_s18] sm:$0xff] }
0x1358   : > { %v3902_v44 = vpop.f32.mrf.mxu1 }
0x1359   : > { %v7109_v12 = vsub.f32 %v7052_v49, %v3902_v44  ;;  %v3919_v62 = vmul.f32 %v7104_v55, %v7104_v55  ;;  %v3917_v49 = vmul.f32 %v7111_v46, %v7111_v46  ;;  %v3913_v51 = vmul.f32 %v3905_v43, %v3905_v43 }
0x135b   : > { %v3920_v31 = vmul.f32 %v7109_v12, %v7109_v12 }
0x135d   : > { %3945 = vmatprep.subr.mxu1 %v3920_v31 }
0x135e   : > { %3946 = vmatpush1.msra.mxu1 %v3919_v62 }
0x135f   : > { %3947 = vmatprep.subr.mxu1 %v3918_v53 }
0x1360   : > { %3948 = vmatpush1.msra.mxu1 %v3917_v49 }
0x1361   : > { %3949 = vmatprep.subr.mxu1 %v3916_v34 }
0x1362   : > { %3950 = vmatpush1.msra.mxu1 %v3915_v1 }
0x1363   : > { %3951 = vmatprep.subr.mxu1 %v3914_v50 }
0x1364   : > { %3952 = vmatpush1.msra.mxu1 %v3913_v51 }
0x1365   : > { %4884 = vmatmul.mubr.msk.f32.vlgmr.msra.gmra.mxu1 %vm1090_vm12, %v7058_v25 }
0x1366   : > { %4062 = vmatprep.mubr.f32.mxu1 %v7722_v37 }
0x1425   : > { %v3987_v45 = vpop.f32.mrf.mxu1 }
0x1427   : > { %v3989_v21 = vpop.f32.mrf.mxu1 }
0x1428   : > { %v3992_v60 = vadd.f32 %v3989_v21, %v3987_v45 }
0x142a   : > { %3993 = vadd.xlane.f32.xlu0 %v3992_v60 }
0x1440   : > { %4116 = vperm.xlu0 %5214, %v4098_v22  }
0x1444   : > { %4106 = vperm.xlu0 %5214, %v4096_v6  }
0x1448   : > { %4101 = vperm.xlu0 %5214, %v4095_v19  }
0x144c   : > { %4133 = vperm.xlu0 %5214, %v4127_v30  }
0x14b3   : > { %v3994_v25 = vpop.xlane.xlu0 %3993 }
0x14b4   : > { %v3995_v0 = vmul.f32 0.0009765625, %v3994_v25 }
0x14b6   : > { %v3996_v3 = vadd.f32 1e-06, %v3995_v0 }
0x14b8   : > { %5253 = vrsqrt.f32 %v3996_v3 }
0x14bb   : > { %v7150_v57 = vpop.permute.xlu0 %4116 }
0x14bf   : > { %v4107_v41 = vpop.permute.xlu0 %4106 }
0x14c3   : > { %v4102_v10 = vpop.permute.xlu0 %4101 }
0x14c5   : > { %v5254_v20 = vpop.eup %5253 }
0x14c6   : > { %4028 = vmatprep.subr.mxu1 %v5254_v20 }
0x14c7   : > { %4029 = vmatpush1.msra.mxu1 %v5254_v20  ;;  %v4134_v27 = vpop.permute.xlu0 %4133 }
0x14c8   : > { %4885 = vmatmul.mubr.msk.f32.vlgmr.msra.gmra.mxu1 %vm842_vm9, %v7078_v2 }
0x14c9   : > { %4068 = vmatprep.mubr.f32.mxu1 %v7722_v37 }
0x14cc   : > { %4886 = vmatmul.mubr.msk.f32.gmra.mxu1 %vm842_vm9, %v7086_v4  ;;  %v4144_v4 = vpop.permute.xlu1 %4143 }
0x14cd   : > { %4074 = vmatprep.mubr.f32.mxu1 %v7722_v37 }
0x14d0   : > { %4887 = vmatmul.mubr.msk.f32.gmra.mxu1 %vm842_vm9, %v7094_v61  ;;  %v4139_v49 = vpop.permute.xlu1 %4138 }
0x14d1   : > { %4080 = vmatprep.mubr.f32.mxu1 %v7722_v37 }
0x14d4   : > { %4888 = vmatmul.mubr.msk.f32.gmra.mxu1 %vm842_vm9, %v5300_v23 }
0x1588   : > { %v4064_v13 = vpop.f32.mrf.mxu1 }
0x1589   : > { %v4087_v2 = vmul.f32 %v4064_v13, %v3905_v43 }
0x158a   : > { %v4066_v39 = vpop.f32.mrf.mxu1 }
0x158b   : > { %v4119_v26 = vmul.f32 %v4102_v10, %v4087_v2  ;;  %v4088_v32 = vmul.f32 %v4066_v39, %v3906_v63 }
0x158c   : > { %v4070_v48 = vpop.f32.mrf.mxu1 }
0x158d   : > { %v4151_v61 = vadd.f32 %v4134_v27, %v4119_v26  ;;  %v4120_v40 = vmul.f32 %v4102_v10, %v4088_v32  ;;  %v4089_v37 = vmul.f32 %v4070_v48, %v3907_v7 }
0x158e   : > { %v4072_v24 = vpop.f32.mrf.mxu1 }
0x158f   : > { %v4889_v23 = vmul.f32 -1.442695, %v4151_v61  ;;  %v4152_v44 = vadd.f32 %v4134_v27, %v4120_v40  ;;  %v4121_v31 = vmul.f32 %v4107_v41, %v4089_v37  ;;  %v4090_v62 = vmul.f32 %v4072_v24, %v7113_v14 }
0x1590   : > { %v4076_v63 = vpop.f32.mrf.mxu1 }
0x1591   : > { %5255 = vpow2.f32 %v4889_v23  ;;  %v4890_v53 = vmul.f32 -1.442695, %v4152_v44  ;;  %v4153_v43 = vadd.f32 %v4139_v49, %v4121_v31  ;;  %v4122_v34 = vmul.f32 %v4107_v41, %v4090_v62 }
0x1592   : > { %v4091_v7 = vmul.f32 %v4076_v63, %v7111_v46  ;;  %v4078_v14 = vpop.f32.mrf.mxu1 }
0x1593   : > { %5257 = vpow2.f32 %v4890_v53  ;;  %v4891_v1 = vmul.f32 -1.442695, %v4153_v43  ;;  %v4154_v50 = vadd.f32 %v4139_v49, %v4122_v34  ;;  %v4092_v19 = vmul.f32 %v4078_v14, %v7106_v47 }
0x1594   : > { %v4123_v6 = vmul.f32 %v4112_v33, %v4091_v7  ;;  %v4082_v2 = vpop.f32.mrf.mxu1 }
0x1595   : > { %5259 = vpow2.f32 %v4891_v1  ;;  %v4892_v51 = vmul.f32 -1.442695, %v4154_v50  ;;  %v4124_v0 = vmul.f32 %v4112_v33, %v4092_v19  ;;  %v4093_v47 = vmul.f32 %v4082_v2, %v7104_v55 }
0x1596   : > { %v4155_v30 = vadd.f32 %v4144_v4, %v4123_v6  ;;  %v4084_v33 = vpop.f32.mrf.mxu1 }
0x1597   : > { %5261 = vpow2.f32 %v4892_v51  ;;  %v4156_v41 = vadd.f32 %v4144_v4, %v4124_v0  ;;  %v4125_v4 = vmul.f32 %v7150_v57, %v4093_v47  ;;  %v4094_v48 = vmul.f32 %v4084_v33, %v7109_v12 }
0x1598   : > { %v4893_v3 = vmul.f32 -1.442695, %v4155_v30 }
0x1599   : > { %v4894_v26 = vmul.f32 -1.442695, %v4156_v41  ;;  %v4157_v55 = vadd.f32 %v7152_v38, %v4125_v4  ;;  %v4126_v37 = vmul.f32 %v7150_v57, %v4094_v48 }
0x159b   : > { %v4895_v24 = vmul.f32 -1.442695, %v4157_v55  ;;  %v4158_v12 = vadd.f32 %v7152_v38, %v4126_v37 }
0x159d   : > { %v4896_v57 = vmul.f32 -1.442695, %v4158_v12 }
0x159e   : > { %v5256_v45 = vpop.eup %5255 }
0x159f   : > { %v4183_v21 = vadd.f32 1.0, %v5256_v45 }
0x15a0   : > { %v5258_v60 = vpop.eup %5257 }
0x15a1   : > { %5263 = vrcp.f32 %v4183_v21  ;;  %v4184_v22 = vadd.f32 1.0, %v5258_v60 }
0x15a2   : > { %v5260_v25 = vpop.eup %5259 }
0x15a3   : > { %5265 = vrcp.f32 %v4184_v22  ;;  %v4185_v20 = vadd.f32 1.0, %v5260_v25 }
0x15a4   : > { %v5262_v10 = vpop.eup %5261  ;;  %5267 = vpow2.f32 %v4893_v3 }
0x15a5   : > { %5269 = vrcp.f32 %v4185_v20  ;;  %v4186_v27 = vadd.f32 1.0, %v5262_v10 }
0x15a6   : > { %5271 = vpow2.f32 %v4894_v26 }
0x15a7   : > { %5273 = vrcp.f32 %v4186_v27 }
0x15a8   : > { %5275 = vpow2.f32 %v4895_v24 }
0x15ae   : > { %v5264_v13 = vpop.eup %5263 }
0x15af   : > { %v7157_v46 = vmul.f32 %v5264_v13, %v4151_v61 }
0x15b0   : > { %v5266_v39 = vpop.eup %5265 }
0x15b1   : > { %7736 = vst [vmem:[#allocation7_spill] sm:$0xff] %v7157_v46  ;;  %v7159_v32 = vmul.f32 %v5266_v39, %v4152_v44  ;;  %4367 = vrot.lane.b32.xlu0 %v7157_v46, %s7705_s2  ;;  %v5268_v61 = vpop.eup %5267 }
0x15b2   : > { %v5270_v40 = vpop.eup %5269  ;;  %v4187_v44 = vadd.f32 1.0, %v5268_v61 }
0x15b3   : > { %7737 = vst [vmem:[#allocation6_spill] sm:$0xff] %v7159_v32  ;;  %4355 = vrot.lane.b32.xlu1 %v7159_v32, %s7705_s2  ;;  %v7180_v23 = vmul.f32 %v5270_v40, %v4153_v43  ;;  %v5272_v31 = vpop.eup %5271 }
0x15b4   : > { %v5274_v62 = vpop.eup %5273  ;;  %5277 = vrcp.f32 %v4187_v44  ;;  %v4188_v49 = vadd.f32 1.0, %v5272_v31 }
0x15b5   : > { %4323 = vrot.lane.b32.xlu0 %v7157_v46, %s5328_s13  ;;  %7738 = vst [vmem:[#allocation5_spill] sm:$0xff] %v7180_v23  ;;  %v7189_v53 = vmul.f32 %v5274_v62, %v4154_v50  ;;  %5279 = vpow2.f32 %v4896_v57  ;;  %v5276_v38 = vpop.eup %5275 }
0x15b6   : > { %5281 = vrcp.f32 %v4188_v49  ;;  %v4189_v1 = vadd.f32 1.0, %v5276_v38 }
0x15b7   : > { %4311 = vrot.lane.b32.xlu1 %v7159_v32, %s5328_s13  ;;  %7739 = vst [vmem:[#allocation4_spill] sm:$0xff] %v7189_v53 }
0x15b8   : > { %5283 = vrcp.f32 %v4189_v1 }
0x15b9   : > { %4279 = vrot.lane.b32.xlu0 %v7157_v46, %s5329_s14 }
0x15bb   : > { %4267 = vrot.lane.b32.xlu1 %v7159_v32, %s5329_s14 }
0x15bd   : > { %4235 = vrot.lane.b32.xlu0 %v7157_v46, %s5330_s15 }
0x15bf   : > { %4219 = vrot.lane.b32.xlu1 %v7159_v32, %s5330_s15 }
0x15c1   : > { %4369 = vrot.lane.b32.xlu0 %v7180_v23, %s7705_s2  ;;  %v5278_v43 = vpop.eup %5277 }
0x15c2   : > { %v7205_v34 = vmul.f32 %v5278_v43, %v4155_v30  ;;  %v5280_v50 = vpop.eup %5279 }
0x15c3   : > { %4499 = vrot.lane.b32.xlu1 %v7180_v23, %s5331_s16  ;;  %v5282_v63 = vpop.eup %5281  ;;  %v4190_v45 = vadd.f32 1.0, %v5280_v50 }
0x15c4   : > { %7740 = vst [vmem:[#allocation8_spill] sm:$0xff] %v7205_v34  ;;  %v7213_v51 = vmul.f32 %v5282_v63, %v4156_v41 }
0x15c5   : > { %4325 = vrot.lane.b32.xlu0 %v7180_v23, %s5328_s13  ;;  %5285 = vrcp.f32 %v4190_v45  ;;  %v5284_v7 = vpop.eup %5283 }
0x15c6   : > { %7741 = vst [vmem:[#allocation9_spill] sm:$0xff] %v7213_v51  ;;  %v7229_v21 = vmul.f32 %v5284_v7, %v4157_v55 }
0x15c7   : > { %4357 = vrot.lane.b32.xlu1 %v7189_v53, %s7705_s2 }
0x15c9   : > { %4281 = vrot.lane.b32.xlu0 %v7180_v23, %s5329_s14 }
0x15cb   : > { %4313 = vrot.lane.b32.xlu1 %v7189_v53, %s5328_s13 }
0x15cd   : > { %4237 = vrot.lane.b32.xlu0 %v7180_v23, %s5330_s15 }
0x15cf   : > { %4269 = vrot.lane.b32.xlu1 %v7189_v53, %s5329_s14 }
0x15d1   : > { %4501 = vrot.lane.b32.xlu0 %v7189_v53, %s5331_s16 }
0x15d2   : > { %v5286_v60 = vpop.eup %5285 }
0x15d3   : > { %4221 = vrot.lane.b32.xlu1 %v7189_v53, %s5330_s15  ;;  %v7237_v22 = vmul.f32 %v5286_v60, %v4158_v12 }
0x15d5   : > { %4371 = vrot.lane.b32.xlu0 %v7205_v34, %s7705_s2 }
0x15d7   : > { %4503 = vrot.lane.b32.xlu1 %v7205_v34, %s5331_s16 }
0x15d9   : > { %4327 = vrot.lane.b32.xlu0 %v7205_v34, %s5328_s13 }
0x15db   : > { %4359 = vrot.lane.b32.xlu1 %v7213_v51, %s7705_s2 }
0x15dd   : > { %4283 = vrot.lane.b32.xlu0 %v7205_v34, %s5329_s14 }
0x15df   : > { %4315 = vrot.lane.b32.xlu1 %v7213_v51, %s5328_s13 }
0x15e1   : > { %4239 = vrot.lane.b32.xlu0 %v7205_v34, %s5330_s15 }
0x15e3   : > { %4271 = vrot.lane.b32.xlu1 %v7213_v51, %s5329_s14 }
0x15e5   : > { %4505 = vrot.lane.b32.xlu0 %v7213_v51, %s5331_s16 }
0x15e7   : > { %4223 = vrot.lane.b32.xlu1 %v7213_v51, %s5330_s15 }
0x15e9   : > { %4373 = vrot.lane.b32.xlu0 %v7229_v21, %s7705_s2 }
0x15eb   : > { %4507 = vrot.lane.b32.xlu1 %v7229_v21, %s5331_s16 }
0x15ed   : > { %4329 = vrot.lane.b32.xlu0 %v7229_v21, %s5328_s13 }
0x15ef   : > { %4361 = vrot.lane.b32.xlu1 %v7237_v22, %s7705_s2 }
0x15f1   : > { %4285 = vrot.lane.b32.xlu0 %v7229_v21, %s5329_s14 }
0x15f3   : > { %4495 = vrot.lane.b32.xlu1 %v7157_v46, %s5331_s16 }
0x15f5   : > { %4241 = vrot.lane.b32.xlu0 %v7229_v21, %s5330_s15 }
0x15f7   : > { %4317 = vrot.lane.b32.xlu1 %v7237_v22, %s5328_s13 }
0x15f9   : > { %4497 = vrot.lane.b32.xlu0 %v7159_v32, %s5331_s16 }
0x15fb   : > { %4463 = vrot.lane.b32.xlu1 %v7229_v21, %s5332_s6 }
0x15fd   : > { %4461 = vrot.lane.b32.xlu0 %v7213_v51, %s5332_s6 }
0x15ff   : > { %4273 = vrot.lane.b32.xlu1 %v7237_v22, %s5329_s14  ;;  %s7742_s14 = sld [smem:[#allocation25_spill]] }
0x1601   : > { %4457 = vrot.lane.b32.xlu0 %v7189_v53, %s5332_s6 }
0x1603   : > { %4459 = vrot.lane.b32.xlu1 %v7205_v34, %s5332_s6 }
0x1605   : > { %4453 = vrot.lane.b32.xlu0 %v7159_v32, %s5332_s6  ;;  %v7296_v14 = vld [vmem:[%s7742_s14] sm:$0x77] }
0x1606   : > { %7743 = vst [vmem:[#allocation10_spill] sm:$0xff] %v7296_v14  ;;  %v4593_v19 = vcombine.high %v7296_v14, %v7296_v14 }
0x1607   : > { %4225 = vrot.lane.b32.xlu1 %v7237_v22, %s5330_s15 }
0x1608   : > { %4661 = vmatprep.mubr.f32.mxu1 %v4593_v19 }
0x1609   : > { %4417 = vrot.lane.b32.xlu0 %v7213_v51, %s7712_s4 }
0x160b   : > { %4455 = vrot.lane.b32.xlu1 %v7180_v23, %s5332_s6 }
0x160d   : > { %4509 = vrot.lane.b32.xlu0 %v7237_v22, %s5331_s16  ;;  %s7744_s16 = sld [smem:[#allocation26_spill]] }
0x160f   : > { %4451 = vrot.lane.b32.xlu1 %v7157_v46, %s5332_s6 }
0x1611   : > { %4413 = vrot.lane.b32.xlu0 %v7189_v53, %s7712_s4 }
0x1613   : > { %4419 = vrot.lane.b32.xlu1 %v7229_v21, %s7712_s4  ;;  %v4585_v47 = vld [vmem:[%s7744_s16] sm:$0x7] }
0x1615   : > { %4465 = vrot.lane.b32.xlu0 %v7237_v22, %s5332_s6 }
0x1617   : > { %4415 = vrot.lane.b32.xlu1 %v7205_v34, %s7712_s4 }
0x1619   : > { %4409 = vrot.lane.b32.xlu0 %v7159_v32, %s7712_s4 }
0x161b   : > { %4411 = vrot.lane.b32.xlu1 %v7180_v23, %s7712_s4 }
0x161d   : > { %4421 = vrot.lane.b32.xlu0 %v7237_v22, %s7712_s4 }
0x161f   : > { %4407 = vrot.lane.b32.xlu1 %v7157_v46, %s7712_s4 }
0x1621   : > { %4549 = vrot.lane.b32.xlu0 %v7213_v51, %s5333_s28 }
0x1623   : > { %v4368_v6 = vpop.permute.xlu0 %4367  ;;  %4551 = vrot.lane.b32.xlu1 %v7229_v21, %s5333_s28 }
0x1625   : > { %4553 = vrot.lane.b32.xlu0 %v7237_v22, %s5333_s28  ;;  %v4356_v30 = vpop.permute.xlu1 %4355 }
0x1626   : > { %v7305_v25 = vsel %vm870_vm8, %v4368_v6, %v4356_v30  ;;  %v7308_v0 = vsel %vm870_vm8, %v4356_v30, %v4368_v6 }
0x1627   : > { %v4324_v3 = vpop.permute.xlu0 %4323  ;;  %4547 = vrot.lane.b32.xlu1 %v7205_v34, %s5333_s28 }
0x1629   : > { %4545 = vrot.lane.b32.xlu0 %v7189_v53, %s5333_s28  ;;  %v4312_v20 = vpop.permute.xlu1 %4311 }
0x162a   : > { %v7315_v41 = vsel %vm3167_vm14, %v4324_v3, %v4312_v20  ;;  %v7318_v10 = vsel %vm3167_vm14, %v4312_v20, %v4324_v3 }
0x162b   : > { %v4280_v13 = vpop.permute.xlu0 %4279  ;;  %4543 = vrot.lane.b32.xlu1 %v7180_v23, %s5333_s28 }
0x162d   : > { %4541 = vrot.lane.b32.xlu0 %v7159_v32, %s5333_s28  ;;  %v4268_v2 = vpop.permute.xlu1 %4267 }
0x162e   : > { %v7325_v39 = vsel %vm3109_vm15, %v4280_v13, %v4268_v2  ;;  %v7328_v26 = vsel %vm3109_vm15, %v4268_v2, %v4280_v13 }
0x162f   : > { %v4236_v27 = vpop.permute.xlu0 %4235  ;;  %4539 = vrot.lane.b32.xlu1 %v7157_v46, %s5333_s28 }
0x1631   : > { %v4220_v33 = vpop.permute.xlu1 %4219 }
0x1632   : > { %v7336_v4 = vsel %vm3052_vm0, %v4236_v27, %v4220_v33  ;;  %v7339_v48 = vsel %vm3052_vm0, %v4220_v33, %v4236_v27 }
0x1633   : > { %4588 = vperm.xlu1 %5215, %v4585_v47   ;;  %v4370_v55 = vpop.permute.xlu0 %4369 }
0x1635   : > { %v4500_v61 = vpop.permute.xlu1 %4499 }
0x1637   : > { %v4326_v40 = vpop.permute.xlu0 %4325 }
0x1639   : > { %v4358_v37 = vpop.permute.xlu1 %4357 }
0x163a   : > { %v4376_v32 = vsel %vm870_vm8, %v4370_v55, %v4358_v37  ;;  %v4388_v23 = vsel %vm870_vm8, %v4358_v37, %v4370_v55 }
0x163b   : > { %v7341_v24 = vpop.permute.xlu0 %4281 }
0x163d   : > { %v4314_v44 = vpop.permute.xlu1 %4313 }
0x163f   : > { %v7343_v12 = vpop.permute.xlu0 %4237 }
0x1641   : > { %v7345_v31 = vpop.permute.xlu1 %4269 }
0x1643   : > { %v4502_v62 = vpop.permute.xlu0 %4501 }
0x1644   : > { %v7348_v57 = vsel %vm3415_vm1, %v4500_v61, %v4502_v62  ;;  %v7351_v49 = vsel %vm3415_vm1, %v4502_v62, %v4500_v61 }
0x1645   : > { %v7353_v38 = vpop.permute.xlu1 %4221 }
0x1647   : > { %v4372_v43 = vpop.permute.xlu0 %4371 }
0x1649   : > { %v7355_v1 = vpop.permute.xlu1 %4503 }
0x164b   : > { %v4328_v50 = vpop.permute.xlu0 %4327 }
0x164d   : > { %v4360_v63 = vpop.permute.xlu1 %4359 }
0x164e   : > { %v4377_v27 = vsel %vm870_vm8, %v4372_v43, %v4360_v63  ;;  %v4389_v61 = vsel %vm870_vm8, %v4360_v63, %v4372_v43  ;;  %v4393_v63 = vmul.f32 %v4388_v23, %v6715_v9 }
0x164f   : > { %v7357_v45 = vpop.permute.xlu0 %4283  ;;  %v4396_v53 = vmul.f32 %v4377_v27, %v6718_v42  ;;  %v4395_v51 = vmul.f32 %v4389_v61, %v6715_v9  ;;  %v4348_v61 = vmul.f32 %v7315_v41, %v6750_v52 }
0x1651   : > { %v4316_v7 = vpop.permute.xlu1 %4315 }
0x1652   : > { %v4333_v37 = vsel %vm3167_vm14, %v4328_v50, %v4316_v7 }
0x1653   : > { %v7359_v60 = vpop.permute.xlu0 %4239 }
0x1655   : > { %v4272_v6 = vpop.permute.xlu1 %4271 }
0x1657   : > { %v7361_v19 = vpop.permute.xlu0 %4505 }
0x1659   : > { %v7363_v30 = vpop.permute.xlu1 %4223 }
0x165b   : > { %v4374_v3 = vpop.permute.xlu0 %4373 }
0x165d   : > { %v7365_v20 = vpop.permute.xlu1 %4507 }
0x165f   : > { %v4330_v13 = vpop.permute.xlu0 %4329 }
0x1661   : > { %v4362_v2 = vpop.permute.xlu1 %4361 }
0x1662   : > { %v4378_v47 = vsel %vm870_vm8, %v4374_v3, %v4362_v2  ;;  %v4390_v33 = vsel %vm870_vm8, %v4362_v2, %v4374_v3  ;;  %v4394_v3 = vmul.f32 %v4376_v32, %v6718_v42  ;;  %v4392_v2 = vmul.f32 %v7305_v25, %v6718_v42 }
0x1663   : > { %v4397_v62 = vmul.f32 %v4390_v33, %v6715_v9  ;;  %v4398_v14 = vmul.f32 %v4378_v47, %v6718_v42  ;;  %v4286_v46 = vpop.permute.xlu0 %4285  ;;  %v4332_v42 = vsel %vm3167_vm14, %v4326_v40, %v4314_v44  ;;  %v4352_v25 = vmul.f32 %v4333_v37, %v6750_v52 }
0x1665   : > { %4597 = vmatprep.subr.mxu1 %v4398_v14  ;;  %v7376_v34 = vpop.permute.xlu1 %4495  ;;  %v4391_v14 = vmul.f32 %v7308_v0, %v6715_v9  ;;  %v4344_v9 = vsel %vm3167_vm14, %v4314_v44, %v4326_v40  ;;  %v4347_v44 = vmul.f32 %v7318_v10, %v6746_v11 }
0x1666   : > { %4598 = vmatpush1.msra.mxu1 %v4397_v62  ;;  %v4349_v33 = vmul.f32 %v4344_v9, %v6746_v11  ;;  %v4289_v62 = vsel %vm3109_vm15, %v7357_v45, %v4272_v6 }
0x1667   : > { %v7380_v43 = vpop.permute.xlu0 %4241  ;;  %4599 = vmatprep.subr.mxu1 %v4396_v53  ;;  %v4345_v53 = vsel %vm3167_vm14, %v4316_v7, %v4328_v50  ;;  %v4350_v50 = vmul.f32 %v4332_v42, %v6750_v52  ;;  %v4308_v10 = vmul.f32 %v4289_v62, %v6789_v29  ;;  %v4513_v62 = vsel %vm3415_vm1, %v7355_v1, %v7361_v19 }
0x1668   : > { %4600 = vmatpush1.msra.mxu1 %v4395_v51 }
0x1669   : > { %4601 = vmatprep.subr.mxu1 %v4394_v3  ;;  %v4318_v55 = vpop.permute.xlu1 %4317 }
0x166a   : > { %v4334_v27 = vsel %vm3167_vm14, %v4330_v13, %v4318_v55  ;;  %v4346_v32 = vsel %vm3167_vm14, %v4318_v55, %v4330_v13  ;;  %4602 = vmatpush1.msra.mxu1 %v4393_v63  ;;  %v4351_v13 = vmul.f32 %v4345_v53, %v6746_v11  ;;  %v4245_v53 = vsel %vm3052_vm0, %v7359_v60, %v7363_v30 }
0x166b   : > { %v4353_v23 = vmul.f32 %v4346_v32, %v6746_v11  ;;  %v4354_v51 = vmul.f32 %v4334_v27, %v6750_v52  ;;  %v7393_v47 = vpop.permute.xlu0 %4497  ;;  %4603 = vmatprep.subr.mxu1 %v4392_v2  ;;  %v4301_v2 = vsel %vm3109_vm15, %v4272_v6, %v7357_v45  ;;  %v4288_v11 = vsel %vm3109_vm15, %v7341_v24, %v7345_v31 }
0x166c   : > { %4604 = vmatpush1.msra.mxu1 %v4391_v14  ;;  %v4307_v6 = vmul.f32 %v4301_v2, %v6785_v16  ;;  %v4306_v14 = vmul.f32 %v4288_v11, %v6789_v29  ;;  %v4304_v32 = vmul.f32 %v7325_v39, %v6789_v29  ;;  %v4264_v9 = vmul.f32 %v4245_v53, %v6832_v36 }
0x166d   : > { %4605 = vmatprep.subr.mxu1 %v4354_v51  ;;  %v7398_v0 = vpop.permute.xlu1 %4463 }
0x166e   : > { %4606 = vmatpush1.msra.mxu1 %v4353_v23 }
0x166f   : > { %v7402_v7 = vpop.permute.xlu0 %4461  ;;  %4607 = vmatprep.subr.mxu1 %v4352_v25 }
0x1670   : > { %4608 = vmatpush1.msra.mxu1 %v4351_v13 }
0x1671   : > { %4609 = vmatprep.subr.mxu1 %v4350_v50  ;;  %v4274_v40 = vpop.permute.xlu1 %4273 }
0x1672   : > { %v4290_v3 = vsel %vm3109_vm15, %v4286_v46, %v4274_v40  ;;  %v4302_v63 = vsel %vm3109_vm15, %v4274_v40, %v4286_v46  ;;  %4610 = vmatpush1.msra.mxu1 %v4349_v33  ;;  %v4300_v46 = vsel %vm3109_vm15, %v7345_v31, %v7341_v24  ;;  %v4303_v31 = vmul.f32 %v7328_v26, %v6785_v16 }
0x1673   : > { %v4309_v55 = vmul.f32 %v4302_v63, %v6785_v16  ;;  %v4310_v52 = vmul.f32 %v4290_v3, %v6789_v29  ;;  %v7417_v41 = vpop.permute.xlu0 %4457  ;;  %4611 = vmatprep.subr.mxu1 %v4348_v61  ;;  %v4305_v27 = vmul.f32 %v4300_v46, %v6785_v16  ;;  %v4257_v29 = vsel %vm3052_vm0, %v7363_v30, %v7359_v60 }
0x1674   : > { %4612 = vmatpush1.msra.mxu1 %v4347_v44  ;;  %v4244_v26 = vsel %vm3052_vm0, %v7343_v12, %v7353_v38  ;;  %v4263_v30 = vmul.f32 %v4257_v29, %v6828_v35  ;;  %v4259_v40 = vmul.f32 %v7339_v48, %v6828_v35  ;;  %v4529_v44 = vsel %vm3415_vm1, %v7361_v19, %v7355_v1 }
0x1675   : > { %4613 = vmatprep.subr.mxu1 %v4310_v52  ;;  %v7426_v45 = vpop.permute.xlu1 %4459  ;;  %v4262_v25 = vmul.f32 %v4244_v26, %v6832_v36  ;;  %v4535_v48 = vmul.f32 %v4513_v62, %v6878_v17  ;;  %v4527_v63 = vsel %vm3415_vm1, %v7393_v47, %v7376_v34  ;;  %v4534_v1 = vmul.f32 %v7351_v49, %v6874_v59 }
0x1676   : > { %4614 = vmatpush1.msra.mxu1 %v4309_v55  ;;  %v4511_v19 = vsel %vm3415_vm1, %v7376_v34, %v7393_v47  ;;  %v4533_v55 = vmul.f32 %v7348_v57, %v6878_v17  ;;  %v4532_v11 = vmul.f32 %v4527_v63, %v6874_v59  ;;  %v4485_v34 = vsel %vm3357_vm2, %v7402_v7, %v7426_v45 }
0x1677   : > { %v7430_v37 = vpop.permute.xlu0 %4453  ;;  %4615 = vmatprep.subr.mxu1 %v4308_v10  ;;  %v4531_v10 = vmul.f32 %v4511_v19, %v6878_v17  ;;  %v4469_v57 = vsel %vm3357_vm2, %v7426_v45, %v7402_v7  ;;  %v7745_v19 = vld [vmem:[#allocation9_spill] sm:$0xff] }
0x1678   : > { %4616 = vmatpush1.msra.mxu1 %v4307_v6 }
0x1679   : > { %4617 = vmatprep.subr.mxu1 %v4306_v14  ;;  %v4226_v24 = vpop.permute.xlu1 %4225 }
0x167a   : > { %v4246_v23 = vsel %vm3052_vm0, %v7380_v43, %v4226_v24  ;;  %v4258_v51 = vsel %vm3052_vm0, %v4226_v24, %v7380_v43  ;;  %4618 = vmatpush1.msra.mxu1 %v4305_v27  ;;  %v4256_v43 = vsel %vm3052_vm0, %v7353_v38, %v7343_v12  ;;  %v4260_v12 = vmul.f32 %v7336_v4, %v6832_v36 }
0x167b   : > { %v4265_v39 = vmul.f32 %v4258_v51, %v6828_v35  ;;  %v4266_v42 = vmul.f32 %v4246_v23, %v6832_v36  ;;  %v7449_v16 = vpop.permute.xlu0 %4417  ;;  %4619 = vmatprep.subr.mxu1 %v4304_v32  ;;  %v4261_v50 = vmul.f32 %v4256_v43, %v6828_v35  ;;  %v4491_v32 = vmul.f32 %v4469_v57, %v6915_v18 }
0x167c   : > { %4620 = vmatpush1.msra.mxu1 %v4303_v31 }
0x167d   : > { %4621 = vmatprep.subr.mxu1 %v4266_v42  ;;  %v4456_v60 = vpop.permute.xlu1 %4455 }
0x167e   : > { %4622 = vmatpush1.msra.mxu1 %v4265_v39  ;;  %v4468_v14 = vsel %vm3357_vm2, %v4456_v60, %v7417_v41 }
0x167f   : > { %v4510_v13 = vpop.permute.xlu0 %4509  ;;  %4623 = vmatprep.subr.mxu1 %v4264_v9  ;;  %v4489_v53 = vmul.f32 %v4468_v14, %v6915_v18 }
0x1680   : > { %v4530_v33 = vsel %vm3415_vm1, %v4510_v13, %v7365_v20  ;;  %4624 = vmatpush1.msra.mxu1 %v4263_v30  ;;  %v4514_v38 = vsel %vm3415_vm1, %v7365_v20, %v4510_v13  ;;  %v4536_v20 = vmul.f32 %v4529_v44, %v6874_v59 }
0x1681   : > { %4625 = vmatprep.subr.mxu1 %v4262_v25  ;;  %v4452_v61 = vpop.permute.xlu1 %4451  ;;  %v4538_v3 = vmul.f32 %v4530_v33, %v6874_v59  ;;  %v4537_v4 = vmul.f32 %v4514_v38, %v6878_v17  ;;  %v4484_v59 = vsel %vm3357_vm2, %v7417_v41, %v4456_v60  ;;  %v4492_v17 = vmul.f32 %v4485_v34, %v6909_v58  ;;  %v7748_v34 = vld [vmem:[#allocation5_spill] sm:$0xff] }
0x1682   : > { %4626 = vmatpush1.msra.mxu1 %v4261_v50  ;;  %v4483_v7 = vsel %vm3357_vm2, %v7430_v37, %v4452_v61  ;;  %v4490_v45 = vmul.f32 %v4484_v59, %v6909_v58  ;;  %v4467_v24 = vsel %vm3357_vm2, %v4452_v61, %v7430_v37  ;;  %v4401_v57 = vmul.f32 %v7748_v34, %v6967_v28  ;;  %v7749_v59 = vld [vmem:[#allocation6_spill] sm:$0xff] }
0x1683   : > { %v4414_v36 = vpop.permute.xlu0 %4413  ;;  %4627 = vmatprep.subr.mxu1 %v4260_v12  ;;  %v4488_v41 = vmul.f32 %v4483_v7, %v6909_v58  ;;  %v4487_v39 = vmul.f32 %v4467_v24, %v6915_v18  ;;  %v7752_v24 = vld [vmem:[#allocation10_spill] sm:$0xff] }
0x1684   : > { %4628 = vmatpush1.msra.mxu1 %v4259_v40 }
0x1685   : > { %4629 = vmatprep.subr.mxu1 %v4538_v3  ;;  %v4420_v35 = vpop.permute.xlu1 %4419 }
0x1686   : > { %4630 = vmatpush2.msra.mxu1 %v4537_v4 }
0x1687   : > { %v4466_v2 = vpop.permute.xlu0 %4465  ;;  %4631 = vmatprep.subr.mxu1 %v4536_v20 }
0x1688   : > { %v4486_v52 = vsel %vm3357_vm2, %v4466_v2, %v7398_v0  ;;  %4632 = vmatpush2.msra.mxu1 %v4535_v48  ;;  %v4470_v46 = vsel %vm3357_vm2, %v7398_v0, %v4466_v2  ;;  %v4404_v2 = vmul.f32 %v7745_v19, %v6964_v15 }
0x1689   : > { %4633 = vmatprep.subr.mxu1 %v4534_v1  ;;  %v4416_v49 = vpop.permute.xlu1 %4415  ;;  %v4494_v47 = vmul.f32 %v4486_v52, %v6909_v58  ;;  %v4493_v0 = vmul.f32 %v4470_v46, %v6915_v18 }
0x168a   : > { %4634 = vmatpush2.msra.mxu1 %v4533_v55  ;;  %v4441_v42 = vsel %vm3299_vm3, %v7449_v16, %v4416_v49  ;;  %v4425_v37 = vsel %vm3299_vm3, %v4416_v49, %v7449_v16 }
0x168b   : > { %v4410_v6 = vpop.permute.xlu0 %4409  ;;  %4635 = vmatprep.subr.mxu1 %v4532_v11  ;;  %v4448_v60 = vmul.f32 %v4441_v42, %v6935_v8  ;;  %v4447_v25 = vmul.f32 %v4425_v37, %v6940_v54  ;;  %v7746_v11 = vld [vmem:[#allocation8_spill] sm:$0xff] }
0x168c   : > { %4636 = vmatpush2.msra.mxu1 %v4531_v10 }
0x168d   : > { %4637 = vmatprep.subr.mxu1 %v4494_v47  ;;  %v4412_v27 = vpop.permute.xlu1 %4411 }
0x168e   : > { %4638 = vmatpush2.msra.mxu1 %v4493_v0  ;;  %v4440_v9 = vsel %vm3299_vm3, %v4414_v36, %v4412_v27  ;;  %v4424_v18 = vsel %vm3299_vm3, %v4412_v27, %v4414_v36  ;;  %v4400_v0 = vmul.f32 %v7749_v59, %v6964_v15  ;;  %v7750_v27 = vld [vmem:[#allocation7_spill] sm:$0xff] }
0x168f   : > { %v4422_v31 = vpop.permute.xlu0 %4421  ;;  %4639 = vmatprep.subr.mxu1 %v4492_v17  ;;  %v4446_v16 = vmul.f32 %v4440_v9, %v6935_v8  ;;  %v4445_v12 = vmul.f32 %v4424_v18, %v6940_v54 }
0x1690   : > { %v4442_v23 = vsel %vm3299_vm3, %v4422_v31, %v4420_v35  ;;  %4640 = vmatpush2.msra.mxu1 %v4491_v32  ;;  %v4426_v51 = vsel %vm3299_vm3, %v4420_v35, %v4422_v31  ;;  %v4399_v32 = vmul.f32 %v7750_v27, %v6967_v28 }
0x1691   : > { %4641 = vmatprep.subr.mxu1 %v4490_v45  ;;  %v4408_v29 = vpop.permute.xlu1 %4407  ;;  %v4450_v26 = vmul.f32 %v4442_v23, %v6935_v8  ;;  %v4449_v58 = vmul.f32 %v4426_v51, %v6940_v54 }
0x1692   : > { %4642 = vmatpush2.msra.mxu1 %v4489_v53  ;;  %v4439_v13 = vsel %vm3299_vm3, %v4410_v6, %v4408_v29  ;;  %v4423_v50 = vsel %vm3299_vm3, %v4408_v29, %v4410_v6 }
0x1693   : > { %v4550_v43 = vpop.permute.xlu0 %4549  ;;  %4643 = vmatprep.subr.mxu1 %v4488_v41  ;;  %v4444_v40 = vmul.f32 %v4439_v13, %v6935_v8  ;;  %v4443_v36 = vmul.f32 %v4423_v50, %v6940_v54  ;;  %v4406_v8 = vmul.f32 %v7237_v22, %v6964_v15  ;;  %v4405_v54 = vmul.f32 %v7229_v21, %v6967_v28  ;;  %v7747_v21 = vld [vmem:[#allocation4_spill] sm:$0xff] }
0x1694   : > { %4644 = vmatpush2.msra.mxu1 %v4487_v39  ;;  %v4403_v22 = vmul.f32 %v7746_v11, %v6967_v28  ;;  %v4402_v10 = vmul.f32 %v7747_v21, %v6964_v15  ;;  %v4584_v15 = vld [vmem:[%s7742_s14 + $0x8] sm:$0x7] }
0x1695   : > { %4645 = vmatprep.subr.mxu1 %v4450_v26  ;;  %v4552_v30 = vpop.permute.xlu1 %4551 }
0x1696   : > { %4646 = vmatpush2.msra.mxu1 %v4449_v58 }
0x1697   : > { %v4554_v33 = vpop.permute.xlu0 %4553  ;;  %4647 = vmatprep.subr.mxu1 %v4448_v60 }
0x1698   : > { %v4558_v38 = vsel %vm3473_vm4, %v4552_v30, %v4554_v33  ;;  %v4574_v61 = vsel %vm3473_vm4, %v4554_v33, %v4552_v30  ;;  %4648 = vmatpush2.msra.mxu1 %v4447_v25 }
0x1699   : > { %v4581_v44 = vmul.f32 %v4558_v38, %v6986_v56  ;;  %v4582_v62 = vmul.f32 %v4574_v61, %v6981_v5  ;;  %4649 = vmatprep.subr.mxu1 %v4446_v16  ;;  %v4548_v3 = vpop.permute.xlu1 %4547 }
0x169a   : > { %v4557_v4 = vsel %vm3473_vm4, %v4548_v3, %v4550_v43  ;;  %v4573_v20 = vsel %vm3473_vm4, %v4550_v43, %v4548_v3  ;;  %4650 = vmatpush2.msra.mxu1 %v4445_v12 }
0x169b   : > { %v4579_v35 = vmul.f32 %v4557_v4, %v6986_v56  ;;  %v4580_v48 = vmul.f32 %v4573_v20, %v6981_v5  ;;  %v4546_v63 = vpop.permute.xlu0 %4545  ;;  %4651 = vmatprep.subr.mxu1 %v4444_v40  ;;  %4692 = vmatprep.subr.mxu0 %v4582_v62 }
0x169c   : > { %4652 = vmatpush2.msra.mxu1 %v4443_v36  ;;  %4693 = vmatpush1.msra.mxu0 %v4581_v44 }
0x169d   : > { %4653 = vmatprep.subr.mxu1 %v4406_v8  ;;  %4694 = vmatprep.subr.mxu0 %v4580_v48  ;;  %v4544_v1 = vpop.permute.xlu1 %4543 }
0x169e   : > { %v4556_v55 = vsel %vm3473_vm4, %v4544_v1, %v4546_v63  ;;  %v4572_v52 = vsel %vm3473_vm4, %v4546_v63, %v4544_v1  ;;  %4654 = vmatpush2.msra.mxu1 %v4405_v54  ;;  %4695 = vmatpush1.msra.mxu0 %v4579_v35 }
0x169f   : > { %v4577_v46 = vmul.f32 %v4556_v55, %v6986_v56  ;;  %v4578_v49 = vmul.f32 %v4572_v52, %v6981_v5  ;;  %4655 = vmatprep.subr.mxu1 %v4404_v2  ;;  %v4542_v47 = vpop.permute.xlu0 %4541 }
0x16a0   : > { %4656 = vmatpush2.msra.mxu1 %v4403_v22 }
0x16a1   : > { %4657 = vmatprep.subr.mxu1 %v4402_v10  ;;  %4696 = vmatprep.subr.mxu0 %v4578_v49  ;;  %v4540_v6 = vpop.permute.xlu1 %4539 }
0x16a2   : > { %v4555_v17 = vsel %vm3473_vm4, %v4540_v6, %v4542_v47  ;;  %v4571_v14 = vsel %vm3473_vm4, %v4542_v47, %v4540_v6  ;;  %4658 = vmatpush2.msra.mxu1 %v4401_v57  ;;  %4697 = vmatpush1.msra.mxu0 %v4577_v46 }
0x16a3   : > { %v4575_v7 = vmul.f32 %v4555_v17, %v6986_v56  ;;  %v4576_v45 = vmul.f32 %v4571_v14, %v6981_v5  ;;  %4659 = vmatprep.subr.mxu1 %v4400_v0 }
0x16a4   : > { %4660 = vmatpush2.msra.mxu1 %v4399_v32 }
0x16a5   : > { %4662 = vmatmul.mubr.f32.vlgmr.msra.gmra.mxu1 %v7752_v24  ;;  %4698 = vmatprep.subr.mxu0 %v4576_v45 }
0x16a6   : > { %4699 = vmatpush1.msra.mxu0 %v4575_v7 }
0x16a7   : > { %4897 = vmatmul.mubr.msk.f32.vlgmr.msra.gmra.mxu0 %vm1090_vm12, %v4584_v15 }
0x16ae   : > { %v4589_v31 = vpop.permute.xlu1 %4588 }
0x1765   : > { %v4663_v53 = vpop.f32.mrf.mxu1 }
0x1766   : > { %v4664_v28 = vadd.f32 %v4663_v53, %v4589_v31 }
0x1767   : > { %v4665_v23 = vpop.f32.mrf.mxu1  ;;  %v4734_v56 = vpop.f32.mrf.mxu0 }
0x1768   : > { %v4666_v41 = vadd.f32 %v4665_v23, %v4589_v31  ;;  %v4735_v5 = vadd.f32 %v4734_v56, %v4664_v28 }
0x1769   : > { %v4736_v51 = vpop.f32.mrf.mxu0 }
0x176a   : > { %v4739_v29 = vmul.f32 0.5, %v4735_v5  ;;  %v4737_v39 = vadd.f32 %v4736_v51, %v4666_v41 }
0x176c   : > { %v4740_v42 = vmul.f32 0.5, %v4737_v39  ;;  %v4741_v37 = vadd.f32 0.5, %v4739_v29 }
0x176e   : > { %v4742_v26 = vadd.f32 0.5, %v4740_v42 }
0x1770   : > { %v4745_v43 = vcombine.low %v4741_v37, %v4742_v26 }
0x1772   : > { %4747 = vst [vmem:[%s734_s25] sm:$0x77] %v4745_v43 }
0x1773 PF: > { %s7754_s24 = sld [smem:[#allocation2_spill]] }
0x1779   : > { %s34_s5 = sadd.s32 1, %s7754_s24  }
0x177a   : > { %p31_p4 = scmp.ge.s32.totalorder %s34_s5, 4  }
0x177c   :  { %33 = sbr.rel (!%p31_p4) target bundleno = 21 (0x15), region = 154 }

</bundles_post_ra>
